<compile_context>
chip_gen: v5e
topology: v5e:2x2
jax: 0.10.0
libtpu: 0.0.40
codegen_flags: <defaults>
</compile_context>

<pallas_src>
import functools

import jax
import jax.numpy as jnp
from jax import lax
from jax.experimental import pallas as pl
from jax.experimental.pallas import tpu as pltpu

EPS = 1e-5  # nn.BatchNorm2d default eps


def _round_up(x, m):
    return ((x + m - 1) // m) * m


def _vmem_cap_bytes():
    """Generation-aware scoped-VMEM cap (~3/4 of physical per-core VMEM)."""
    cap = 64 << 20  # conservative (v7x-sized) fallback
    try:
        info = pltpu.get_tpu_info()
        cap = int(getattr(info, "vmem_capacity_bytes", 0)) or cap
    except Exception:
        pass
    return (cap * 3) // 4


def _pick_images_per_block(n, hw, cpad, vmem_budget):
    """Whole images per grid block: biggest block fitting the budget, capped at ~4K
    rows (pipelining / megacore load balance), preferring >= 2 blocks."""
    per_row = cpad * (2 * 4 + 2 * 2 + 4 + 8 * 4)   # x dbuf + out dbuf + staging + f32 temps
    max_rows = max(hw, vmem_budget // per_row)
    bt = 1
    for cand in range(1, n + 1):
        if n % cand:
            continue
        rows = cand * hw
        if cand > 1 and rows % 8 != 0:
            continue                                # multi-block shapes need 8-aligned rows
        if rows > max_rows or rows > 4096:
            break
        bt = cand
    if bt == n and n > 1:                           # prefer >=2 blocks (v7x megacore, overlap)
        smaller = [d for d in range(1, n) if n % d == 0 and (d == 1 or (d * hw) % 8 == 0)]
        if smaller:
            bt = smaller[-1]
    if (n // bt) > 1 and (bt * hw) % 8 != 0:
        # TODO(synk): intra-image row tiling for H*W not a multiple of 8 / huge images.
        bt = n
    return bt


# ---- pass 1: per-block BN1 partial statistics -------------------------------------

def _bn_stats_kernel(x_ref, st_ref):
    x = x_ref[...]                                   # (Rb, C) f32
    rb = x.shape[0]
    s = jnp.sum(x, axis=0, keepdims=True)            # (1, C)
    d = x - s * (1.0 / rb)                           # centered at block mean
    m2 = jnp.sum(d * d, axis=0, keepdims=True)       # (1, C)
    st_ref[0:1, :] = s
    st_ref[1:2, :] = m2


# ---- pass 2: BN1-apply + ReLU + 3x3 conv + per-block BN2 partial stats ------------

def _conv3_kernel(x_ref, s1_ref, b1_ref, w3_ref, acc_ref, st_ref, hp_ref, *, H, W, PAD):
    Rb, C = x_ref.shape

    # BatchNorm #1 (precomputed scale/shift) + ReLU, in f32.
    h = jnp.maximum(x_ref[...] * s1_ref[...] + b1_ref[...], 0.0)

    # Stage into the halo'd scratch; only the halo rows are zeroed (body overwritten).
    # Staging stays f32: tap reads start at odd row offsets (dy*W+dx), and packed-bf16
    # sublane realignment is avoided; the slab is small now that im2col is gone.
    hp_ref[pl.ds(0, PAD), :] = jnp.zeros((PAD, C), jnp.float32)
    hp_ref[pl.ds(PAD + Rb, PAD), :] = jnp.zeros((PAD, C), jnp.float32)
    hp_ref[pl.ds(PAD, Rb), :] = h

    # Row-edge masks from a block-local iota.  Rows per block are bounded by the VMEM
    # budget (<< 2^22), so the f32 floor-division modulus below is exact.
    rowf = lax.broadcasted_iota(jnp.int32, (Rb, 1), 0).astype(jnp.float32)
    w_id = rowf - jnp.floor((rowf + 0.5) * (1.0 / W)) * W                 # row % W
    r_hw = rowf - jnp.floor((rowf + 0.5) * (1.0 / (H * W))) * (H * W)     # row % (H*W)
    wL = jnp.where(w_id > 0.5, 1.0, 0.0)                  # left neighbour in-bounds
    wR = jnp.where(w_id < W - 1.5, 1.0, 0.0)              # right neighbour in-bounds
    hU = jnp.where(r_hw > W - 0.5, 1.0, 0.0)              # upper neighbour in-bounds
    hD = jnp.where(r_hw < (H - 1) * W - 0.5, 1.0, 0.0)    # lower neighbour in-bounds
    wmask = {-1: wL, 0: None, 1: wR}
    hmask = {-1: hU, 0: None, 1: hD}

    # 3x3 conv: 9 shifted-slab MXU matmuls (bf16 operands, f32 accumulation).  The
    # per-row 0/1 mask commutes with the matmul, so it is applied to the f32 tap
    # output (all mask math stays f32, no extra casts).
    acc = jnp.zeros((Rb, C), jnp.float32)
    t = 0
    for dy in (-1, 0, 1):
        for dx in (-1, 0, 1):
            off = dy * W + dx
            slab = hp_ref[pl.ds(PAD + off, Rb), :].astype(jnp.bfloat16)
            contrib = jnp.dot(slab, w3_ref[t], preferred_element_type=jnp.float32)
            if wmask[dx] is not None:
                contrib = contrib * wmask[dx]
            if hmask[dy] is not None:
                contrib = contrib * hmask[dy]
            acc = acc + contrib
            t += 1

    # Per-block BN2 partial stats from the f32 accumulator (centered at block mean).
    s2 = jnp.sum(acc, axis=0, keepdims=True)
    dc = acc - s2 * (1.0 / Rb)
    m2 = jnp.sum(dc * dc, axis=0, keepdims=True)
    st_ref[0:1, :] = s2
    st_ref[1:2, :] = m2

    acc_ref[...] = acc.astype(acc_ref.dtype)
    # TODO(synk): running_mean / running_var updates (training-time side effect of
    # nn.BatchNorm2d) are not modeled; they do not affect the forward output.


# ---- pass 3: BN2-apply + ReLU + 1x1 conv + residual -------------------------------

def _final_kernel(x_ref, a_ref, s2_ref, b2_ref, w1_ref, o_ref):
    h2 = jnp.maximum(a_ref[...].astype(jnp.float32) * s2_ref[...] + b2_ref[...], 0.0)
    y = jnp.dot(h2.astype(jnp.bfloat16), w1_ref[...], preferred_element_type=jnp.float32)
    o_ref[...] = x_ref[...] + y


@jax.jit
def resblock_pallas(x_nchw, params):
    N, C, H, W = x_nchw.shape
    HW = H * W
    NHW = N * HW
    Cpad = _round_up(max(C, 1), 128)
    PAD = _round_up(W + 1, 8)          # halo >= W+1 rows, sublane-aligned

    cap = _vmem_cap_bytes()
    bT = _pick_images_per_block(N, HW, Cpad, cap // 2)
    Rb = bT * HW
    nblk = N // bT

    # NCHW -> (N*H*W, C) channels-last slab (channels on the lane axis).
    # TODO(synk): for small C (like the C=4 test shape) this wastes most of the 128
    # lanes and the MXU; real ResNet blocks (C >= 128) are the target regime and a
    # W*C lane-folded layout would be needed to make tiny C efficient.
    x2 = jnp.transpose(x_nchw, (0, 2, 3, 1)).reshape(NHW, C).astype(jnp.float32)

    g1 = params["bn1_gamma"].astype(jnp.float32)
    b1 = params["bn1_beta"].astype(jnp.float32)
    g2 = params["bn2_gamma"].astype(jnp.float32)
    b2 = params["bn2_beta"].astype(jnp.float32)
    # PyTorch OIHW -> (ky, kx, Cin, Cout) -> (9, Cin, Cout); bf16 MXU operands.
    w3 = jnp.transpose(params["conv3_w"], (2, 3, 1, 0)).reshape(9, C, C).astype(jnp.bfloat16)
    w1 = params["conv1_w"][:, :, 0, 0].T.astype(jnp.bfloat16)     # (Cin, Cout)

    # Honest per-block VMEM estimate (lane/sublane-padded) for the conv pass.
    Rp = _round_up(Rb, 8)
    est = (2 * Rp * Cpad * 4                  # x block, double-buffered, f32
           + 2 * Rp * Cpad * 2                # conv-out block, double-buffered, bf16
           + (Rp + 2 * PAD) * Cpad * 4        # halo'd staging scratch, f32
           + 9 * _round_up(C, 8) * Cpad * 2   # conv3 weights, bf16
           + 8 * Rp * Cpad * 4                # f32 temporaries (h, acc, tap product, masks)
           + (4 << 20))                       # headroom
    vmem_limit = int(min(cap, max(32 << 20, est)))
    cparams = pltpu.CompilerParams(dimension_semantics=("parallel",),
                                   vmem_limit_bytes=vmem_limit)

    row_spec = pl.BlockSpec((Rb, C), lambda i: (i, 0))
    vec_spec = pl.BlockSpec((1, C), lambda i: (0, 0))
    st_spec = pl.BlockSpec((None, 2, C), lambda i: (i, 0, 0))

    # ---- pass 1 ----
    st1 = pl.pallas_call(
        _bn_stats_kernel,
        out_shape=jax.ShapeDtypeStruct((nblk, 2, C), jnp.float32),
        grid=(nblk,),
        in_specs=[row_spec],
        out_specs=st_spec,
        compiler_params=cparams,
    )(x2)

    def combine(st):
        # Pooled (Chan) combination of per-block centered sums: exact and stable.
        bsum, bm2 = st[:, 0, :], st[:, 1, :]
        mean = jnp.sum(bsum, axis=0) / NHW
        bmean = bsum / Rb
        m2 = jnp.sum(bm2, axis=0) + jnp.sum(Rb * (bmean - mean[None, :]) ** 2, axis=0)
        return mean, m2 / NHW                 # biased variance (BN training forward)

    mean1, var1 = combine(st1)
    inv1 = lax.rsqrt(var1 + EPS)
    scale1 = (g1 * inv1).reshape(1, C)
    shift1 = (b1 - mean1 * g1 * inv1).reshape(1, C)

    # ---- pass 2 ----
    acc_hbm, st2 = pl.pallas_call(
        functools.partial(_conv3_kernel, H=H, W=W, PAD=PAD),
        out_shape=(jax.ShapeDtypeStruct((NHW, C), jnp.bfloat16),
                   jax.ShapeDtypeStruct((nblk, 2, C), jnp.float32)),
        grid=(nblk,),
        in_specs=[row_spec, vec_spec, vec_spec,
                  pl.BlockSpec((9, C, C), lambda i: (0, 0, 0))],
        out_specs=(row_spec, st_spec),
        scratch_shapes=[pltpu.VMEM((Rb + 2 * PAD, C), jnp.float32)],
        compiler_params=cparams,
    )(x2, scale1, shift1, w3)

    mean2, var2 = combine(st2)
    inv2 = lax.rsqrt(var2 + EPS)
    scale2 = (g2 * inv2).reshape(1, C)
    shift2 = (b2 - mean2 * g2 * inv2).reshape(1, C)

    # ---- pass 3 ----
    out2 = pl.pallas_call(
        _final_kernel,
        out_shape=jax.ShapeDtypeStruct((NHW, C), jnp.float32),
        grid=(nblk,),
        in_specs=[row_spec, row_spec, vec_spec, vec_spec,
                  pl.BlockSpec((C, C), lambda i: (0, 0))],
        out_specs=row_spec,
        input_output_aliases={0: 0},          # reuse x2's HBM buffer for the output
        compiler_params=cparams,
    )(x2, acc_hbm, scale2, shift2, w1)

    return jnp.transpose(out2.reshape(N, H, W, C), (0, 3, 1, 2))


def resblock_ref(x, params):
    """Pure-JAX f32 reference (NCHW, matches PyTorch training-mode forward)."""
    def bn(v, g, b):
        mean = v.mean(axis=(0, 2, 3), keepdims=True)
        var = ((v - mean) ** 2).mean(axis=(0, 2, 3), keepdims=True)
        return (v - mean) * lax.rsqrt(var + EPS) * g.reshape(1, -1, 1, 1) + b.reshape(1, -1, 1, 1)

    h = jax.nn.relu(bn(x, params["bn1_gamma"], params["bn1_beta"]))
    h = lax.conv_general_dilated(h, params["conv3_w"], (1, 1), ((1, 1), (1, 1)),
                                 dimension_numbers=("NCHW", "OIHW", "NCHW"))
    h = jax.nn.relu(bn(h, params["bn2_gamma"], params["bn2_beta"]))
    h = lax.conv_general_dilated(h, params["conv1_w"], (1, 1), ((0, 0), (0, 0)),
                                 dimension_numbers=("NCHW", "OIHW", "NCHW"))
    return x + h


if __name__ == "__main__":
    N, C, H, W = 2, 4, 16, 16
    key = jax.random.PRNGKey(0)
    kx, k1, k2, k3, k4, k5, k6 = jax.random.split(key, 7)

    x = jax.random.normal(kx, (N, C, H, W), jnp.float32)
    params = {
        "bn1_gamma": 1.0 + 0.1 * jax.random.normal(k1, (C,), jnp.float32),
        "bn1_beta": 0.1 * jax.random.normal(k2, (C,), jnp.float32),
        "conv3_w": jax.random.normal(k3, (C, C, 3, 3), jnp.float32) / jnp.sqrt(9.0 * C),
        "bn2_gamma": 1.0 + 0.1 * jax.random.normal(k4, (C,), jnp.float32),
        "bn2_beta": 0.1 * jax.random.normal(k5, (C,), jnp.float32),
        "conv1_w": jax.random.normal(k6, (C, C, 1, 1), jnp.float32) / jnp.sqrt(1.0 * C),
    }

    out = jax.block_until_ready(resblock_pallas(x, params))
    ref = jax.block_until_ready(resblock_ref(x, params))

    assert out.shape == x.shape and out.dtype == x.dtype
    # The kernel feeds bf16 operands to the MXU (f32 accumulate) and stores the conv
    # intermediate in bf16, while the reference is all-f32 -> bf16-level tolerance.
    max_err = float(jnp.max(jnp.abs(out - ref)))
    if max_err > 6e-2:
        raise AssertionError(f"kernel mismatch vs reference: max abs err = {max_err}")
    print("KERNEL_OK")
</pallas_src>

<mosaic_0001>
module attributes {stable_mosaic.version = 11 : i64} {
  func.func @_bn_stats_kernel(%arg0: i32, %arg1: memref<256x4xf32, #tpu.memory_space<vmem>>, %arg2: memref<1x2x4xf32, #tpu.memory_space<vmem>>) attributes {dimension_semantics = [#tpu.dimension_semantics<parallel>], iteration_bounds = array<i64: 2>, scalar_prefetch = 0 : i64, scratch_operands = 0 : i64, tpu.core_type = #tpu.core_type<tc>, window_params = [{transform_indices = @transform_0, window_bounds = array<i64: 256, 4>}, {transform_indices = @transform_1, window_bounds = array<i64: 1, 2, 4>}]} {
    %c0 = arith.constant 0 : index
    %c0_0 = arith.constant 0 : index
    %0 = vector.load %arg1[%c0, %c0_0] : memref<256x4xf32, #tpu.memory_space<vmem>>, vector<256x4xf32>
    %cst = arith.constant dense<0.000000e+00> : vector<4xf32>
    %1 = vector.multi_reduction <add>, %0, %cst [0] : vector<256x4xf32> to vector<4xf32>
    %2 = vector.shape_cast %1 : vector<4xf32> to vector<1x4xf32>
    %cst_1 = arith.constant 3.906250e-03 : f32
    %3 = vector.broadcast %cst_1 : f32 to vector<1x4xf32>
    %4 = arith.mulf %2, %3 : vector<1x4xf32>
    %5 = vector.broadcast %4 : vector<1x4xf32> to vector<256x4xf32>
    %6 = arith.subf %0, %5 : vector<256x4xf32>
    %7 = arith.mulf %6, %6 : vector<256x4xf32>
    %cst_2 = arith.constant dense<0.000000e+00> : vector<4xf32>
    %8 = vector.multi_reduction <add>, %7, %cst_2 [0] : vector<256x4xf32> to vector<4xf32>
    %9 = vector.shape_cast %8 : vector<4xf32> to vector<1x4xf32>
    %c0_3 = arith.constant 0 : index
    %c0_4 = arith.constant 0 : index
    %c0_5 = arith.constant 0 : index
    %10 = vector.load %arg2[%c0_3, %c0_4, %c0_5] : memref<1x2x4xf32, #tpu.memory_space<vmem>>, vector<1x1x4xf32>
    %11 = vector.shape_cast %10 : vector<1x1x4xf32> to vector<1x4xf32>
    %12 = vector.shape_cast %2 : vector<1x4xf32> to vector<1x1x4xf32>
    tpu.vector_store %arg2[%c0_3, %c0_4, %c0_5], %12 {strides = array<i32>} : memref<1x2x4xf32, #tpu.memory_space<vmem>>, vector<1x1x4xf32>,
    %c0_6 = arith.constant 0 : index
    %c1 = arith.constant 1 : index
    %c0_7 = arith.constant 0 : index
    %13 = vector.load %arg2[%c0_6, %c1, %c0_7] : memref<1x2x4xf32, #tpu.memory_space<vmem>>, vector<1x1x4xf32>
    %14 = vector.shape_cast %13 : vector<1x1x4xf32> to vector<1x4xf32>
    %15 = vector.shape_cast %9 : vector<1x4xf32> to vector<1x1x4xf32>
    tpu.vector_store %arg2[%c0_6, %c1, %c0_7], %15 {strides = array<i32>} : memref<1x2x4xf32, #tpu.memory_space<vmem>>, vector<1x1x4xf32>,
    return
  }
  func.func @transform_0(%arg0: i32) -> (i32, i32) {
    %c0_i32 = arith.constant 0 : i32
    %c0_i32_0 = arith.constant 0 : i32
    return %arg0, %c0_i32 : i32, i32
  }
  func.func @transform_1(%arg0: i32) -> (i32, i32, i32) {
    %c0_i32 = arith.constant 0 : i32
    %c0_i32_0 = arith.constant 0 : i32
    %c0_i32_1 = arith.constant 0 : i32
    return %arg0, %c0_i32, %c0_i32_0 : i32, i32, i32
  }
}

module attributes {stable_mosaic.version = 11 : i64} {
  func.func @_final_kernel(%arg0: i32, %arg1: memref<256x4xf32, #tpu.memory_space<vmem>>, %arg2: memref<256x4xbf16, #tpu.memory_space<vmem>>, %arg3: memref<1x4xf32, #tpu.memory_space<vmem>>, %arg4: memref<1x4xf32, #tpu.memory_space<vmem>>, %arg5: memref<4x4xbf16, #tpu.memory_space<vmem>>, %arg6: memref<256x4xf32, #tpu.memory_space<vmem>>) attributes {dimension_semantics = [#tpu.dimension_semantics<parallel>], iteration_bounds = array<i64: 2>, scalar_prefetch = 0 : i64, scratch_operands = 0 : i64, tpu.core_type = #tpu.core_type<tc>, window_params = [{transform_indices = @transform_0, window_bounds = array<i64: 256, 4>}, {transform_indices = @transform_1, window_bounds = array<i64: 256, 4>}, {pipeline_mode = #tpu.pipeline_mode<synchronous>, transform_indices = @transform_2, window_bounds = array<i64: 1, 4>}, {pipeline_mode = #tpu.pipeline_mode<synchronous>, transform_indices = @transform_3, window_bounds = array<i64: 1, 4>}, {pipeline_mode = #tpu.pipeline_mode<synchronous>, transform_indices = @transform_4, window_bounds = array<i64: 4, 4>}, {transform_indices = @transform_5, window_bounds = array<i64: 256, 4>}]} {
    %c0 = arith.constant 0 : index
    %c0_0 = arith.constant 0 : index
    %0 = vector.load %arg2[%c0, %c0_0] : memref<256x4xbf16, #tpu.memory_space<vmem>>, vector<256x4xbf16>
    %1 = arith.extf %0 : vector<256x4xbf16> to vector<256x4xf32>
    %c0_1 = arith.constant 0 : index
    %c0_2 = arith.constant 0 : index
    %2 = vector.load %arg3[%c0_1, %c0_2] : memref<1x4xf32, #tpu.memory_space<vmem>>, vector<1x4xf32>
    %3 = vector.broadcast %2 : vector<1x4xf32> to vector<256x4xf32>
    %4 = arith.mulf %1, %3 : vector<256x4xf32>
    %c0_3 = arith.constant 0 : index
    %c0_4 = arith.constant 0 : index
    %5 = vector.load %arg4[%c0_3, %c0_4] : memref<1x4xf32, #tpu.memory_space<vmem>>, vector<1x4xf32>
    %6 = vector.broadcast %5 : vector<1x4xf32> to vector<256x4xf32>
    %7 = arith.addf %4, %6 : vector<256x4xf32>
    %cst = arith.constant 0.000000e+00 : f32
    %8 = vector.broadcast %cst : f32 to vector<256x4xf32>
    %9 = arith.maximumf %7, %8 : vector<256x4xf32>
    %10 = arith.truncf %9 : vector<256x4xf32> to vector<256x4xbf16>
    %c0_5 = arith.constant 0 : index
    %c0_6 = arith.constant 0 : index
    %11 = vector.load %arg5[%c0_5, %c0_6] : memref<4x4xbf16, #tpu.memory_space<vmem>>, vector<4x4xbf16>
    %cst_7 = arith.constant dense<0.000000e+00> : vector<256x4xf32>
    %12 = tpu.matmul %10, %11, %cst_7 {dimension_numbers = #tpu.dot_dimension_numbers<[1], [0], [0], [1], [0, 0, 1, 1], [], []>} : vector<256x4xbf16>, vector<4x4xbf16>, vector<256x4xf32> -> vector<256x4xf32>
    %c0_8 = arith.constant 0 : index
    %c0_9 = arith.constant 0 : index
    %13 = vector.load %arg1[%c0_8, %c0_9] : memref<256x4xf32, #tpu.memory_space<vmem>>, vector<256x4xf32>
    %14 = arith.addf %13, %12 : vector<256x4xf32>
    %c0_10 = arith.constant 0 : index
    %c0_11 = arith.constant 0 : index
    %15 = vector.load %arg6[%c0_10, %c0_11] : memref<256x4xf32, #tpu.memory_space<vmem>>, vector<256x4xf32>
    tpu.vector_store %arg6[%c0_10, %c0_11], %14 {strides = array<i32>} : memref<256x4xf32, #tpu.memory_space<vmem>>, vector<256x4xf32>,
    return
  }
  func.func @transform_0(%arg0: i32) -> (i32, i32) {
    %c0_i32 = arith.constant 0 : i32
    %c0_i32_0 = arith.constant 0 : i32
    return %arg0, %c0_i32 : i32, i32
  }
  func.func @transform_1(%arg0: i32) -> (i32, i32) {
    %c0_i32 = arith.constant 0 : i32
    %c0_i32_0 = arith.constant 0 : i32
    return %arg0, %c0_i32 : i32, i32
  }
  func.func @transform_2(%arg0: i32) -> (i32, i32) {
    %c0_i32 = arith.constant 0 : i32
    %c0_i32_0 = arith.constant 0 : i32
    %c0_i32_1 = arith.constant 0 : i32
    return %c0_i32, %c0_i32_0 : i32, i32
  }
  func.func @transform_3(%arg0: i32) -> (i32, i32) {
    %c0_i32 = arith.constant 0 : i32
    %c0_i32_0 = arith.constant 0 : i32
    %c0_i32_1 = arith.constant 0 : i32
    return %c0_i32, %c0_i32_0 : i32, i32
  }
  func.func @transform_4(%arg0: i32) -> (i32, i32) {
    %c0_i32 = arith.constant 0 : i32
    %c0_i32_0 = arith.constant 0 : i32
    %c0_i32_1 = arith.constant 0 : i32
    return %c0_i32, %c0_i32_0 : i32, i32
  }
  func.func @transform_5(%arg0: i32) -> (i32, i32) {
    %c0_i32 = arith.constant 0 : i32
    %c0_i32_0 = arith.constant 0 : i32
    return %arg0, %c0_i32 : i32, i32
  }
}

module attributes {stable_mosaic.version = 11 : i64} {
  func.func @_conv3_kernel(%arg0: i32, %arg1: memref<256x4xf32, #tpu.memory_space<vmem>>, %arg2: memref<1x4xf32, #tpu.memory_space<vmem>>, %arg3: memref<1x4xf32, #tpu.memory_space<vmem>>, %arg4: memref<9x4x4xbf16, #tpu.memory_space<vmem>>, %arg5: memref<256x4xbf16, #tpu.memory_space<vmem>>, %arg6: memref<1x2x4xf32, #tpu.memory_space<vmem>>, %arg7: memref<304x4xf32, #tpu.memory_space<vmem>>) attributes {dimension_semantics = [#tpu.dimension_semantics<parallel>], iteration_bounds = array<i64: 2>, scalar_prefetch = 0 : i64, scratch_operands = 1 : i64, tpu.core_type = #tpu.core_type<tc>, window_params = [{transform_indices = @transform_0, window_bounds = array<i64: 256, 4>}, {pipeline_mode = #tpu.pipeline_mode<synchronous>, transform_indices = @transform_1, window_bounds = array<i64: 1, 4>}, {pipeline_mode = #tpu.pipeline_mode<synchronous>, transform_indices = @transform_2, window_bounds = array<i64: 1, 4>}, {pipeline_mode = #tpu.pipeline_mode<synchronous>, transform_indices = @transform_3, window_bounds = array<i64: 9, 4, 4>}, {transform_indices = @transform_4, window_bounds = array<i64: 256, 4>}, {transform_indices = @transform_5, window_bounds = array<i64: 1, 2, 4>}]} {
    %c0 = arith.constant 0 : index
    %c0_0 = arith.constant 0 : index
    %0 = vector.load %arg1[%c0, %c0_0] : memref<256x4xf32, #tpu.memory_space<vmem>>, vector<256x4xf32>
    %c0_1 = arith.constant 0 : index
    %c0_2 = arith.constant 0 : index
    %1 = vector.load %arg2[%c0_1, %c0_2] : memref<1x4xf32, #tpu.memory_space<vmem>>, vector<1x4xf32>
    %2 = vector.broadcast %1 : vector<1x4xf32> to vector<256x4xf32>
    %3 = arith.mulf %0, %2 : vector<256x4xf32>
    %c0_3 = arith.constant 0 : index
    %c0_4 = arith.constant 0 : index
    %4 = vector.load %arg3[%c0_3, %c0_4] : memref<1x4xf32, #tpu.memory_space<vmem>>, vector<1x4xf32>
    %5 = vector.broadcast %4 : vector<1x4xf32> to vector<256x4xf32>
    %6 = arith.addf %3, %5 : vector<256x4xf32>
    %cst = arith.constant 0.000000e+00 : f32
    %7 = vector.broadcast %cst : f32 to vector<256x4xf32>
    %8 = arith.maximumf %6, %7 : vector<256x4xf32>
    %cst_5 = arith.constant 0.000000e+00 : f32
    %9 = vector.broadcast %cst_5 : f32 to vector<24x4xf32>
    %c0_6 = arith.constant 0 : index
    %c0_7 = arith.constant 0 : index
    %10 = vector.load %arg7[%c0_6, %c0_7] : memref<304x4xf32, #tpu.memory_space<vmem>>, vector<24x4xf32>
    tpu.vector_store %arg7[%c0_6, %c0_7], %9 {strides = array<i32>} : memref<304x4xf32, #tpu.memory_space<vmem>>, vector<24x4xf32>,
    %cst_8 = arith.constant 0.000000e+00 : f32
    %11 = vector.broadcast %cst_8 : f32 to vector<24x4xf32>
    %c280 = arith.constant 280 : index
    %c0_9 = arith.constant 0 : index
    %12 = vector.load %arg7[%c280, %c0_9] : memref<304x4xf32, #tpu.memory_space<vmem>>, vector<24x4xf32>
    tpu.vector_store %arg7[%c280, %c0_9], %11 {strides = array<i32>} : memref<304x4xf32, #tpu.memory_space<vmem>>, vector<24x4xf32>,
    %c24 = arith.constant 24 : index
    %c0_10 = arith.constant 0 : index
    %13 = vector.load %arg7[%c24, %c0_10] : memref<304x4xf32, #tpu.memory_space<vmem>>, vector<256x4xf32>
    tpu.vector_store %arg7[%c24, %c0_10], %8 {strides = array<i32>} : memref<304x4xf32, #tpu.memory_space<vmem>>, vector<256x4xf32>,
    %14 = tpu.iota {dimensions = array<i32: 0>} : vector<256x1xi32>
    %15 = arith.sitofp %14 : vector<256x1xi32> to vector<256x1xf32>
    %cst_11 = arith.constant 5.000000e-01 : f32
    %16 = vector.broadcast %cst_11 : f32 to vector<256x1xf32>
    %17 = arith.addf %15, %16 : vector<256x1xf32>
    %cst_12 = arith.constant 6.250000e-02 : f32
    %18 = vector.broadcast %cst_12 : f32 to vector<256x1xf32>
    %19 = arith.mulf %17, %18 : vector<256x1xf32>
    %20 = math.floor %19 : vector<256x1xf32>
    %cst_13 = arith.constant 1.600000e+01 : f32
    %21 = vector.broadcast %cst_13 : f32 to vector<256x1xf32>
    %22 = arith.mulf %20, %21 : vector<256x1xf32>
    %23 = arith.subf %15, %22 : vector<256x1xf32>
    %cst_14 = arith.constant 5.000000e-01 : f32
    %24 = vector.broadcast %cst_14 : f32 to vector<256x1xf32>
    %25 = arith.addf %15, %24 : vector<256x1xf32>
    %cst_15 = arith.constant 3.906250e-03 : f32
    %26 = vector.broadcast %cst_15 : f32 to vector<256x1xf32>
    %27 = arith.mulf %25, %26 : vector<256x1xf32>
    %28 = math.floor %27 : vector<256x1xf32>
    %cst_16 = arith.constant 2.560000e+02 : f32
    %29 = vector.broadcast %cst_16 : f32 to vector<256x1xf32>
    %30 = arith.mulf %28, %29 : vector<256x1xf32>
    %31 = arith.subf %15, %30 : vector<256x1xf32>
    %cst_17 = arith.constant 5.000000e-01 : f32
    %32 = vector.broadcast %cst_17 : f32 to vector<256x1xf32>
    %33 = arith.cmpf ogt, %23, %32 : vector<256x1xf32>
    %cst_18 = arith.constant 1.000000e+00 : f32
    %cst_19 = arith.constant 0.000000e+00 : f32
    %34 = vector.broadcast %cst_18 : f32 to vector<256x1xf32>
    %35 = vector.broadcast %cst_19 : f32 to vector<256x1xf32>
    %36 = arith.select %33, %34, %35 : vector<256x1xi1>, vector<256x1xf32>
    %cst_20 = arith.constant 1.450000e+01 : f32
    %37 = vector.broadcast %cst_20 : f32 to vector<256x1xf32>
    %38 = arith.cmpf olt, %23, %37 : vector<256x1xf32>
    %cst_21 = arith.constant 1.000000e+00 : f32
    %cst_22 = arith.constant 0.000000e+00 : f32
    %39 = vector.broadcast %cst_21 : f32 to vector<256x1xf32>
    %40 = vector.broadcast %cst_22 : f32 to vector<256x1xf32>
    %41 = arith.select %38, %39, %40 : vector<256x1xi1>, vector<256x1xf32>
    %cst_23 = arith.constant 1.550000e+01 : f32
    %42 = vector.broadcast %cst_23 : f32 to vector<256x1xf32>
    %43 = arith.cmpf ogt, %31, %42 : vector<256x1xf32>
    %cst_24 = arith.constant 1.000000e+00 : f32
    %cst_25 = arith.constant 0.000000e+00 : f32
    %44 = vector.broadcast %cst_24 : f32 to vector<256x1xf32>
    %45 = vector.broadcast %cst_25 : f32 to vector<256x1xf32>
    %46 = arith.select %43, %44, %45 : vector<256x1xi1>, vector<256x1xf32>
    %cst_26 = arith.constant 2.395000e+02 : f32
    %47 = vector.broadcast %cst_26 : f32 to vector<256x1xf32>
    %48 = arith.cmpf olt, %31, %47 : vector<256x1xf32>
    %cst_27 = arith.constant 1.000000e+00 : f32
    %cst_28 = arith.constant 0.000000e+00 : f32
    %49 = vector.broadcast %cst_27 : f32 to vector<256x1xf32>
    %50 = vector.broadcast %cst_28 : f32 to vector<256x1xf32>
    %51 = arith.select %48, %49, %50 : vector<256x1xi1>, vector<256x1xf32>
    %cst_29 = arith.constant 0.000000e+00 : f32
    %52 = vector.broadcast %cst_29 : f32 to vector<256x4xf32>
    %c7 = arith.constant 7 : index
    %c0_30 = arith.constant 0 : index
    %53 = vector.load %arg7[%c7, %c0_30] : memref<304x4xf32, #tpu.memory_space<vmem>>, vector<256x4xf32>
    %54 = arith.truncf %53 : vector<256x4xf32> to vector<256x4xbf16>
    %c0_31 = arith.constant 0 : index
    %c0_32 = arith.constant 0 : index
    %c0_33 = arith.constant 0 : index
    %55 = vector.load %arg4[%c0_31, %c0_32, %c0_33] : memref<9x4x4xbf16, #tpu.memory_space<vmem>>, vector<1x4x4xbf16>
    %56 = vector.shape_cast %55 : vector<1x4x4xbf16> to vector<4x4xbf16>
    %cst_34 = arith.constant dense<0.000000e+00> : vector<256x4xf32>
    %57 = tpu.matmul %54, %56, %cst_34 {dimension_numbers = #tpu.dot_dimension_numbers<[1], [0], [0], [1], [0, 0, 1, 1], [], []>} : vector<256x4xbf16>, vector<4x4xbf16>, vector<256x4xf32> -> vector<256x4xf32>
    %58 = vector.broadcast %36 : vector<256x1xf32> to vector<256x4xf32>
    %59 = arith.mulf %57, %58 : vector<256x4xf32>
    %60 = vector.broadcast %46 : vector<256x1xf32> to vector<256x4xf32>
    %61 = arith.mulf %59, %60 : vector<256x4xf32>
    %62 = arith.addf %52, %61 : vector<256x4xf32>
    %c8 = arith.constant 8 : index
    %c0_35 = arith.constant 0 : index
    %63 = vector.load %arg7[%c8, %c0_35] : memref<304x4xf32, #tpu.memory_space<vmem>>, vector<256x4xf32>
    %64 = arith.truncf %63 : vector<256x4xf32> to vector<256x4xbf16>
    %c1 = arith.constant 1 : index
    %c0_36 = arith.constant 0 : index
    %c0_37 = arith.constant 0 : index
    %65 = vector.load %arg4[%c1, %c0_36, %c0_37] : memref<9x4x4xbf16, #tpu.memory_space<vmem>>, vector<1x4x4xbf16>
    %66 = vector.shape_cast %65 : vector<1x4x4xbf16> to vector<4x4xbf16>
    %cst_38 = arith.constant dense<0.000000e+00> : vector<256x4xf32>
    %67 = tpu.matmul %64, %66, %cst_38 {dimension_numbers = #tpu.dot_dimension_numbers<[1], [0], [0], [1], [0, 0, 1, 1], [], []>} : vector<256x4xbf16>, vector<4x4xbf16>, vector<256x4xf32> -> vector<256x4xf32>
    %68 = vector.broadcast %46 : vector<256x1xf32> to vector<256x4xf32>
    %69 = arith.mulf %67, %68 : vector<256x4xf32>
    %70 = arith.addf %62, %69 : vector<256x4xf32>
    %c9 = arith.constant 9 : index
    %c0_39 = arith.constant 0 : index
    %71 = vector.load %arg7[%c9, %c0_39] : memref<304x4xf32, #tpu.memory_space<vmem>>, vector<256x4xf32>
    %72 = arith.truncf %71 : vector<256x4xf32> to vector<256x4xbf16>
    %c2 = arith.constant 2 : index
    %c0_40 = arith.constant 0 : index
    %c0_41 = arith.constant 0 : index
    %73 = vector.load %arg4[%c2, %c0_40, %c0_41] : memref<9x4x4xbf16, #tpu.memory_space<vmem>>, vector<1x4x4xbf16>
    %74 = vector.shape_cast %73 : vector<1x4x4xbf16> to vector<4x4xbf16>
    %cst_42 = arith.constant dense<0.000000e+00> : vector<256x4xf32>
    %75 = tpu.matmul %72, %74, %cst_42 {dimension_numbers = #tpu.dot_dimension_numbers<[1], [0], [0], [1], [0, 0, 1, 1], [], []>} : vector<256x4xbf16>, vector<4x4xbf16>, vector<256x4xf32> -> vector<256x4xf32>
    %76 = vector.broadcast %41 : vector<256x1xf32> to vector<256x4xf32>
    %77 = arith.mulf %75, %76 : vector<256x4xf32>
    %78 = vector.broadcast %46 : vector<256x1xf32> to vector<256x4xf32>
    %79 = arith.mulf %77, %78 : vector<256x4xf32>
    %80 = arith.addf %70, %79 : vector<256x4xf32>
    %c23 = arith.constant 23 : index
    %c0_43 = arith.constant 0 : index
    %81 = vector.load %arg7[%c23, %c0_43] : memref<304x4xf32, #tpu.memory_space<vmem>>, vector<256x4xf32>
    %82 = arith.truncf %81 : vector<256x4xf32> to vector<256x4xbf16>
    %c3 = arith.constant 3 : index
    %c0_44 = arith.constant 0 : index
    %c0_45 = arith.constant 0 : index
    %83 = vector.load %arg4[%c3, %c0_44, %c0_45] : memref<9x4x4xbf16, #tpu.memory_space<vmem>>, vector<1x4x4xbf16>
    %84 = vector.shape_cast %83 : vector<1x4x4xbf16> to vector<4x4xbf16>
    %cst_46 = arith.constant dense<0.000000e+00> : vector<256x4xf32>
    %85 = tpu.matmul %82, %84, %cst_46 {dimension_numbers = #tpu.dot_dimension_numbers<[1], [0], [0], [1], [0, 0, 1, 1], [], []>} : vector<256x4xbf16>, vector<4x4xbf16>, vector<256x4xf32> -> vector<256x4xf32>
    %86 = vector.broadcast %36 : vector<256x1xf32> to vector<256x4xf32>
    %87 = arith.mulf %85, %86 : vector<256x4xf32>
    %88 = arith.addf %80, %87 : vector<256x4xf32>
    %c24_47 = arith.constant 24 : index
    %c0_48 = arith.constant 0 : index
    %89 = vector.load %arg7[%c24_47, %c0_48] : memref<304x4xf32, #tpu.memory_space<vmem>>, vector<256x4xf32>
    %90 = arith.truncf %89 : vector<256x4xf32> to vector<256x4xbf16>
    %c4 = arith.constant 4 : index
    %c0_49 = arith.constant 0 : index
    %c0_50 = arith.constant 0 : index
    %91 = vector.load %arg4[%c4, %c0_49, %c0_50] : memref<9x4x4xbf16, #tpu.memory_space<vmem>>, vector<1x4x4xbf16>
    %92 = vector.shape_cast %91 : vector<1x4x4xbf16> to vector<4x4xbf16>
    %cst_51 = arith.constant dense<0.000000e+00> : vector<256x4xf32>
    %93 = tpu.matmul %90, %92, %cst_51 {dimension_numbers = #tpu.dot_dimension_numbers<[1], [0], [0], [1], [0, 0, 1, 1], [], []>} : vector<256x4xbf16>, vector<4x4xbf16>, vector<256x4xf32> -> vector<256x4xf32>
    %94 = arith.addf %88, %93 : vector<256x4xf32>
    %c25 = arith.constant 25 : index
    %c0_52 = arith.constant 0 : index
    %95 = vector.load %arg7[%c25, %c0_52] : memref<304x4xf32, #tpu.memory_space<vmem>>, vector<256x4xf32>
    %96 = arith.truncf %95 : vector<256x4xf32> to vector<256x4xbf16>
    %c5 = arith.constant 5 : index
    %c0_53 = arith.constant 0 : index
    %c0_54 = arith.constant 0 : index
    %97 = vector.load %arg4[%c5, %c0_53, %c0_54] : memref<9x4x4xbf16, #tpu.memory_space<vmem>>, vector<1x4x4xbf16>
    %98 = vector.shape_cast %97 : vector<1x4x4xbf16> to vector<4x4xbf16>
    %cst_55 = arith.constant dense<0.000000e+00> : vector<256x4xf32>
    %99 = tpu.matmul %96, %98, %cst_55 {dimension_numbers = #tpu.dot_dimension_numbers<[1], [0], [0], [1], [0, 0, 1, 1], [], []>} : vector<256x4xbf16>, vector<4x4xbf16>, vector<256x4xf32> -> vector<256x4xf32>
    %100 = vector.broadcast %41 : vector<256x1xf32> to vector<256x4xf32>
    %101 = arith.mulf %99, %100 : vector<256x4xf32>
    %102 = arith.addf %94, %101 : vector<256x4xf32>
    %c39 = arith.constant 39 : index
    %c0_56 = arith.constant 0 : index
    %103 = vector.load %arg7[%c39, %c0_56] : memref<304x4xf32, #tpu.memory_space<vmem>>, vector<256x4xf32>
    %104 = arith.truncf %103 : vector<256x4xf32> to vector<256x4xbf16>
    %c6 = arith.constant 6 : index
    %c0_57 = arith.constant 0 : index
    %c0_58 = arith.constant 0 : index
    %105 = vector.load %arg4[%c6, %c0_57, %c0_58] : memref<9x4x4xbf16, #tpu.memory_space<vmem>>, vector<1x4x4xbf16>
    %106 = vector.shape_cast %105 : vector<1x4x4xbf16> to vector<4x4xbf16>
    %cst_59 = arith.constant dense<0.000000e+00> : vector<256x4xf32>
    %107 = tpu.matmul %104, %106, %cst_59 {dimension_numbers = #tpu.dot_dimension_numbers<[1], [0], [0], [1], [0, 0, 1, 1], [], []>} : vector<256x4xbf16>, vector<4x4xbf16>, vector<256x4xf32> -> vector<256x4xf32>
    %108 = vector.broadcast %36 : vector<256x1xf32> to vector<256x4xf32>
    %109 = arith.mulf %107, %108 : vector<256x4xf32>
    %110 = vector.broadcast %51 : vector<256x1xf32> to vector<256x4xf32>
    %111 = arith.mulf %109, %110 : vector<256x4xf32>
    %112 = arith.addf %102, %111 : vector<256x4xf32>
    %c40 = arith.constant 40 : index
    %c0_60 = arith.constant 0 : index
    %113 = vector.load %arg7[%c40, %c0_60] : memref<304x4xf32, #tpu.memory_space<vmem>>, vector<256x4xf32>
    %114 = arith.truncf %113 : vector<256x4xf32> to vector<256x4xbf16>
    %c7_61 = arith.constant 7 : index
    %c0_62 = arith.constant 0 : index
    %c0_63 = arith.constant 0 : index
    %115 = vector.load %arg4[%c7_61, %c0_62, %c0_63] : memref<9x4x4xbf16, #tpu.memory_space<vmem>>, vector<1x4x4xbf16>
    %116 = vector.shape_cast %115 : vector<1x4x4xbf16> to vector<4x4xbf16>
    %cst_64 = arith.constant dense<0.000000e+00> : vector<256x4xf32>
    %117 = tpu.matmul %114, %116, %cst_64 {dimension_numbers = #tpu.dot_dimension_numbers<[1], [0], [0], [1], [0, 0, 1, 1], [], []>} : vector<256x4xbf16>, vector<4x4xbf16>, vector<256x4xf32> -> vector<256x4xf32>
    %118 = vector.broadcast %51 : vector<256x1xf32> to vector<256x4xf32>
    %119 = arith.mulf %117, %118 : vector<256x4xf32>
    %120 = arith.addf %112, %119 : vector<256x4xf32>
    %c41 = arith.constant 41 : index
    %c0_65 = arith.constant 0 : index
    %121 = vector.load %arg7[%c41, %c0_65] : memref<304x4xf32, #tpu.memory_space<vmem>>, vector<256x4xf32>
    %122 = arith.truncf %121 : vector<256x4xf32> to vector<256x4xbf16>
    %c8_66 = arith.constant 8 : index
    %c0_67 = arith.constant 0 : index
    %c0_68 = arith.constant 0 : index
    %123 = vector.load %arg4[%c8_66, %c0_67, %c0_68] : memref<9x4x4xbf16, #tpu.memory_space<vmem>>, vector<1x4x4xbf16>
    %124 = vector.shape_cast %123 : vector<1x4x4xbf16> to vector<4x4xbf16>
    %cst_69 = arith.constant dense<0.000000e+00> : vector<256x4xf32>
    %125 = tpu.matmul %122, %124, %cst_69 {dimension_numbers = #tpu.dot_dimension_numbers<[1], [0], [0], [1], [0, 0, 1, 1], [], []>} : vector<256x4xbf16>, vector<4x4xbf16>, vector<256x4xf32> -> vector<256x4xf32>
    %126 = vector.broadcast %41 : vector<256x1xf32> to vector<256x4xf32>
    %127 = arith.mulf %125, %126 : vector<256x4xf32>
    %128 = vector.broadcast %51 : vector<256x1xf32> to vector<256x4xf32>
    %129 = arith.mulf %127, %128 : vector<256x4xf32>
    %130 = arith.addf %120, %129 : vector<256x4xf32>
    %cst_70 = arith.constant dense<0.000000e+00> : vector<4xf32>
    %131 = vector.multi_reduction <add>, %130, %cst_70 [0] : vector<256x4xf32> to vector<4xf32>
    %132 = vector.shape_cast %131 : vector<4xf32> to vector<1x4xf32>
    %cst_71 = arith.constant 3.906250e-03 : f32
    %133 = vector.broadcast %cst_71 : f32 to vector<1x4xf32>
    %134 = arith.mulf %132, %133 : vector<1x4xf32>
    %135 = vector.broadcast %134 : vector<1x4xf32> to vector<256x4xf32>
    %136 = arith.subf %130, %135 : vector<256x4xf32>
    %137 = arith.mulf %136, %136 : vector<256x4xf32>
    %cst_72 = arith.constant dense<0.000000e+00> : vector<4xf32>
    %138 = vector.multi_reduction <add>, %137, %cst_72 [0] : vector<256x4xf32> to vector<4xf32>
    %139 = vector.shape_cast %138 : vector<4xf32> to vector<1x4xf32>
    %c0_73 = arith.constant 0 : index
    %c0_74 = arith.constant 0 : index
    %c0_75 = arith.constant 0 : index
    %140 = vector.load %arg6[%c0_73, %c0_74, %c0_75] : memref<1x2x4xf32, #tpu.memory_space<vmem>>, vector<1x1x4xf32>
    %141 = vector.shape_cast %140 : vector<1x1x4xf32> to vector<1x4xf32>
    %142 = vector.shape_cast %132 : vector<1x4xf32> to vector<1x1x4xf32>
    tpu.vector_store %arg6[%c0_73, %c0_74, %c0_75], %142 {strides = array<i32>} : memref<1x2x4xf32, #tpu.memory_space<vmem>>, vector<1x1x4xf32>,
    %c0_76 = arith.constant 0 : index
    %c1_77 = arith.constant 1 : index
    %c0_78 = arith.constant 0 : index
    %143 = vector.load %arg6[%c0_76, %c1_77, %c0_78] : memref<1x2x4xf32, #tpu.memory_space<vmem>>, vector<1x1x4xf32>
    %144 = vector.shape_cast %143 : vector<1x1x4xf32> to vector<1x4xf32>
    %145 = vector.shape_cast %139 : vector<1x4xf32> to vector<1x1x4xf32>
    tpu.vector_store %arg6[%c0_76, %c1_77, %c0_78], %145 {strides = array<i32>} : memref<1x2x4xf32, #tpu.memory_space<vmem>>, vector<1x1x4xf32>,
    %146 = arith.truncf %130 : vector<256x4xf32> to vector<256x4xbf16>
    %c0_79 = arith.constant 0 : index
    %c0_80 = arith.constant 0 : index
    %147 = vector.load %arg5[%c0_79, %c0_80] : memref<256x4xbf16, #tpu.memory_space<vmem>>, vector<256x4xbf16>
    tpu.vector_store %arg5[%c0_79, %c0_80], %146 {strides = array<i32>} : memref<256x4xbf16, #tpu.memory_space<vmem>>, vector<256x4xbf16>,
    return
  }
  func.func @transform_0(%arg0: i32) -> (i32, i32) {
    %c0_i32 = arith.constant 0 : i32
    %c0_i32_0 = arith.constant 0 : i32
    return %arg0, %c0_i32 : i32, i32
  }
  func.func @transform_1(%arg0: i32) -> (i32, i32) {
    %c0_i32 = arith.constant 0 : i32
    %c0_i32_0 = arith.constant 0 : i32
    %c0_i32_1 = arith.constant 0 : i32
    return %c0_i32, %c0_i32_0 : i32, i32
  }
  func.func @transform_2(%arg0: i32) -> (i32, i32) {
    %c0_i32 = arith.constant 0 : i32
    %c0_i32_0 = arith.constant 0 : i32
    %c0_i32_1 = arith.constant 0 : i32
    return %c0_i32, %c0_i32_0 : i32, i32
  }
  func.func @transform_3(%arg0: i32) -> (i32, i32, i32) {
    %c0_i32 = arith.constant 0 : i32
    %c0_i32_0 = arith.constant 0 : i32
    %c0_i32_1 = arith.constant 0 : i32
    %c0_i32_2 = arith.constant 0 : i32
    return %c0_i32, %c0_i32_0, %c0_i32_1 : i32, i32, i32
  }
  func.func @transform_4(%arg0: i32) -> (i32, i32) {
    %c0_i32 = arith.constant 0 : i32
    %c0_i32_0 = arith.constant 0 : i32
    return %arg0, %c0_i32 : i32, i32
  }
  func.func @transform_5(%arg0: i32) -> (i32, i32, i32) {
    %c0_i32 = arith.constant 0 : i32
    %c0_i32_0 = arith.constant 0 : i32
    %c0_i32_1 = arith.constant 0 : i32
    return %arg0, %c0_i32, %c0_i32_0 : i32, i32, i32
  }
}

</mosaic_0001>

<bundles_post_ra>
// kernel: resblock_pallas.3
= control target key start
LH: loop header
LB: loop body
LE: loop exit
PB: predicated region body
PF: predicated region fallthrough
CT: control target
= control target key end

     0   :  { %s445_s6 = smov 0   ;;  %s737_s0 = inlined_call_operand.vmem [shape: f32[512,4], index: 0, kind: input, shape index: {}]   ;;  %s738_s1 = inlined_call_operand.vmem [shape: f32[2,2,4], index: 1, kind: output, shape index: {}]  }
   0x1 LB: > { %s451_s7 = sadd.s32 4294967295, %s433_s6   ;;  %p413_p0 = scmp.ge.s32.totalorder %s433_s6, 1  ;;  %s433_s6 = sphi %s445_s6, %s11_s6  }
   0x2   : > { %p88_p1 = scmp.lt.s32.totalorder %s433_s6, 3 }
   0x4   : > { %p89_p2 = pnand %p413_p0, %p88_p1 }
   0x5   : > { %s414_s8 = sshll.u32 (!%p89_p2), %s451_s7, 5  ;;  %p113_p4 = scmp.lt.s32.totalorder (!%p89_p2), %s451_s7, 1 }
   0x6   : > { %92 = sbr.rel (%p89_p2) target bundleno = 172 (0xac), region = 24  ;;  %p108_p3 = scmp.lt.s32.totalorder (!%p89_p2), %s414_s8, 63 }
   0xb   : > { %s740_s8 = smov (!%p108_p3, %s414_s8), 63  ;;  %vm149_vm0 = vcmask 31744   ;;  %s742_s7 = smov (!%p113_p4, %s451_s7), 1  ;;  %vm353_vm1 = vcmask 24576  }
   0xc   : > { %s415_s9 = sshll.u32 %s740_s8, 3  ;;  %s416_s13 = sshll.u32 %s742_s7, 1 }
   0xd   : > { %s459_s12 = scalar_lea.vmem %s737_s0, %s415_s9  ;;  %s705_s16 = scalar_lea.vmem %s738_s1, %s416_s13 }
   0xe   : > { %v462_v0 = vld [vmem:[%s459_s12] sm:$0xff]  ;;  %v465_v1 = vld [vmem:[%s459_s12 + $0x8] sm:$0xff]  ;;  %v468_v2 = vld [vmem:[%s459_s12 + $0x10] sm:$0xff] }
   0xf   : > { %v471_v3 = vld [vmem:[%s459_s12 + $0x18] sm:$0xff]  ;;  %v150_v4 = vsel %vm149_vm0, %v462_v0, 0.0  ;;  %v151_v5 = vsel %vm149_vm0, %v465_v1, 0.0  ;;  %v153_v6 = vsel %vm149_vm0, %v468_v2, 0.0  ;;  %v480_v7 = vld [vmem:[%s459_s12 + $0x20] sm:$0xff]  ;;  %v485_v10 = vld [vmem:[%s459_s12 + $0x28] sm:$0xff] }
  0x10   : > { %v152_v8 = vadd.f32 %v151_v5, %v150_v4  ;;  %v155_v9 = vsel %vm149_vm0, %v471_v3, 0.0  ;;  %v157_v12 = vsel %vm149_vm0, %v480_v7, 0.0  ;;  %v490_v13 = vld [vmem:[%s459_s12 + $0x30] sm:$0xff]  ;;  %v159_v15 = vsel %vm149_vm0, %v485_v10, 0.0  ;;  %v495_v16 = vld [vmem:[%s459_s12 + $0x38] sm:$0xff]  ;;  %v500_v19 = vld [vmem:[%s459_s12 + $0x40] sm:$0xff] }
  0x11   : > { %v161_v18 = vsel %vm149_vm0, %v490_v13, 0.0  ;;  %v163_v21 = vsel %vm149_vm0, %v495_v16, 0.0  ;;  %v505_v22 = vld [vmem:[%s459_s12 + $0x48] sm:$0xff]  ;;  %v165_v24 = vsel %vm149_vm0, %v500_v19, 0.0  ;;  %v510_v25 = vld [vmem:[%s459_s12 + $0x50] sm:$0xff]  ;;  %v515_v28 = vld [vmem:[%s459_s12 + $0x58] sm:$0xff] }
  0x12   : > { %v154_v11 = vadd.f32 %v153_v6, %v152_v8  ;;  %v167_v27 = vsel %vm149_vm0, %v505_v22, 0.0  ;;  %v169_v30 = vsel %vm149_vm0, %v510_v25, 0.0  ;;  %v520_v31 = vld [vmem:[%s459_s12 + $0x60] sm:$0xff]  ;;  %v171_v33 = vsel %vm149_vm0, %v515_v28, 0.0  ;;  %v525_v34 = vld [vmem:[%s459_s12 + $0x68] sm:$0xff]  ;;  %v530_v37 = vld [vmem:[%s459_s12 + $0x70] sm:$0xff] }
  0x13   : > { %v173_v36 = vsel %vm149_vm0, %v520_v31, 0.0  ;;  %v175_v39 = vsel %vm149_vm0, %v525_v34, 0.0  ;;  %v535_v40 = vld [vmem:[%s459_s12 + $0x78] sm:$0xff]  ;;  %v177_v42 = vsel %vm149_vm0, %v530_v37, 0.0  ;;  %v540_v43 = vld [vmem:[%s459_s12 + $0x80] sm:$0xff]  ;;  %v545_v46 = vld [vmem:[%s459_s12 + $0x88] sm:$0xff] }
  0x14   : > { %v156_v14 = vadd.f32 %v155_v9, %v154_v11  ;;  %v179_v45 = vsel %vm149_vm0, %v535_v40, 0.0  ;;  %v181_v48 = vsel %vm149_vm0, %v540_v43, 0.0  ;;  %v550_v49 = vld [vmem:[%s459_s12 + $0x90] sm:$0xff]  ;;  %v183_v51 = vsel %vm149_vm0, %v545_v46, 0.0  ;;  %v555_v52 = vld [vmem:[%s459_s12 + $0x98] sm:$0xff]  ;;  %v560_v55 = vld [vmem:[%s459_s12 + $0xa0] sm:$0xff] }
  0x15   : > { %v185_v54 = vsel %vm149_vm0, %v550_v49, 0.0  ;;  %v187_v57 = vsel %vm149_vm0, %v555_v52, 0.0  ;;  %v565_v58 = vld [vmem:[%s459_s12 + $0xa8] sm:$0xff]  ;;  %v189_v60 = vsel %vm149_vm0, %v560_v55, 0.0  ;;  %v570_v61 = vld [vmem:[%s459_s12 + $0xb0] sm:$0xff]  ;;  %v575_v4 = vld [vmem:[%s459_s12 + $0xb8] sm:$0xff] }
  0x16   : > { %v158_v17 = vadd.f32 %v157_v12, %v156_v14  ;;  %v191_v63 = vsel %vm149_vm0, %v565_v58, 0.0  ;;  %v193_v6 = vsel %vm149_vm0, %v570_v61, 0.0  ;;  %v580_v8 = vld [vmem:[%s459_s12 + $0xc0] sm:$0xff]  ;;  %v195_v11 = vsel %vm149_vm0, %v575_v4, 0.0  ;;  %v585_v12 = vld [vmem:[%s459_s12 + $0xc8] sm:$0xff] }
  0x18   : > { %v160_v20 = vadd.f32 %v159_v15, %v158_v17  ;;  %v197_v15 = vsel %vm149_vm0, %v580_v8, 0.0  ;;  %v590_v17 = vld [vmem:[%s459_s12 + $0xd0] sm:$0xff] }
  0x1a   : > { %v162_v23 = vadd.f32 %v161_v18, %v160_v20  ;;  %v199_v20 = vsel %vm149_vm0, %v585_v12, 0.0 }
  0x1c   : > { %v164_v26 = vadd.f32 %v163_v21, %v162_v23  ;;  %v595_v21 = vld [vmem:[%s459_s12 + $0xd8] sm:$0xff] }
  0x1e   : > { %v166_v29 = vadd.f32 %v165_v24, %v164_v26  ;;  %v201_v24 = vsel %vm149_vm0, %v590_v17, 0.0  ;;  %v600_v26 = vld [vmem:[%s459_s12 + $0xe0] sm:$0xff] }
  0x20   : > { %v168_v32 = vadd.f32 %v167_v27, %v166_v29  ;;  %v203_v29 = vsel %vm149_vm0, %v595_v21, 0.0 }
  0x22   : > { %v170_v35 = vadd.f32 %v169_v30, %v168_v32  ;;  %v605_v30 = vld [vmem:[%s459_s12 + $0xe8] sm:$0xff] }
  0x24   : > { %v172_v38 = vadd.f32 %v171_v33, %v170_v35  ;;  %v205_v33 = vsel %vm149_vm0, %v600_v26, 0.0  ;;  %v610_v35 = vld [vmem:[%s459_s12 + $0xf0] sm:$0xff] }
  0x26   : > { %v174_v41 = vadd.f32 %v173_v36, %v172_v38  ;;  %v207_v38 = vsel %vm149_vm0, %v605_v30, 0.0 }
  0x28   : > { %v176_v44 = vadd.f32 %v175_v39, %v174_v41  ;;  %v615_v39 = vld [vmem:[%s459_s12 + $0xf8] sm:$0xff] }
  0x2a   : > { %v178_v47 = vadd.f32 %v177_v42, %v176_v44  ;;  %v209_v42 = vsel %vm149_vm0, %v610_v35, 0.0 }
  0x2c   : > { %v180_v50 = vadd.f32 %v179_v45, %v178_v47  ;;  %v211_v45 = vsel %vm149_vm0, %v615_v39, 0.0 }
  0x2e   : > { %v182_v53 = vadd.f32 %v181_v48, %v180_v50 }
  0x30   : > { %v184_v56 = vadd.f32 %v183_v51, %v182_v53 }
  0x32   : > { %v186_v59 = vadd.f32 %v185_v54, %v184_v56 }
  0x34   : > { %v188_v62 = vadd.f32 %v187_v57, %v186_v59 }
  0x36   : > { %v190_v5 = vadd.f32 %v189_v60, %v188_v62 }
  0x38   : > { %v192_v9 = vadd.f32 %v191_v63, %v190_v5 }
  0x3a   : > { %v194_v14 = vadd.f32 %v193_v6, %v192_v9 }
  0x3c   : > { %v196_v18 = vadd.f32 %v195_v11, %v194_v14 }
  0x3e   : > { %v198_v23 = vadd.f32 %v197_v15, %v196_v18 }
  0x40   : > { %v200_v27 = vadd.f32 %v199_v20, %v198_v23 }
  0x42   : > { %v202_v32 = vadd.f32 %v201_v24, %v200_v27 }
  0x44   : > { %v204_v36 = vadd.f32 %v203_v29, %v202_v32 }
  0x46   : > { %v206_v41 = vadd.f32 %v205_v33, %v204_v36 }
  0x48   : > { %v208_v44 = vadd.f32 %v207_v38, %v206_v41 }
  0x4a   : > { %v210_v47 = vadd.f32 %v209_v42, %v208_v44 }
  0x4c   : > { %v212_v48 = vadd.f32 %v211_v45, %v210_v47 }
  0x4e   : > { %v213_v50 = vrot.slane %v212_v48, 4 }
  0x50   : > { %v214_v51 = vadd.f32 %v213_v50, %v212_v48 }
  0x52   : > { %v215_v53 = vrot.slane %v214_v51, 2 }
  0x54   : > { %v216_v54 = vadd.f32 %v215_v53, %v214_v51 }
  0x56   : > { %v217_v56 = vrot.slane %v216_v54, 1 }
  0x58   : > { %v621_v57 = vadd.f32 %v217_v56, %v216_v54 }
  0x5a   : > { %v624_v59 = vmul.f32 0.00390625, %v621_v57  ;;  %354 = vst.msk [vmem:[%s705_s16] sm:$0x1] %vm353_vm1, %v621_v57 }
  0x5c   : > { %v220_v60 = vsub.f32 %v462_v0, %v624_v59  ;;  %v221_v62 = vsub.f32 %v465_v1, %v624_v59  ;;  %v222_v63 = vsub.f32 %v468_v2, %v624_v59  ;;  %v223_v5 = vsub.f32 %v471_v3, %v624_v59 }
  0x5d   : > { %v224_v6 = vsub.f32 %v480_v7, %v624_v59  ;;  %v225_v15 = vsub.f32 %v485_v10, %v624_v59  ;;  %v226_v0 = vsub.f32 %v490_v13, %v624_v59  ;;  %v227_v7 = vsub.f32 %v495_v16, %v624_v59 }
  0x5e   : > { %v252_v9 = vmul.f32 %v220_v60, %v220_v60  ;;  %v253_v11 = vmul.f32 %v221_v62, %v221_v62  ;;  %v254_v14 = vmul.f32 %v222_v63, %v222_v63  ;;  %v255_v18 = vmul.f32 %v223_v5, %v223_v5 }
  0x5f   : > { %v256_v1 = vmul.f32 %v224_v6, %v224_v6  ;;  %v257_v24 = vmul.f32 %v225_v15, %v225_v15  ;;  %v228_v10 = vsub.f32 %v500_v19, %v624_v59  ;;  %v258_v32 = vmul.f32 %v226_v0, %v226_v0 }
  0x60   : > { %v284_v20 = vsel %vm149_vm0, %v252_v9, 0.0  ;;  %v285_v2 = vsel %vm149_vm0, %v253_v11, 0.0  ;;  %v287_v3 = vsel %vm149_vm0, %v254_v14, 0.0  ;;  %v289_v27 = vsel %vm149_vm0, %v255_v18, 0.0 }
  0x61   : > { %v286_v23 = vadd.f32 %v285_v2, %v284_v20  ;;  %v291_v13 = vsel %vm149_vm0, %v256_v1, 0.0  ;;  %v229_v36 = vsub.f32 %v505_v22, %v624_v59  ;;  %v259_v38 = vmul.f32 %v227_v7, %v227_v7 }
  0x62   : > { %v293_v41 = vsel %vm149_vm0, %v257_v24, 0.0  ;;  %v230_v16 = vsub.f32 %v510_v25, %v624_v59  ;;  %v260_v44 = vmul.f32 %v228_v10, %v228_v10  ;;  %v295_v45 = vsel %vm149_vm0, %v258_v32, 0.0 }
  0x63   : > { %v288_v29 = vadd.f32 %v287_v3, %v286_v23  ;;  %v231_v19 = vsub.f32 %v515_v28, %v624_v59  ;;  %v261_v48 = vmul.f32 %v229_v36, %v229_v36  ;;  %v297_v50 = vsel %vm149_vm0, %v259_v38, 0.0 }
  0x64   : > { %v232_v22 = vsub.f32 %v520_v31, %v624_v59  ;;  %v262_v53 = vmul.f32 %v230_v16, %v230_v16  ;;  %v299_v54 = vsel %vm149_vm0, %v260_v44, 0.0  ;;  %v233_v25 = vsub.f32 %v525_v34, %v624_v59 }
  0x65   : > { %v290_v33 = vadd.f32 %v289_v27, %v288_v29  ;;  %v263_v60 = vmul.f32 %v231_v19, %v231_v19  ;;  %v301_v62 = vsel %vm149_vm0, %v261_v48, 0.0  ;;  %v234_v28 = vsub.f32 %v530_v37, %v624_v59 }
  0x66   : > { %v264_v5 = vmul.f32 %v232_v22, %v232_v22  ;;  %v303_v6 = vsel %vm149_vm0, %v262_v53, 0.0  ;;  %v235_v31 = vsub.f32 %v535_v40, %v624_v59  ;;  %v265_v11 = vmul.f32 %v233_v25, %v233_v25 }
  0x67   : > { %v292_v42 = vadd.f32 %v291_v13, %v290_v33  ;;  %v305_v14 = vsel %vm149_vm0, %v263_v60, 0.0  ;;  %v236_v34 = vsub.f32 %v540_v43, %v624_v59  ;;  %v266_v18 = vmul.f32 %v234_v28, %v234_v28 }
  0x68   : > { %v307_v0 = vsel %vm149_vm0, %v264_v5, 0.0  ;;  %v237_v37 = vsub.f32 %v545_v46, %v624_v59  ;;  %v267_v20 = vmul.f32 %v235_v31, %v235_v31  ;;  %v309_v2 = vsel %vm149_vm0, %v265_v11, 0.0 }
  0x69   : > { %v294_v47 = vadd.f32 %v293_v41, %v292_v42  ;;  %v238_v40 = vsub.f32 %v550_v49, %v624_v59  ;;  %v268_v23 = vmul.f32 %v236_v34, %v236_v34  ;;  %v311_v7 = vsel %vm149_vm0, %v266_v18, 0.0 }
  0x6a   : > { %v239_v24 = vsub.f32 %v555_v52, %v624_v59  ;;  %v269_v27 = vmul.f32 %v237_v37, %v237_v37  ;;  %v313_v29 = vsel %vm149_vm0, %v267_v20, 0.0  ;;  %v240_v46 = vsub.f32 %v560_v55, %v624_v59 }
  0x6b   : > { %v296_v51 = vadd.f32 %v295_v45, %v294_v47  ;;  %v270_v32 = vmul.f32 %v238_v40, %v238_v40  ;;  %v315_v13 = vsel %vm149_vm0, %v268_v23, 0.0  ;;  %v241_v33 = vsub.f32 %v565_v58, %v624_v59 }
  0x6c   : > { %v271_v36 = vmul.f32 %v239_v24, %v239_v24  ;;  %v317_v38 = vsel %vm149_vm0, %v269_v27, 0.0  ;;  %v242_v52 = vsub.f32 %v570_v61, %v624_v59  ;;  %v272_v42 = vmul.f32 %v240_v46, %v240_v46 }
  0x6d   : > { %v298_v56 = vadd.f32 %v297_v50, %v296_v51  ;;  %v319_v16 = vsel %vm149_vm0, %v270_v32, 0.0  ;;  %v243_v55 = vsub.f32 %v575_v4, %v624_v59  ;;  %v273_v45 = vmul.f32 %v241_v33, %v241_v33 }
  0x6e   : > { %v321_v47 = vsel %vm149_vm0, %v271_v36, 0.0  ;;  %v244_v58 = vsub.f32 %v580_v8, %v624_v59  ;;  %v274_v48 = vmul.f32 %v242_v52, %v242_v52  ;;  %v323_v50 = vsel %vm149_vm0, %v272_v42, 0.0 }
  0x6f   : > { %v300_v63 = vadd.f32 %v299_v54, %v298_v56  ;;  %v245_v61 = vsub.f32 %v585_v12, %v624_v59  ;;  %v275_v22 = vmul.f32 %v243_v55, %v243_v55  ;;  %v325_v53 = vsel %vm149_vm0, %v273_v45, 0.0 }
  0x70   : > { %v246_v8 = vsub.f32 %v590_v17, %v624_v59  ;;  %v276_v54 = vmul.f32 %v244_v58, %v244_v58  ;;  %v327_v56 = vsel %vm149_vm0, %v274_v48, 0.0  ;;  %v247_v12 = vsub.f32 %v595_v21, %v624_v59 }
  0x71   : > { %v302_v9 = vadd.f32 %v301_v62, %v300_v63  ;;  %v277_v60 = vmul.f32 %v245_v61, %v245_v61  ;;  %v329_v62 = vsel %vm149_vm0, %v275_v22, 0.0  ;;  %v248_v28 = vsub.f32 %v600_v26, %v624_v59 }
  0x72   : > { %v278_v5 = vmul.f32 %v246_v8, %v246_v8  ;;  %v331_v17 = vsel %vm149_vm0, %v276_v54, 0.0  ;;  %v279_v31 = vmul.f32 %v247_v12, %v247_v12  ;;  %v251_v26 = vsub.f32 %v615_v39, %v624_v59 }
  0x73   : > { %v304_v15 = vadd.f32 %v303_v6, %v302_v9  ;;  %v249_v9 = vsub.f32 %v605_v30, %v624_v59  ;;  %v333_v21 = vsel %vm149_vm0, %v277_v60, 0.0 }
  0x74   : > { %v335_v57 = vsel %vm149_vm0, %v278_v5, 0.0 }
  0x75   : > { %v306_v1 = vadd.f32 %v305_v14, %v304_v15  ;;  %v250_v14 = vsub.f32 %v610_v35, %v624_v59  ;;  %v280_v15 = vmul.f32 %v248_v28, %v248_v28  ;;  %v281_v18 = vmul.f32 %v249_v9, %v249_v9 }
  0x77   : > { %v308_v3 = vadd.f32 %v307_v0, %v306_v1  ;;  %v337_v0 = vsel %vm149_vm0, %v279_v31, 0.0  ;;  %v282_v37 = vmul.f32 %v250_v14, %v250_v14  ;;  %v339_v30 = vsel %vm149_vm0, %v280_v15, 0.0 }
  0x79   : > { %v310_v43 = vadd.f32 %v309_v2, %v308_v3  ;;  %v283_v2 = vmul.f32 %v251_v26, %v251_v26  ;;  %v341_v3 = vsel %vm149_vm0, %v281_v18, 0.0  ;;  %v343_v40 = vsel %vm149_vm0, %v282_v37, 0.0 }
  0x7b   : > { %v312_v10 = vadd.f32 %v311_v7, %v310_v43  ;;  %v345_v7 = vsel %vm149_vm0, %v283_v2, 0.0 }
  0x7d   : > { %v314_v49 = vadd.f32 %v313_v29, %v312_v10 }
  0x7f   : > { %v316_v41 = vadd.f32 %v315_v13, %v314_v49 }
  0x81   : > { %v318_v44 = vadd.f32 %v317_v38, %v316_v41 }
  0x83   : > { %v320_v19 = vadd.f32 %v319_v16, %v318_v44 }
  0x85   : > { %v322_v51 = vadd.f32 %v321_v47, %v320_v19 }
  0x87   : > { %v324_v4 = vadd.f32 %v323_v50, %v322_v51 }
  0x89   : > { %v326_v25 = vadd.f32 %v325_v53, %v324_v4 }
  0x8b   : > { %v328_v63 = vadd.f32 %v327_v56, %v326_v25 }
  0x8d   : > { %v330_v6 = vadd.f32 %v329_v62, %v328_v63 }
  0x8f   : > { %v332_v11 = vadd.f32 %v331_v17, %v330_v6 }
  0x91   : > { %v334_v34 = vadd.f32 %v333_v21, %v332_v11 }
  0x93   : > { %v336_v1 = vadd.f32 %v335_v57, %v334_v34 }
  0x95   : > { %v338_v20 = vadd.f32 %v337_v0, %v336_v1 }
  0x97   : > { %v340_v35 = vadd.f32 %v339_v30, %v338_v20 }
  0x99   : > { %v342_v23 = vadd.f32 %v341_v3, %v340_v35 }
  0x9b   : > { %v344_v43 = vadd.f32 %v343_v40, %v342_v23 }
  0x9d   : > { %v346_v39 = vadd.f32 %v345_v7, %v344_v43 }
  0x9f   : > { %v347_v59 = vrot.slane %v346_v39, 4 }
  0xa1   : > { %v348_v24 = vadd.f32 %v347_v59, %v346_v39 }
  0xa3   : > { %v349_v27 = vrot.slane %v348_v24, 2 }
  0xa5   : > { %v350_v29 = vadd.f32 %v349_v27, %v348_v24 }
  0xa7   : > { %v351_v10 = vrot.slane %v350_v29, 1 }
  0xa9   : > { %v352_v46 = vadd.f32 %v351_v10, %v350_v29 }
  0xab   : > { %355 = vst.msk [vmem:[%s705_s16 + $0x1] sm:$0x1] %vm353_vm1, %v352_v46 }
  0xac PF: > { %s11_s6 = sadd.s32 1, %s433_s6  }
  0xad   : > { %p8_p5 = scmp.ge.s32.totalorder %s11_s6, 4  }
  0xaf   :  { %10 = sbr.rel (!%p8_p5) target bundleno = 1 (0x1), region = 54 }

// kernel: resblock_pallas.5
= control target key start
LH: loop header
LB: loop body
LE: loop exit
PB: predicated region body
PF: predicated region fallthrough
CT: control target
= control target key end

     0   :  { %s901_s18 = smov 0   ;;  %s1194_s0 = inlined_call_operand.vmem [shape: f32[512,4], index: 0, kind: input, shape index: {}, may-alias: {0,5}]   ;;  %s1195_s1 = inlined_call_operand.vmem [shape: bf16[512,4], index: 1, kind: input, shape index: {}]   ;;  %s1196_s2 = inlined_call_operand.vmem [shape: f32[1,4], index: 2, kind: input, shape index: {}]   ;;  %s1197_s3 = inlined_call_operand.vmem [shape: f32[1,4], index: 3, kind: input, shape index: {}]   ;;  %s1198_s4 = inlined_call_operand.vmem [shape: bf16[4,4], index: 4, kind: input, shape index: {}]   ;;  %s1199_s5 = inlined_call_operand.vmem [shape: f32[512,4], index: 5, kind: output, shape index: {}, may-alias: {0,5}]  }
   0x1 LB: > { %s742_s19 = sadd.s32 4294967295, %s869_s18   ;;  %p746_p0 = scmp.ge.s32.totalorder %s869_s18, 1  ;;  %s869_s18 = sphi %s901_s18, %s15_s18  }
   0x2   : > { %p199_p1 = scmp.lt.s32.totalorder %s869_s18, 3 }
   0x4   : > { %p200_p2 = pnand %p746_p0, %p199_p1 }
   0x5   : > { %s747_s22 = sshll.u32 (!%p200_p2), %s742_s19, 5 }
   0x6   : > { %203 = sbr.rel (%p200_p2) target bundleno = 219 (0xdb), region = 40  ;;  %p233_p3 = scmp.lt.s32.totalorder (!%p200_p2), %s747_s22, 63 }
   0xb   : > { %v435_v0 = vld [vmem:[%s1198_s4] sm:$0x3]  ;;  %vm485_vm0 = vcmask 1041408   ;;  %s1201_s22 = smov (!%p233_p3, %s747_s22), 63  ;;  %vm436_vm1 = vcmask 31744  }
   0xc   : > { %v487_v1 = vsel %vm485_vm0, %v435_v0, 0  ;;  %s750_s23 = sshll.u32 %s1201_s22, 2  ;;  %v923_v2 = vld [vmem:[%s1196_s2] ss:$0 sm:$0xff]  ;;  %s748_s6 = sshll.u32 %s1201_s22, 3 }
   0xd   : > { %496 = vmatpush.bf16.msra.mxu0 %v487_v1  ;;  %850 = vmatpush.bf16.msra.mxu1 %v487_v1  ;;  %s918_s26 = scalar_lea.vmem %s1195_s1, %s750_s23  ;;  %v931_v8 = vld [vmem:[%s1197_s3] ss:$0 sm:$0xff]  ;;  %s1032_s9 = scalar_lea.vmem %s1194_s0, %s748_s6 }
   0xe   : > { %851 = vmatpush.bf16.msra.mxu2 %v487_v1  ;;  %852 = vmatpush.bf16.msra.mxu3 %v487_v1  ;;  %v772_v3 = vld [vmem:[%s918_s26] sm:$0xff]   ;;  %v835_v32 = vld [vmem:[%s918_s26 + $0x8] sm:$0xff]   ;;  %s1096_s12 = scalar_lea.vmem %s1199_s5, %s748_s6 }
   0xf   : > { %v838_v4 = vld [vmem:[%s918_s26 + $0x20] sm:$0xff]   ;;  %v773_v6 = vunpack.c.l.bf16 %v772_v3  ;;  %v774_v7 = vunpack.c.h.bf16 %v772_v3  ;;  %v839_v37 = vld [vmem:[%s918_s26 + $0x28] sm:$0xff]   ;;  %v777_v45 = vunpack.c.l.bf16 %v835_v32  ;;  %v778_v46 = vunpack.c.h.bf16 %v835_v32 }
  0x10   : > { %v842_v5 = vld [vmem:[%s918_s26 + $0x40] sm:$0xff]   ;;  %v789_v9 = vunpack.c.l.bf16 %v838_v4  ;;  %v790_v10 = vunpack.c.h.bf16 %v838_v4  ;;  %v843_v42 = vld [vmem:[%s918_s26 + $0x48] sm:$0xff]   ;;  %v793_v50 = vunpack.c.l.bf16 %v839_v37  ;;  %v794_v51 = vunpack.c.h.bf16 %v839_v37 }
  0x11   : > { %v846_v11 = vld [vmem:[%s918_s26 + $0x60] sm:$0xff]   ;;  %v805_v12 = vunpack.c.l.bf16 %v842_v5  ;;  %v806_v13 = vunpack.c.h.bf16 %v842_v5  ;;  %v319_v16 = vmul.f32 %v923_v2, %v773_v6  ;;  %v320_v17 = vmul.f32 %v923_v2, %v774_v7  ;;  %v847_v47 = vld [vmem:[%s918_s26 + $0x68] sm:$0xff]  }
  0x12   : > { %v821_v14 = vunpack.c.l.bf16 %v846_v11  ;;  %v822_v15 = vunpack.c.h.bf16 %v846_v11  ;;  %v327_v18 = vmul.f32 %v923_v2, %v789_v9  ;;  %v328_v19 = vmul.f32 %v923_v2, %v790_v10 }
  0x13   : > { %v335_v20 = vmul.f32 %v923_v2, %v805_v12  ;;  %v336_v21 = vmul.f32 %v923_v2, %v806_v13  ;;  %v355_v24 = vadd.f32 %v931_v8, %v319_v16  ;;  %v356_v25 = vadd.f32 %v931_v8, %v320_v17 }
  0x14   : > { %v343_v22 = vmul.f32 %v923_v2, %v821_v14  ;;  %v344_v23 = vmul.f32 %v923_v2, %v822_v15  ;;  %v363_v26 = vadd.f32 %v931_v8, %v327_v18  ;;  %v364_v27 = vadd.f32 %v931_v8, %v328_v19  ;;  %v836_v14 = vld [vmem:[%s918_s26 + $0x10] sm:$0xff]  }
  0x15   : > { %v371_v28 = vadd.f32 %v931_v8, %v335_v20  ;;  %v372_v29 = vadd.f32 %v931_v8, %v336_v21  ;;  %v387_v33 = vmax.f32 %v355_v24, 0.0  ;;  %v388_v34 = vmax.f32 %v356_v25, 0.0  ;;  %v840_v15 = vld [vmem:[%s918_s26 + $0x30] sm:$0xff]  }
  0x16   : > { %v379_v30 = vadd.f32 %v931_v8, %v343_v22  ;;  %v380_v31 = vadd.f32 %v931_v8, %v344_v23  ;;  %v395_v35 = vmax.f32 %v363_v26, 0.0  ;;  %v396_v36 = vmax.f32 %v364_v27, 0.0  ;;  %v844_v20 = vld [vmem:[%s918_s26 + $0x50] sm:$0xff]  }
  0x17   : > { %v403_v38 = vmax.f32 %v371_v28, 0.0  ;;  %v404_v39 = vmax.f32 %v372_v29, 0.0  ;;  %v419_v43 = vpack.c.bf16 %v388_v34, %v387_v33  ;;  %v321_v52 = vmul.f32 %v923_v2, %v777_v45  ;;  %v848_v21 = vld [vmem:[%s918_s26 + $0x70] sm:$0xff]  }
  0x18   : > { %v411_v40 = vmax.f32 %v379_v30, 0.0  ;;  %v412_v41 = vmax.f32 %v380_v31, 0.0  ;;  %v423_v44 = vpack.c.bf16 %v396_v36, %v395_v35  ;;  %v322_v53 = vmul.f32 %v923_v2, %v778_v46 }
  0x19   : > { %v427_v48 = vpack.c.bf16 %v404_v39, %v403_v38  ;;  %753 = vmatmul.msk.bf16.vlgmr.msra.gmra.mxu0 %vm436_vm1, %v419_v43  ;;  %v809_v54 = vunpack.c.l.bf16 %v843_v42  ;;  %v810_v55 = vunpack.c.h.bf16 %v843_v42  ;;  %v329_v56 = vmul.f32 %v923_v2, %v793_v50 }
  0x1a   : > { %v431_v49 = vpack.c.bf16 %v412_v41, %v411_v40  ;;  %757 = vmatmul.msk.bf16.vlgmr.msra.gmra.mxu1 %vm436_vm1, %v423_v44  ;;  %v330_v57 = vmul.f32 %v923_v2, %v794_v51  ;;  %v825_v58 = vunpack.c.l.bf16 %v847_v47  ;;  %v826_v59 = vunpack.c.h.bf16 %v847_v47 }
  0x1b   : > { %761 = vmatmul.msk.bf16.vlgmr.msra.gmra.mxu2 %vm436_vm1, %v427_v48  ;;  %v337_v60 = vmul.f32 %v923_v2, %v809_v54  ;;  %v338_v61 = vmul.f32 %v923_v2, %v810_v55  ;;  %v357_v0 = vadd.f32 %v931_v8, %v321_v52  ;;  %v358_v1 = vadd.f32 %v931_v8, %v322_v53 }
  0x1c   : > { %765 = vmatmul.msk.bf16.vlgmr.msra.gmra.mxu3 %vm436_vm1, %v431_v49  ;;  %v345_v62 = vmul.f32 %v923_v2, %v825_v58  ;;  %v346_v63 = vmul.f32 %v923_v2, %v826_v59  ;;  %v365_v3 = vadd.f32 %v931_v8, %v329_v56  ;;  %v366_v4 = vadd.f32 %v931_v8, %v330_v57  ;;  %v837_v56 = vld [vmem:[%s918_s26 + $0x18] sm:$0xff]  }
  0x1d   : > { %v373_v5 = vadd.f32 %v931_v8, %v337_v60  ;;  %v374_v6 = vadd.f32 %v931_v8, %v338_v61  ;;  %v389_v10 = vmax.f32 %v357_v0, 0.0  ;;  %v390_v11 = vmax.f32 %v358_v1, 0.0  ;;  %v841_v59 = vld [vmem:[%s918_s26 + $0x38] sm:$0xff]  }
  0x1e   : > { %v381_v7 = vadd.f32 %v931_v8, %v345_v62  ;;  %v382_v9 = vadd.f32 %v931_v8, %v346_v63  ;;  %v397_v12 = vmax.f32 %v365_v3, 0.0  ;;  %v398_v13 = vmax.f32 %v366_v4, 0.0  ;;  %v845_v60 = vld [vmem:[%s918_s26 + $0x58] sm:$0xff]  }
  0x1f   : > { %v405_v16 = vmax.f32 %v373_v5, 0.0  ;;  %v406_v17 = vmax.f32 %v374_v6, 0.0  ;;  %v781_v22 = vunpack.c.l.bf16 %v836_v14  ;;  %v782_v23 = vunpack.c.h.bf16 %v836_v14  ;;  %v849_v61 = vld [vmem:[%s918_s26 + $0x78] sm:$0xff]  }
  0x20   : > { %v413_v18 = vmax.f32 %v381_v7, 0.0  ;;  %v414_v19 = vmax.f32 %v382_v9, 0.0  ;;  %v797_v24 = vunpack.c.l.bf16 %v840_v15  ;;  %v798_v25 = vunpack.c.h.bf16 %v840_v15 }
  0x21   : > { %v420_v26 = vpack.c.bf16 %v390_v11, %v389_v10  ;;  %v424_v27 = vpack.c.bf16 %v398_v13, %v397_v12  ;;  %v813_v28 = vunpack.c.l.bf16 %v844_v20  ;;  %v814_v29 = vunpack.c.h.bf16 %v844_v20 }
  0x22   : > { %v428_v30 = vpack.c.bf16 %v406_v17, %v405_v16  ;;  %v432_v31 = vpack.c.bf16 %v414_v19, %v413_v18  ;;  %v829_v32 = vunpack.c.l.bf16 %v848_v21  ;;  %v830_v33 = vunpack.c.h.bf16 %v848_v21 }
  0x23   : > { %v323_v34 = vmul.f32 %v923_v2, %v781_v22  ;;  %v324_v35 = vmul.f32 %v923_v2, %v782_v23  ;;  %v331_v36 = vmul.f32 %v923_v2, %v797_v24  ;;  %v332_v37 = vmul.f32 %v923_v2, %v798_v25 }
  0x24   : > { %v339_v38 = vmul.f32 %v923_v2, %v813_v28  ;;  %v340_v39 = vmul.f32 %v923_v2, %v814_v29  ;;  %v347_v40 = vmul.f32 %v923_v2, %v829_v32  ;;  %v348_v41 = vmul.f32 %v923_v2, %v830_v33 }
  0x25   : > { %v359_v42 = vadd.f32 %v931_v8, %v323_v34  ;;  %v360_v43 = vadd.f32 %v931_v8, %v324_v35  ;;  %v367_v44 = vadd.f32 %v931_v8, %v331_v36  ;;  %v368_v45 = vadd.f32 %v931_v8, %v332_v37 }
  0x26   : > { %v375_v46 = vadd.f32 %v931_v8, %v339_v38  ;;  %v376_v47 = vadd.f32 %v931_v8, %v340_v39  ;;  %v383_v48 = vadd.f32 %v931_v8, %v347_v40  ;;  %v384_v49 = vadd.f32 %v931_v8, %v348_v41  ;;  %v586_v39 = vld [vmem:[%s1032_s9 + $0x40] sm:$0xff]  ;;  %v579_v40 = vld [vmem:[%s1032_s9 + $0x8] sm:$0xff] }
  0x27   : > { %v391_v50 = vmax.f32 %v359_v42, 0.0  ;;  %v392_v51 = vmax.f32 %v360_v43, 0.0  ;;  %v399_v52 = vmax.f32 %v367_v44, 0.0  ;;  %v400_v53 = vmax.f32 %v368_v45, 0.0  ;;  %v587_v41 = vld [vmem:[%s1032_s9 + $0x48] sm:$0xff]  ;;  %v580_v44 = vld [vmem:[%s1032_s9 + $0x10] sm:$0xff] }
  0x28   : > { %v407_v54 = vmax.f32 %v375_v46, 0.0  ;;  %v408_v55 = vmax.f32 %v376_v47, 0.0  ;;  %v415_v57 = vmax.f32 %v383_v48, 0.0  ;;  %v416_v58 = vmax.f32 %v384_v49, 0.0  ;;  %v595_v42 = vld [vmem:[%s1032_s9 + $0x88] sm:$0xff]  ;;  %v588_v45 = vld [vmem:[%s1032_s9 + $0x50] sm:$0xff] }
  0x29   : > { %754 = vmatmul.msk.bf16.gmra.mxu0 %vm436_vm1, %v420_v26  ;;  %v421_v62 = vpack.c.bf16 %v392_v51, %v391_v50  ;;  %v425_v63 = vpack.c.bf16 %v400_v53, %v399_v52  ;;  %v785_v0 = vunpack.c.l.bf16 %v837_v56  ;;  %v786_v1 = vunpack.c.h.bf16 %v837_v56  ;;  %v603_v43 = vld [vmem:[%s1032_s9 + $0xc8] sm:$0xff]  ;;  %v596_v46 = vld [vmem:[%s1032_s9 + $0x90] sm:$0xff]  ;;  %v581_v48 = vld [vmem:[%s1032_s9 + $0x18] sm:$0xff] }
  0x2a   : > { %758 = vmatmul.msk.bf16.gmra.mxu1 %vm436_vm1, %v424_v27  ;;  %v429_v3 = vpack.c.bf16 %v408_v55, %v407_v54  ;;  %v801_v4 = vunpack.c.l.bf16 %v841_v59  ;;  %v802_v5 = vunpack.c.h.bf16 %v841_v59  ;;  %v817_v6 = vunpack.c.l.bf16 %v845_v60  ;;  %v604_v47 = vld [vmem:[%s1032_s9 + $0xd0] sm:$0xff]  ;;  %v589_v49 = vld [vmem:[%s1032_s9 + $0x58] sm:$0xff]  ;;  %v1053_v52 = vld [vmem:[%s1032_s9 + $0x20] sm:$0xff] }
  0x2b   : > { %762 = vmatmul.msk.bf16.gmra.mxu2 %vm436_vm1, %v428_v30  ;;  %v433_v7 = vpack.c.bf16 %v416_v58, %v415_v57  ;;  %v818_v9 = vunpack.c.h.bf16 %v845_v60  ;;  %v833_v10 = vunpack.c.l.bf16 %v849_v61  ;;  %v834_v11 = vunpack.c.h.bf16 %v849_v61  ;;  %v1047_v50 = vld [vmem:[%s1032_s9 + $0x98] sm:$0xff]  ;;  %v1056_v53 = vld [vmem:[%s1032_s9 + $0x60] sm:$0xff]  ;;  %v1065_v56 = vld [vmem:[%s1032_s9 + $0x28] sm:$0xff] }
  0x2c   : > { %766 = vmatmul.msk.bf16.gmra.mxu3 %vm436_vm1, %v432_v31  ;;  %v325_v12 = vmul.f32 %v923_v2, %v785_v0  ;;  %v326_v13 = vmul.f32 %v923_v2, %v786_v1  ;;  %v333_v14 = vmul.f32 %v923_v2, %v801_v4  ;;  %v334_v15 = vmul.f32 %v923_v2, %v802_v5  ;;  %v1050_v51 = vld [vmem:[%s1032_s9 + $0xd8] sm:$0xff]  ;;  %v1059_v54 = vld [vmem:[%s1032_s9 + $0xa0] sm:$0xff]  ;;  %v1068_v57 = vld [vmem:[%s1032_s9 + $0x68] sm:$0xff] }
  0x2d   : > { %v341_v16 = vmul.f32 %v923_v2, %v817_v6  ;;  %v342_v17 = vmul.f32 %v923_v2, %v818_v9  ;;  %v349_v18 = vmul.f32 %v923_v2, %v833_v10  ;;  %v350_v19 = vmul.f32 %v923_v2, %v834_v11  ;;  %v1062_v55 = vld [vmem:[%s1032_s9 + $0xe0] sm:$0xff]  ;;  %v1071_v58 = vld [vmem:[%s1032_s9 + $0xa8] sm:$0xff]  ;;  %v1077_v60 = vld [vmem:[%s1032_s9 + $0x30] sm:$0xff] }
  0x2e   : > { %v361_v20 = vadd.f32 %v931_v8, %v325_v12  ;;  %v362_v21 = vadd.f32 %v931_v8, %v326_v13  ;;  %v369_v22 = vadd.f32 %v931_v8, %v333_v14  ;;  %v370_v23 = vadd.f32 %v931_v8, %v334_v15  ;;  %v1074_v59 = vld [vmem:[%s1032_s9 + $0xe8] sm:$0xff]  ;;  %v1080_v61 = vld [vmem:[%s1032_s9 + $0x70] sm:$0xff]  ;;  %v1089_v0 = vld [vmem:[%s1032_s9 + $0x38] sm:$0xff] }
  0x2f   : > { %v377_v24 = vadd.f32 %v931_v8, %v341_v16  ;;  %v378_v25 = vadd.f32 %v931_v8, %v342_v17  ;;  %v385_v26 = vadd.f32 %v931_v8, %v349_v18  ;;  %v386_v27 = vadd.f32 %v931_v8, %v350_v19  ;;  %v578_v8 = vld [vmem:[%s1032_s9] sm:$0xff]  ;;  %v1099_v4 = vld [vmem:[%s1032_s9 + $0x78] sm:$0xff] }
  0x30   : > { %v393_v28 = vmax.f32 %v361_v20, 0.0  ;;  %v394_v29 = vmax.f32 %v362_v21, 0.0  ;;  %v401_v2 = vmax.f32 %v369_v22, 0.0  ;;  %v402_v30 = vmax.f32 %v370_v23, 0.0  ;;  %v1102_v5 = vld [vmem:[%s1032_s9 + $0xb8] sm:$0xff]  ;;  %v594_v10 = vld [vmem:[%s1032_s9 + $0x80] sm:$0xff] }
  0x31   : > { %v409_v31 = vmax.f32 %v377_v24, 0.0  ;;  %v410_v32 = vmax.f32 %v378_v25, 0.0  ;;  %v417_v33 = vmax.f32 %v385_v26, 0.0  ;;  %v418_v34 = vmax.f32 %v386_v27, 0.0  ;;  %v1105_v6 = vld [vmem:[%s1032_s9 + $0xf8] sm:$0xff]  ;;  %v602_v11 = vld [vmem:[%s1032_s9 + $0xc0] sm:$0xff] }
  0x32   : > { %v422_v35 = vpack.c.bf16 %v394_v29, %v393_v28  ;;  %v426_v36 = vpack.c.bf16 %v402_v30, %v401_v2 }
  0x33   : > { %v430_v37 = vpack.c.bf16 %v410_v32, %v409_v31  ;;  %v434_v38 = vpack.c.bf16 %v418_v34, %v417_v33 }
  0x39   : > { %755 = vmatmul.msk.bf16.gmra.mxu0 %vm436_vm1, %v421_v62  ;;  %v1083_v62 = vld [vmem:[%s1032_s9 + $0xb0] sm:$0xff] }
  0x3a   : > { %759 = vmatmul.msk.bf16.gmra.mxu1 %vm436_vm1, %v425_v63  ;;  %v1086_v63 = vld [vmem:[%s1032_s9 + $0xf0] sm:$0xff] }
  0x3b   : > { %763 = vmatmul.msk.bf16.gmra.mxu2 %vm436_vm1, %v429_v3 }
  0x3c   : > { %767 = vmatmul.msk.bf16.gmra.mxu3 %vm436_vm1, %v433_v7 }
  0x49   : > { %756 = vmatmul.msk.bf16.gmra.mxu0 %vm436_vm1, %v422_v35 }
  0x4a   : > { %760 = vmatmul.msk.bf16.gmra.mxu1 %vm436_vm1, %v426_v36 }
  0x4b   : > { %764 = vmatmul.msk.bf16.gmra.mxu2 %vm436_vm1, %v430_v37 }
  0x4c   : > { %768 = vmatmul.msk.bf16.gmra.mxu3 %vm436_vm1, %v434_v38 }
  0x96   : > { %v498_v1 = vpop.f32.mrf.mxu0 }
  0x97   : > { %v518_v3 = vpop.f32.mrf.mxu1  ;;  %v610_v7 = vadd.f32 %v578_v8, %v498_v1 }
  0x98   : > { %v618_v9 = vadd.f32 %v586_v39, %v518_v3 }
  0x99   : > { %642 = vst.msk [vmem:[%s1096_s12] sm:$0xff] %vm436_vm1, %v610_v7 }
  0x9a   : > { %650 = vst.msk [vmem:[%s1096_s12 + $0x40] sm:$0xff] %vm436_vm1, %v618_v9 }
  0x9e   : > { %v538_v12 = vpop.f32.mrf.mxu2  ;;  %v500_v15 = vpop.f32.mrf.mxu0 }
  0x9f   : > { %v558_v13 = vpop.f32.mrf.mxu3  ;;  %v626_v14 = vadd.f32 %v594_v10, %v538_v12  ;;  %v520_v16 = vpop.f32.mrf.mxu1  ;;  %v611_v18 = vadd.f32 %v579_v40, %v500_v15 }
  0xa0   : > { %v634_v17 = vadd.f32 %v602_v11, %v558_v13  ;;  %v619_v19 = vadd.f32 %v587_v41, %v520_v16 }
  0xa1   : > { %658 = vst.msk [vmem:[%s1096_s12 + $0x80] sm:$0xff] %vm436_vm1, %v626_v14 }
  0xa2   : > { %643 = vst.msk [vmem:[%s1096_s12 + $0x8] sm:$0xff] %vm436_vm1, %v611_v18 }
  0xa3   : > { %651 = vst.msk [vmem:[%s1096_s12 + $0x48] sm:$0xff] %vm436_vm1, %v619_v19 }
  0xa4   : > { %666 = vst.msk [vmem:[%s1096_s12 + $0xc0] sm:$0xff] %vm436_vm1, %v634_v17 }
  0xa6   : > { %v540_v20 = vpop.f32.mrf.mxu2  ;;  %v503_v23 = vpop.f32.mrf.mxu0 }
  0xa7   : > { %v560_v21 = vpop.f32.mrf.mxu3  ;;  %v627_v22 = vadd.f32 %v595_v42, %v540_v20  ;;  %v523_v24 = vpop.f32.mrf.mxu1  ;;  %v612_v26 = vadd.f32 %v580_v44, %v503_v23 }
  0xa8   : > { %v635_v25 = vadd.f32 %v603_v43, %v560_v21  ;;  %v620_v27 = vadd.f32 %v588_v45, %v523_v24 }
  0xa9   : > { %659 = vst.msk [vmem:[%s1096_s12 + $0x88] sm:$0xff] %vm436_vm1, %v627_v22 }
  0xaa   : > { %644 = vst.msk [vmem:[%s1096_s12 + $0x10] sm:$0xff] %vm436_vm1, %v612_v26 }
  0xab   : > { %652 = vst.msk [vmem:[%s1096_s12 + $0x50] sm:$0xff] %vm436_vm1, %v620_v27 }
  0xac   : > { %667 = vst.msk [vmem:[%s1096_s12 + $0xc8] sm:$0xff] %vm436_vm1, %v635_v25 }
  0xae   : > { %v543_v28 = vpop.f32.mrf.mxu2  ;;  %v505_v30 = vpop.f32.mrf.mxu0 }
  0xaf   : > { %v563_v29 = vpop.f32.mrf.mxu3  ;;  %v628_v2 = vadd.f32 %v596_v46, %v543_v28  ;;  %v525_v31 = vpop.f32.mrf.mxu1  ;;  %v613_v33 = vadd.f32 %v581_v48, %v505_v30 }
  0xb0   : > { %v636_v32 = vadd.f32 %v604_v47, %v563_v29  ;;  %v621_v34 = vadd.f32 %v589_v49, %v525_v31 }
  0xb1   : > { %660 = vst.msk [vmem:[%s1096_s12 + $0x90] sm:$0xff] %vm436_vm1, %v628_v2 }
  0xb2   : > { %645 = vst.msk [vmem:[%s1096_s12 + $0x18] sm:$0xff] %vm436_vm1, %v613_v33 }
  0xb3   : > { %653 = vst.msk [vmem:[%s1096_s12 + $0x58] sm:$0xff] %vm436_vm1, %v621_v34 }
  0xb4   : > { %668 = vst.msk [vmem:[%s1096_s12 + $0xd0] sm:$0xff] %vm436_vm1, %v636_v32 }
  0xb6   : > { %v545_v35 = vpop.f32.mrf.mxu2  ;;  %v508_v38 = vpop.f32.mrf.mxu0 }
  0xb7   : > { %v565_v36 = vpop.f32.mrf.mxu3  ;;  %v629_v37 = vadd.f32 %v1047_v50, %v545_v35  ;;  %v528_v8 = vpop.f32.mrf.mxu1  ;;  %v614_v40 = vadd.f32 %v1053_v52, %v508_v38 }
  0xb8   : > { %v637_v39 = vadd.f32 %v1050_v51, %v565_v36  ;;  %v622_v41 = vadd.f32 %v1056_v53, %v528_v8 }
  0xb9   : > { %661 = vst.msk [vmem:[%s1096_s12 + $0x98] sm:$0xff] %vm436_vm1, %v629_v37 }
  0xba   : > { %646 = vst.msk [vmem:[%s1096_s12 + $0x20] sm:$0xff] %vm436_vm1, %v614_v40 }
  0xbb   : > { %654 = vst.msk [vmem:[%s1096_s12 + $0x60] sm:$0xff] %vm436_vm1, %v622_v41 }
  0xbc   : > { %669 = vst.msk [vmem:[%s1096_s12 + $0xd8] sm:$0xff] %vm436_vm1, %v637_v39 }
  0xbe   : > { %v548_v42 = vpop.f32.mrf.mxu2  ;;  %v510_v45 = vpop.f32.mrf.mxu0 }
  0xbf   : > { %v568_v43 = vpop.f32.mrf.mxu3  ;;  %v630_v44 = vadd.f32 %v1059_v54, %v548_v42  ;;  %v530_v46 = vpop.f32.mrf.mxu1  ;;  %v615_v48 = vadd.f32 %v1065_v56, %v510_v45 }
  0xc0   : > { %v638_v47 = vadd.f32 %v1062_v55, %v568_v43  ;;  %v623_v49 = vadd.f32 %v1068_v57, %v530_v46 }
  0xc1   : > { %662 = vst.msk [vmem:[%s1096_s12 + $0xa0] sm:$0xff] %vm436_vm1, %v630_v44 }
  0xc2   : > { %647 = vst.msk [vmem:[%s1096_s12 + $0x28] sm:$0xff] %vm436_vm1, %v615_v48 }
  0xc3   : > { %655 = vst.msk [vmem:[%s1096_s12 + $0x68] sm:$0xff] %vm436_vm1, %v623_v49 }
  0xc4   : > { %670 = vst.msk [vmem:[%s1096_s12 + $0xe0] sm:$0xff] %vm436_vm1, %v638_v47 }
  0xc6   : > { %v550_v50 = vpop.f32.mrf.mxu2  ;;  %v513_v53 = vpop.f32.mrf.mxu0 }
  0xc7   : > { %v570_v51 = vpop.f32.mrf.mxu3  ;;  %v631_v52 = vadd.f32 %v1071_v58, %v550_v50  ;;  %v533_v54 = vpop.f32.mrf.mxu1  ;;  %v616_v56 = vadd.f32 %v1077_v60, %v513_v53 }
  0xc8   : > { %v639_v55 = vadd.f32 %v1074_v59, %v570_v51  ;;  %v624_v57 = vadd.f32 %v1080_v61, %v533_v54 }
  0xc9   : > { %663 = vst.msk [vmem:[%s1096_s12 + $0xa8] sm:$0xff] %vm436_vm1, %v631_v52 }
  0xca   : > { %648 = vst.msk [vmem:[%s1096_s12 + $0x30] sm:$0xff] %vm436_vm1, %v616_v56 }
  0xcb   : > { %656 = vst.msk [vmem:[%s1096_s12 + $0x70] sm:$0xff] %vm436_vm1, %v624_v57 }
  0xcc   : > { %671 = vst.msk [vmem:[%s1096_s12 + $0xe8] sm:$0xff] %vm436_vm1, %v639_v55 }
  0xce   : > { %v553_v58 = vpop.f32.mrf.mxu2  ;;  %v515_v3 = vpop.f32.mrf.mxu0 }
  0xcf   : > { %v573_v1 = vpop.f32.mrf.mxu3  ;;  %v632_v59 = vadd.f32 %v1083_v62, %v553_v58  ;;  %v535_v60 = vpop.f32.mrf.mxu1  ;;  %v617_v61 = vadd.f32 %v1089_v0, %v515_v3 }
  0xd0   : > { %v640_v7 = vadd.f32 %v1086_v63, %v573_v1  ;;  %v625_v9 = vadd.f32 %v1099_v4, %v535_v60 }
  0xd1   : > { %664 = vst.msk [vmem:[%s1096_s12 + $0xb0] sm:$0xff] %vm436_vm1, %v632_v59 }
  0xd2   : > { %649 = vst.msk [vmem:[%s1096_s12 + $0x38] sm:$0xff] %vm436_vm1, %v617_v61 }
  0xd3   : > { %657 = vst.msk [vmem:[%s1096_s12 + $0x78] sm:$0xff] %vm436_vm1, %v625_v9 }
  0xd4   : > { %672 = vst.msk [vmem:[%s1096_s12 + $0xf0] sm:$0xff] %vm436_vm1, %v640_v7 }
  0xd6   : > { %v555_v10 = vpop.f32.mrf.mxu2 }
  0xd7   : > { %v575_v11 = vpop.f32.mrf.mxu3  ;;  %v633_v62 = vadd.f32 %v1102_v5, %v555_v10 }
  0xd8   : > { %v641_v12 = vadd.f32 %v1105_v6, %v575_v11 }
  0xd9   : > { %665 = vst.msk [vmem:[%s1096_s12 + $0xb8] sm:$0xff] %vm436_vm1, %v633_v62 }
  0xda   : > { %673 = vst.msk [vmem:[%s1096_s12 + $0xf8] sm:$0xff] %vm436_vm1, %v641_v12 }
  0xdb PF: > { %s15_s18 = sadd.s32 1, %s869_s18  }
  0xdc   : > { %p12_p4 = scmp.ge.s32.totalorder %s15_s18, 4  }
  0xde   :  { %14 = sbr.rel (!%p12_p4) target bundleno = 1 (0x1), region = 73 }

// kernel: resblock_pallas.4
= control target key start
LH: loop header
LB: loop body
LE: loop exit
PB: predicated region body
PF: predicated region fallthrough
CT: control target
= control target key end

     0   :  { %s3983_s18 = smov 0   ;;  %s6004_s0 = inlined_call_operand.vmem [shape: f32[512,4], index: 0, kind: input, shape index: {}]   ;;  %s6005_s1 = inlined_call_operand.vmem [shape: f32[1,4], index: 1, kind: input, shape index: {}]   ;;  %s6006_s2 = inlined_call_operand.vmem [shape: f32[1,4], index: 2, kind: input, shape index: {}]   ;;  %s6007_s3 = inlined_call_operand.vmem [shape: bf16[9,4,4], index: 3, kind: input, shape index: {}]   ;;  %s6008_s4 = inlined_call_operand.vmem [shape: bf16[512,4], index: 4, kind: output, shape index: {0}]   ;;  %s6009_s5 = inlined_call_operand.vmem [shape: f32[2,2,4], index: 5, kind: output, shape index: {1}]  }
   0x1 LB: > { %s3989_s19 = sadd.s32 4294967295, %s3950_s18   ;;  %p3768_p0 = scmp.ge.s32.totalorder %s3950_s18, 1  ;;  %s3950_s18 = sphi %s3983_s18, %s16_s18  }
   0x2   : > { %p191_p1 = scmp.lt.s32.totalorder %s3950_s18, 3 }
   0x4   : > { %p192_p2 = pnand %p3768_p0, %p191_p1 }
   0x6   : > { %195 = sbr.rel (%p192_p2) target bundleno = 861 (0x35d), region = 36 }
   0xb   : > { %v1072_v0 = vld [vmem:[%s6007_s3] sm:$0x3]  ;;  %vm1121_vm0 = vcmask 1041408   ;;  %s3769_s22 = sshll.u32 %s3989_s19, 5  ;;  %vm376_vm1 = vcmask 31744   ;;  %v6010_v5 = vmov 0.0  }
   0xc   : > { %v1123_v1 = vsel %vm1121_vm0, %v1072_v0, 0  ;;  %p224_p3 = scmp.lt.s32.totalorder %s3769_s22, 63  ;;  %v4001_v2 = vld [vmem:[%s6005_s1] ss:$0 sm:$0xff]  ;;  %v3807_v3 = vld [vmem:[%s6007_s3 + $0x4] sm:$0x3] }
   0xd   : > { %3928 = vmatpush.bf16.msra.mxu1 %v1123_v1  ;;  %3929 = vmatpush.bf16.msra.mxu2 %v1123_v1  ;;  %v1663_v4 = vsel %vm1121_vm0, %v3807_v3, 0  ;;  %377 = vst.msk [vmem:[#allocation2] sm:$0xff] %vm376_vm1, %v6010_v5  ;;  %v3824_v6 = vld [vmem:[%s6007_s3 + $0x6] sm:$0x3]  ;;  %v3790_v8 = vld [vmem:[%s6007_s3 + $0x2] sm:$0x3] }
   0xe   : > { %3930 = vmatpush.bf16.msra.mxu3 %v1123_v1  ;;  %1132 = vmatpush.bf16.msra.mxu0 %v1123_v1  ;;  %s6326_s22 = smov (!%p224_p3, %s3769_s22), 63  ;;  %378 = vst.msk [vmem:[#allocation2 + $0x8] sm:$0xff] %vm376_vm1, %v6010_v5  ;;  %v1949_v7 = vsel %vm1121_vm0, %v3824_v6, 0  ;;  %v3841_v9 = vld [vmem:[%s6007_s3 + $0x8] sm:$0x3]  ;;  %v1409_v10 = vsel %vm1121_vm0, %v3790_v8, 0 }
   0xf   : > { %s3770_s8 = sshll.u32 %s6326_s22, 3  ;;  %379 = vst.msk [vmem:[#allocation2 + $0x10] sm:$0xff] %vm376_vm1, %v6010_v5  ;;  %v2203_v11 = vsel %vm1121_vm0, %v3841_v9, 0  ;;  %v4036_v12 = vld [vmem:[%s6006_s2] ss:$0 sm:$0xff]  ;;  %s3772_s29 = sshll.u32 %s6326_s22, 2 }
  0x10   : > { %s4031_s11 = scalar_lea.vmem %s6004_s0, %s3770_s8  ;;  %380 = vst.msk [vmem:[#allocation2 + $0x118] sm:$0xff] %vm376_vm1, %v6010_v5  ;;  %s5256_s6 = scalar_lea.vmem %s6008_s4, %s3772_s29 }
  0x11   : > { %1672 = vmatpush.bf16.msrb.mxu2 %v1663_v4  ;;  %1418 = vmatpush.bf16.msrb.mxu1 %v1409_v10  ;;  %v245_v13 = vld [vmem:[%s4031_s11 + $0x28] sm:$0xff]  ;;  %v246_v14 = vld [vmem:[%s4031_s11 + $0x30] sm:$0xff]  ;;  %v247_v15 = vld [vmem:[%s4031_s11 + $0x38] sm:$0xff]  ;;  %381 = vst.msk [vmem:[#allocation2 + $0x120] sm:$0xff] %vm376_vm1, %v6010_v5  ;;  %p235_p4 = scmp.lt.s32.totalorder %s3989_s19, 1 }
  0x12   : > { %1958 = vmatpush.bf16.msrb.mxu3 %v1949_v7  ;;  %2212 = vmatpush.bf16.msrb.mxu0 %v2203_v11  ;;  %v281_v16 = vmul.f32 %v4001_v2, %v245_v13  ;;  %v282_v17 = vmul.f32 %v4001_v2, %v246_v14  ;;  %v283_v18 = vmul.f32 %v4001_v2, %v247_v15  ;;  %v253_v19 = vld [vmem:[%s4031_s11 + $0x68] sm:$0xff]  ;;  %v254_v20 = vld [vmem:[%s4031_s11 + $0x70] sm:$0xff]  ;;  %v255_v21 = vld [vmem:[%s4031_s11 + $0x78] sm:$0xff] }
  0x13   : > { %382 = vst.msk [vmem:[#allocation2 + $0x128] sm:$0xff] %vm376_vm1, %v6010_v5  ;;  %v289_v22 = vmul.f32 %v4001_v2, %v253_v19  ;;  %v290_v23 = vmul.f32 %v4001_v2, %v254_v20  ;;  %v291_v24 = vmul.f32 %v4001_v2, %v255_v21  ;;  %v261_v25 = vld [vmem:[%s4031_s11 + $0xa8] sm:$0xff]  ;;  %v262_v26 = vld [vmem:[%s4031_s11 + $0xb0] sm:$0xff]  ;;  %v263_v27 = vld [vmem:[%s4031_s11 + $0xb8] sm:$0xff]  ;;  %s6328_s19 = smov (!%p235_p4, %s3989_s19), 1 }
  0x14   : > { %v317_v28 = vadd.f32 %v4036_v12, %v281_v16  ;;  %v318_v29 = vadd.f32 %v4036_v12, %v282_v17  ;;  %v319_v30 = vadd.f32 %v4036_v12, %v283_v18  ;;  %v297_v31 = vmul.f32 %v4001_v2, %v261_v25  ;;  %v248_v37 = vld [vmem:[%s4031_s11 + $0x40] sm:$0xff]  ;;  %v249_v38 = vld [vmem:[%s4031_s11 + $0x48] sm:$0xff]  ;;  %v250_v6 = vld [vmem:[%s4031_s11 + $0x50] sm:$0xff]  ;;  %s3773_s7 = sshll.u32 %s6328_s19, 1 }
  0x15   : > { %v325_v32 = vadd.f32 %v4036_v12, %v289_v22  ;;  %v326_v33 = vadd.f32 %v4036_v12, %v290_v23  ;;  %v327_v34 = vadd.f32 %v4036_v12, %v291_v24  ;;  %v298_v35 = vmul.f32 %v4001_v2, %v262_v26  ;;  %v1024_v36 = vld [vmem:[#allocation2 + $0x7] sm:$0xff]  ;;  %v251_v11 = vld [vmem:[%s4031_s11 + $0x58] sm:$0xff]  ;;  %v258_v13 = vld [vmem:[%s4031_s11 + $0x90] sm:$0xff]  ;;  %s5876_s10 = scalar_lea.vmem %s6009_s5, %s3773_s7 }
  0x16   : > { %v349_v39 = vmax.f32 %v317_v28, 0.0  ;;  %v350_v40 = vmax.f32 %v318_v29, 0.0  ;;  %v351_v41 = vmax.f32 %v319_v30, 0.0  ;;  %v299_v42 = vmul.f32 %v4001_v2, %v263_v27  ;;  %v1025_v43 = vld [vmem:[#allocation2 + $0xf] sm:$0xff]  ;;  %v256_v44 = vld [vmem:[%s4031_s11 + $0x80] sm:$0xff]  ;;  %v259_v16 = vld [vmem:[%s4031_s11 + $0x98] sm:$0xff] }
  0x17   : > { %v257_v45 = vld [vmem:[%s4031_s11 + $0x88] sm:$0xff]  ;;  %v357_v46 = vmax.f32 %v325_v32, 0.0  ;;  %v358_v47 = vmax.f32 %v326_v33, 0.0  ;;  %v333_v48 = vadd.f32 %v4036_v12, %v297_v31  ;;  %v264_v49 = vld [vmem:[%s4031_s11 + $0xc0] sm:$0xff]  ;;  %v334_v50 = vadd.f32 %v4036_v12, %v298_v35  ;;  %v266_v20 = vld [vmem:[%s4031_s11 + $0xd0] sm:$0xff] }
  0x18   : > { %388 = vst.msk [vmem:[#allocation2 + $0x40] sm:$0xff] %vm376_vm1, %v349_v39  ;;  %v335_v51 = vadd.f32 %v4036_v12, %v299_v42  ;;  %v1056_v52 = vpack.c.bf16 %v1025_v43, %v1024_v36  ;;  %v284_v53 = vmul.f32 %v4001_v2, %v248_v37  ;;  %v265_v54 = vld [vmem:[%s4031_s11 + $0xc8] sm:$0xff]  ;;  %v359_v55 = vmax.f32 %v327_v34, 0.0  ;;  %v240_v59 = vld [vmem:[%s4031_s11] sm:$0xff]  ;;  %v267_v25 = vld [vmem:[%s4031_s11 + $0xd8] sm:$0xff] }
  0x19   : > { %389 = vst.msk [vmem:[#allocation2 + $0x48] sm:$0xff] %vm376_vm1, %v350_v40  ;;  %v285_v56 = vmul.f32 %v4001_v2, %v249_v38  ;;  %v292_v57 = vmul.f32 %v4001_v2, %v256_v44  ;;  %v293_v58 = vmul.f32 %v4001_v2, %v257_v45  ;;  %v241_v60 = vld [vmem:[%s4031_s11 + $0x8] sm:$0xff]  ;;  %v365_v61 = vmax.f32 %v333_v48, 0.0  ;;  %v242_v30 = vld [vmem:[%s4031_s11 + $0x10] sm:$0xff]  ;;  %v243_v35 = vld [vmem:[%s4031_s11 + $0x18] sm:$0xff] }
  0x1a   : > { %390 = vst.msk [vmem:[#allocation2 + $0x50] sm:$0xff] %vm376_vm1, %v351_v41  ;;  %3774 = vmatmul.msk.bf16.vlgmr.msra.gmra.mxu0 %vm376_vm1, %v1056_v52  ;;  %v320_v62 = vadd.f32 %v4036_v12, %v284_v53  ;;  %v300_v63 = vmul.f32 %v4001_v2, %v264_v49  ;;  %v366_v0 = vmax.f32 %v334_v50, 0.0  ;;  %v301_v4 = vmul.f32 %v4001_v2, %v265_v54 }
  0x1b   : > { %396 = vst.msk [vmem:[#allocation2 + $0x80] sm:$0xff] %vm376_vm1, %v357_v46  ;;  %v321_v1 = vadd.f32 %v4036_v12, %v285_v56  ;;  %v328_v3 = vadd.f32 %v4036_v12, %v292_v57  ;;  %v367_v7 = vmax.f32 %v335_v51, 0.0  ;;  %v329_v8 = vadd.f32 %v4036_v12, %v293_v58 }
  0x1c   : > { %397 = vst.msk [vmem:[#allocation2 + $0x88] sm:$0xff] %vm376_vm1, %v358_v47  ;;  %v276_v9 = vmul.f32 %v4001_v2, %v240_v59  ;;  %v277_v10 = vmul.f32 %v4001_v2, %v241_v60  ;;  %v352_v14 = vmax.f32 %v320_v62, 0.0  ;;  %v336_v15 = vadd.f32 %v4036_v12, %v300_v63  ;;  %v260_v62 = vld [vmem:[%s4031_s11 + $0xa0] sm:$0xff] }
  0x1d   : > { %398 = vst.msk [vmem:[#allocation2 + $0x90] sm:$0xff] %vm376_vm1, %v359_v55  ;;  %v353_v17 = vmax.f32 %v321_v1, 0.0  ;;  %v337_v18 = vadd.f32 %v4036_v12, %v301_v4  ;;  %v286_v19 = vmul.f32 %v4001_v2, %v250_v6  ;;  %v360_v21 = vmax.f32 %v328_v3, 0.0  ;;  %v268_v3 = vld [vmem:[%s4031_s11 + $0xe0] sm:$0xff]  ;;  %v269_v4 = vld [vmem:[%s4031_s11 + $0xe8] sm:$0xff] }
  0x1e   : > { %404 = vst.msk [vmem:[#allocation2 + $0xc0] sm:$0xff] %vm376_vm1, %v365_v61  ;;  %v312_v22 = vadd.f32 %v4036_v12, %v276_v9  ;;  %v287_v23 = vmul.f32 %v4001_v2, %v251_v11  ;;  %v294_v24 = vmul.f32 %v4001_v2, %v258_v13  ;;  %v361_v27 = vmax.f32 %v329_v8, 0.0  ;;  %v252_v61 = vld [vmem:[%s4031_s11 + $0x60] sm:$0xff] }
  0x1f   : > { %405 = vst.msk [vmem:[#allocation2 + $0xc8] sm:$0xff] %vm376_vm1, %v366_v0  ;;  %v313_v28 = vadd.f32 %v4036_v12, %v277_v10  ;;  %v295_v29 = vmul.f32 %v4001_v2, %v259_v16  ;;  %v368_v32 = vmax.f32 %v336_v15, 0.0  ;;  %v322_v33 = vadd.f32 %v4036_v12, %v286_v19  ;;  %v244_v9 = vld [vmem:[%s4031_s11 + $0x20] sm:$0xff] }
  0x20   : > { %v1032_v26 = vld [vmem:[#allocation2 + $0x47] sm:$0xff]  ;;  %406 = vst.msk [vmem:[#allocation2 + $0xd0] sm:$0xff] %vm376_vm1, %v367_v7  ;;  %v302_v34 = vmul.f32 %v4001_v2, %v266_v20  ;;  %v369_v37 = vmax.f32 %v337_v18, 0.0  ;;  %v323_v38 = vadd.f32 %v4036_v12, %v287_v23  ;;  %v303_v39 = vmul.f32 %v4001_v2, %v267_v25 }
  0x21   : > { %v1033_v31 = vld [vmem:[#allocation2 + $0x4f] sm:$0xff]  ;;  %391 = vst.msk [vmem:[#allocation2 + $0x58] sm:$0xff] %vm376_vm1, %v352_v14  ;;  %v344_v41 = vmax.f32 %v312_v22, 0.0  ;;  %v330_v42 = vadd.f32 %v4036_v12, %v294_v24  ;;  %v278_v43 = vmul.f32 %v4001_v2, %v242_v30  ;;  %v345_v45 = vmax.f32 %v313_v28, 0.0 }
  0x22   : > { %v4120_v36 = vpack.c.bf16 %v1033_v31, %v1032_v26  ;;  %392 = vst.msk [vmem:[#allocation2 + $0x60] sm:$0xff] %vm376_vm1, %v353_v17  ;;  %v331_v46 = vadd.f32 %v4036_v12, %v295_v29  ;;  %v279_v47 = vmul.f32 %v4001_v2, %v243_v35  ;;  %v354_v49 = vmax.f32 %v322_v33, 0.0 }
  0x23   : > { %v1040_v40 = vld [vmem:[#allocation2 + $0x87] sm:$0xff]  ;;  %399 = vst.msk [vmem:[#allocation2 + $0x98] sm:$0xff] %vm376_vm1, %v360_v21  ;;  %v338_v50 = vadd.f32 %v4036_v12, %v302_v34  ;;  %v355_v52 = vmax.f32 %v323_v38, 0.0  ;;  %v339_v53 = vadd.f32 %v4036_v12, %v303_v39  ;;  %v362_v55 = vmax.f32 %v330_v42, 0.0 }
  0x24   : > { %3778 = vmatmul.msk.bf16.vlgmr.msra.gmra.mxu1 %vm376_vm1, %v4120_v36  ;;  %v1041_v44 = vld [vmem:[#allocation2 + $0x8f] sm:$0xff]  ;;  %400 = vst.msk [vmem:[#allocation2 + $0xa0] sm:$0xff] %vm376_vm1, %v361_v27  ;;  %v314_v56 = vadd.f32 %v4036_v12, %v278_v43  ;;  %v363_v58 = vmax.f32 %v331_v46, 0.0  ;;  %v315_v59 = vadd.f32 %v4036_v12, %v279_v47  ;;  %v288_v0 = vmul.f32 %v4001_v2, %v252_v61  ;;  %v3875_v47 = vld [vmem:[%s6007_s3 + $0xc] sm:$0x3] }
  0x25   : > { %v1064_v48 = vpack.c.bf16 %v1041_v44, %v1040_v40  ;;  %407 = vst.msk [vmem:[#allocation2 + $0xd8] sm:$0xff] %vm376_vm1, %v368_v32  ;;  %v370_v60 = vmax.f32 %v338_v50, 0.0  ;;  %v371_v63 = vmax.f32 %v339_v53, 0.0  ;;  %v296_v1 = vmul.f32 %v4001_v2, %v260_v62 }
  0x26   : > { %v1048_v51 = vld [vmem:[#allocation2 + $0xc7] sm:$0xff]  ;;  %408 = vst.msk [vmem:[#allocation2 + $0xe0] sm:$0xff] %vm376_vm1, %v369_v37  ;;  %v346_v6 = vmax.f32 %v314_v56, 0.0  ;;  %v304_v7 = vmul.f32 %v4001_v2, %v268_v3  ;;  %v305_v8 = vmul.f32 %v4001_v2, %v269_v4  ;;  %v347_v10 = vmax.f32 %v315_v59, 0.0 }
  0x27   : > { %3782 = vmatmul.msk.bf16.vlgmr.msra.gmra.mxu2 %vm376_vm1, %v1064_v48  ;;  %v1049_v54 = vld [vmem:[#allocation2 + $0xcf] sm:$0xff]  ;;  %383 = vst.msk [vmem:[#allocation2 + $0x18] sm:$0xff] %vm376_vm1, %v344_v41  ;;  %v324_v11 = vadd.f32 %v4036_v12, %v288_v0  ;;  %v332_v13 = vadd.f32 %v4036_v12, %v296_v1  ;;  %v280_v14 = vmul.f32 %v4001_v2, %v244_v9 }
  0x28   : > { %v1068_v57 = vpack.c.bf16 %v1049_v54, %v1048_v51  ;;  %384 = vst.msk [vmem:[#allocation2 + $0x20] sm:$0xff] %vm376_vm1, %v345_v45  ;;  %v1034_v15 = vld [vmem:[#allocation2 + $0x57] sm:$0xff]  ;;  %v340_v17 = vadd.f32 %v4036_v12, %v304_v7  ;;  %v341_v18 = vadd.f32 %v4036_v12, %v305_v8  ;;  %v3892_v48 = vld [vmem:[%s6007_s3 + $0xe] sm:$0x3]  ;;  %v2679_v51 = vsel %vm1121_vm0, %v3875_v47, 0 }
  0x29   : > { %393 = vst.msk [vmem:[#allocation2 + $0x68] sm:$0xff] %vm376_vm1, %v354_v49  ;;  %v1035_v16 = vld [vmem:[#allocation2 + $0x5f] sm:$0xff]  ;;  %v356_v20 = vmax.f32 %v324_v11, 0.0  ;;  %v364_v21 = vmax.f32 %v332_v13, 0.0  ;;  %v316_v22 = vadd.f32 %v4036_v12, %v280_v14  ;;  %v3858_v49 = vld [vmem:[%s6007_s3 + $0xa] sm:$0x3]  ;;  %2688 = vmatpush.bf16.msra.mxu2 %v2679_v51 }
  0x2a   : > { %3786 = vmatmul.msk.bf16.vlgmr.msra.gmra.mxu3 %vm376_vm1, %v1068_v57  ;;  %394 = vst.msk [vmem:[#allocation2 + $0x70] sm:$0xff] %vm376_vm1, %v355_v52  ;;  %v372_v24 = vmax.f32 %v340_v17, 0.0  ;;  %v4165_v2 = vpack.c.bf16 %v1035_v16, %v1034_v15  ;;  %v1042_v25 = vld [vmem:[#allocation2 + $0x97] sm:$0xff]  ;;  %v373_v28 = vmax.f32 %v341_v18, 0.0  ;;  %v2965_v52 = vsel %vm1121_vm0, %v3892_v48, 0 }
  0x2b   : > { %401 = vst.msk [vmem:[#allocation2 + $0xa8] sm:$0xff] %vm376_vm1, %v362_v55  ;;  %v1043_v26 = vld [vmem:[#allocation2 + $0x9f] sm:$0xff]  ;;  %v348_v29 = vmax.f32 %v316_v22, 0.0  ;;  %v2425_v53 = vsel %vm1121_vm0, %v3858_v49, 0  ;;  %v3909_v54 = vld [vmem:[%s6007_s3 + $0x10] sm:$0x3]  ;;  %2974 = vmatpush.bf16.msra.mxu3 %v2965_v52 }
  0x2c   : > { %402 = vst.msk [vmem:[#allocation2 + $0xb0] sm:$0xff] %vm376_vm1, %v363_v58  ;;  %v1065_v12 = vpack.c.bf16 %v1043_v26, %v1042_v25  ;;  %v1050_v30 = vld [vmem:[#allocation2 + $0xd7] sm:$0xff]  ;;  %v3219_v55 = vsel %vm1121_vm0, %v3909_v54, 0  ;;  %2434 = vmatpush.bf16.msra.mxu1 %v2425_v53  ;;  %v2110_v26 = vld [vmem:[#allocation2 + $0x48] sm:$0xff] }
  0x2d   : > { %409 = vst.msk [vmem:[#allocation2 + $0xe8] sm:$0xff] %vm376_vm1, %v370_v60  ;;  %v1051_v31 = vld [vmem:[#allocation2 + $0xdf] sm:$0xff]  ;;  %3228 = vmatpush.bf16.msra.mxu0 %v3219_v55  ;;  %v1311_v7 = vld [vmem:[#allocation2 + $0x10] sm:$0xff] }
  0x2e   : > { %v1026_v19 = vld [vmem:[#allocation2 + $0x17] sm:$0xff]  ;;  %410 = vst.msk [vmem:[#allocation2 + $0xf0] sm:$0xff] %vm376_vm1, %v371_v63  ;;  %v1069_v32 = vpack.c.bf16 %v1051_v31, %v1050_v30 }
  0x2f   : > { %v1027_v23 = vld [vmem:[#allocation2 + $0x1f] sm:$0xff]  ;;  %385 = vst.msk [vmem:[#allocation2 + $0x28] sm:$0xff] %vm376_vm1, %v346_v6  ;;  %v1310_v6 = vld [vmem:[#allocation2 + $0x8] sm:$0xff]  ;;  %v1565_v11 = vld [vmem:[#allocation2 + $0x11] sm:$0xff] }
  0x30   : > { %v4167_v27 = vpack.c.bf16 %v1027_v23, %v1026_v19  ;;  %386 = vst.msk [vmem:[#allocation2 + $0x30] sm:$0xff] %vm376_vm1, %v347_v10  ;;  %v1036_v35 = vld [vmem:[#allocation2 + $0x67] sm:$0xff]  ;;  %v2104_v3 = vld [vmem:[#allocation2 + $0x18] sm:$0xff]  ;;  %v1342_v9 = vpack.c.bf16 %v1311_v7, %v1310_v6 }
  0x31   : > { %395 = vst.msk [vmem:[#allocation2 + $0x78] sm:$0xff] %vm376_vm1, %v356_v20  ;;  %v1037_v37 = vld [vmem:[#allocation2 + $0x6f] sm:$0xff]  ;;  %v2105_v4 = vld [vmem:[#allocation2 + $0x20] sm:$0xff]  ;;  %v2112_v31 = vld [vmem:[#allocation2 + $0x58] sm:$0xff] }
  0x32   : > { %3775 = vmatmul.msk.bf16.gmra.mxu0 %vm376_vm1, %v4167_v27  ;;  %403 = vst.msk [vmem:[#allocation2 + $0xb8] sm:$0xff] %vm376_vm1, %v364_v21  ;;  %v4181_v39 = vpack.c.bf16 %v1037_v37, %v1036_v35  ;;  %v1044_v40 = vld [vmem:[#allocation2 + $0xa7] sm:$0xff]  ;;  %v2136_v8 = vpack.c.bf16 %v2105_v4, %v2104_v3  ;;  %v1566_v17 = vld [vmem:[#allocation2 + $0x19] sm:$0xff]  ;;  %v1573_v35 = vld [vmem:[#allocation2 + $0x51] sm:$0xff] }
  0x33   : > { %411 = vst.msk [vmem:[#allocation2 + $0xf8] sm:$0xff] %vm376_vm1, %v372_v24  ;;  %v1045_v41 = vld [vmem:[#allocation2 + $0xaf] sm:$0xff]  ;;  %v2109_v21 = vld [vmem:[#allocation2 + $0x40] sm:$0xff] }
  0x34   : > { %3779 = vmatmul.msk.bf16.gmra.mxu1 %vm376_vm1, %v4165_v2  ;;  %412 = vst.msk [vmem:[#allocation2 + $0x100] sm:$0xff] %vm376_vm1, %v373_v28  ;;  %v1066_v42 = vpack.c.bf16 %v1045_v41, %v1044_v40  ;;  %v1052_v43 = vld [vmem:[#allocation2 + $0xe7] sm:$0xff]  ;;  %v1574_v47 = vld [vmem:[#allocation2 + $0x59] sm:$0xff] }
  0x35   : > { %387 = vst.msk [vmem:[#allocation2 + $0x38] sm:$0xff] %vm376_vm1, %v348_v29  ;;  %v1053_v44 = vld [vmem:[#allocation2 + $0xef] sm:$0xff]  ;;  %v1575_v48 = vld [vmem:[#allocation2 + $0x61] sm:$0xff] }
  0x36   : > { %v1028_v33 = vld [vmem:[#allocation2 + $0x27] sm:$0xff]  ;;  %v1070_v45 = vpack.c.bf16 %v1053_v44, %v1052_v43  ;;  %v2115_v44 = vld [vmem:[#allocation2 + $0x70] sm:$0xff] }
  0x37   : > { %3783 = vmatmul.msk.bf16.gmra.mxu2 %vm376_vm1, %v1065_v12  ;;  %v1029_v34 = vld [vmem:[#allocation2 + $0x2f] sm:$0xff]  ;;  %v1567_v18 = vld [vmem:[#allocation2 + $0x21] sm:$0xff] }
  0x38   : > { %v1058_v38 = vpack.c.bf16 %v1029_v34, %v1028_v33  ;;  %v1038_v56 = vld [vmem:[#allocation2 + $0x77] sm:$0xff]  ;;  %v1039_v57 = vld [vmem:[#allocation2 + $0x7f] sm:$0xff]  ;;  %v1564_v10 = vld [vmem:[#allocation2 + $0x9] sm:$0xff]  ;;  %v1597_v19 = vpack.c.bf16 %v1567_v18, %v1566_v17 }
  0x39   : > { %v4204_v59 = vpack.c.bf16 %v1039_v57, %v1038_v56  ;;  %v1046_v60 = vld [vmem:[#allocation2 + $0xb7] sm:$0xff]  ;;  %v1047_v61 = vld [vmem:[#allocation2 + $0xbf] sm:$0xff]  ;;  %v1596_v13 = vpack.c.bf16 %v1565_v11, %v1564_v10  ;;  %v2106_v14 = vld [vmem:[#allocation2 + $0x28] sm:$0xff]  ;;  %v415_v11 = vlaneseq }
  0x3a   : > { %3787 = vmatmul.msk.bf16.gmra.mxu3 %vm376_vm1, %v1069_v32  ;;  %v1067_v62 = vpack.c.bf16 %v1047_v61, %v1046_v60  ;;  %v1054_v63 = vld [vmem:[#allocation2 + $0xf7] sm:$0xff]  ;;  %v1568_v23 = vld [vmem:[#allocation2 + $0x29] sm:$0xff]  ;;  %v1571_v12 = vld [vmem:[#allocation2 + $0x41] sm:$0xff] }
  0x3b   : > { %v1055_v0 = vld [vmem:[#allocation2 + $0xff] sm:$0xff]  ;;  %v2107_v15 = vld [vmem:[#allocation2 + $0x30] sm:$0xff]  ;;  %v2114_v43 = vld [vmem:[#allocation2 + $0x68] sm:$0xff] }
  0x3c   : > { %v1030_v46 = vld [vmem:[#allocation2 + $0x37] sm:$0xff]  ;;  %v1031_v50 = vld [vmem:[#allocation2 + $0x3f] sm:$0xff]  ;;  %v1071_v1 = vpack.c.bf16 %v1055_v0, %v1054_v63  ;;  %v2137_v16 = vpack.c.bf16 %v2107_v15, %v2106_v14  ;;  %v1572_v34 = vld [vmem:[#allocation2 + $0x49] sm:$0xff]  ;;  %v4297_v14 = vshrl.u32 %v415_v11, 7 }
  0x3d   : > { %v1059_v58 = vpack.c.bf16 %v1031_v50, %v1030_v46  ;;  %v2108_v20 = vld [vmem:[#allocation2 + $0x38] sm:$0xff]  ;;  %v2113_v32 = vld [vmem:[#allocation2 + $0x60] sm:$0xff]  ;;  %v1600_v40 = vpack.c.bf16 %v1573_v35, %v1572_v34  ;;  %v2141_v46 = vpack.c.bf16 %v2115_v44, %v2114_v43  ;;  %v1601_v50 = vpack.c.bf16 %v1575_v48, %v1574_v47 }
  0x3e   : > { %v2138_v22 = vpack.c.bf16 %v2109_v21, %v2108_v20  ;;  %v1569_v24 = vld [vmem:[#allocation2 + $0x31] sm:$0xff]  ;;  %v1570_v29 = vld [vmem:[#allocation2 + $0x39] sm:$0xff]  ;;  %v2140_v33 = vpack.c.bf16 %v2113_v32, %v2112_v31  ;;  %v448_v18 = vcvt.s32.f32 %v4297_v14  ;;  %v420_v32 = vadd.s32 32, %v4297_v14 }
  0x3f   : > { %v1598_v25 = vpack.c.bf16 %v1569_v24, %v1568_v23  ;;  %v1599_v30 = vpack.c.bf16 %v1571_v12, %v1570_v29  ;;  %v1577_v60 = vld [vmem:[#allocation2 + $0x71] sm:$0xff]  ;;  %v2117_v0 = vld [vmem:[#allocation2 + $0x80] sm:$0xff]  ;;  %v418_v24 = vadd.s32 16, %v4297_v14 }
  0x40   : > { %v2116_v63 = vld [vmem:[#allocation2 + $0x78] sm:$0xff]  ;;  %v480_v21 = vadd.f32 0.5, %v448_v18  ;;  %v2119_v31 = vld [vmem:[#allocation2 + $0x90] sm:$0xff] }
  0x41   : > { %v2142_v3 = vpack.c.bf16 %v2117_v0, %v2116_v63  ;;  %v1578_v15 = vld [vmem:[#allocation2 + $0x79] sm:$0xff]  ;;  %v450_v29 = vcvt.s32.f32 %v418_v24 }
  0x42   : > { %3776 = vmatmul.msk.bf16.gmra.mxu0 %vm376_vm1, %v1058_v38  ;;  %v640_v34 = vmul.f32 0.00390625, %v480_v21 }
  0x43   : > { %v482_v43 = vadd.f32 0.5, %v450_v29 }
  0x44   : > { %3780 = vmatmul.msk.bf16.gmra.mxu1 %vm376_vm1, %v4181_v39 }
  0x47   : > { %3784 = vmatmul.msk.bf16.gmra.mxu2 %vm376_vm1, %v1066_v42 }
  0x4a   : > { %3788 = vmatmul.msk.bf16.gmra.mxu3 %vm376_vm1, %v1070_v45 }
  0x52   : > { %3777 = vmatmul.msk.bf16.gmra.mxu0 %vm376_vm1, %v1059_v58 }
  0x54   : > { %3781 = vmatmul.msk.bf16.gmra.mxu1 %vm376_vm1, %v4204_v59 }
  0x57   : > { %3785 = vmatmul.msk.bf16.gmra.mxu2 %vm376_vm1, %v1067_v62 }
  0x5a   : > { %3789 = vmatmul.msk.bf16.gmra.mxu3 %vm376_vm1, %v1071_v1 }
  0x62   : > { %3842 = vmatmul.msk.bf16.vlgmr.msrb.gmra.mxu0 %vm376_vm1, %v2136_v8 }
  0x64   : > { %3791 = vmatmul.msk.bf16.vlgmr.msrb.gmra.mxu1 %vm376_vm1, %v1342_v9 }
  0x67   : > { %3808 = vmatmul.msk.bf16.vlgmr.msrb.gmra.mxu2 %vm376_vm1, %v1596_v13 }
  0x6a   : > { %3825 = vmatmul.msk.bf16.vlgmr.msrb.gmra.mxu3 %vm376_vm1, %v4167_v27  ;;  %v2111_v27 = vld [vmem:[#allocation2 + $0x50] sm:$0xff] }
  0x6b   : > { %v2139_v28 = vpack.c.bf16 %v2111_v27, %v2110_v26  ;;  %v1865_v26 = vld [vmem:[#allocation2 + $0x8f] sm:$0xff]  ;;  %v512_v27 = vmul.f32 0.0625, %v480_v21 }
  0x72   : > { %3843 = vmatmul.msk.bf16.gmra.mxu0 %vm376_vm1, %v2137_v16 }
  0x74   : > { %3792 = vmatmul.msk.bf16.gmra.mxu1 %vm376_vm1, %v2136_v8 }
  0x77   : > { %3809 = vmatmul.msk.bf16.gmra.mxu2 %vm376_vm1, %v1597_v19 }
  0x7a   : > { %3826 = vmatmul.msk.bf16.gmra.mxu3 %vm376_vm1, %v1058_v38 }
  0x82   : > { %3844 = vmatmul.msk.bf16.gmra.mxu0 %vm376_vm1, %v2138_v22 }
  0x84   : > { %3793 = vmatmul.msk.bf16.gmra.mxu1 %vm376_vm1, %v2137_v16  ;;  %v1579_v16 = vld [vmem:[#allocation2 + $0x81] sm:$0xff] }
  0x85   : > { %v1603_v19 = vpack.c.bf16 %v1579_v16, %v1578_v15  ;;  %v642_v15 = vmul.f32 0.00390625, %v482_v43 }
  0x87   : > { %3810 = vmatmul.msk.bf16.gmra.mxu2 %vm376_vm1, %v1598_v25  ;;  %v1864_v25 = vld [vmem:[#allocation2 + $0x87] sm:$0xff] }
  0x88   : > { %v1889_v12 = vpack.c.bf16 %v1865_v26, %v1864_v25  ;;  %v422_v25 = vadd.s32 48, %v4297_v14 }
  0x8a   : > { %3827 = vmatmul.msk.bf16.gmra.mxu3 %vm376_vm1, %v1059_v58  ;;  %v1576_v58 = vld [vmem:[#allocation2 + $0x69] sm:$0xff] }
  0x8b   : > { %v1602_v62 = vpack.c.bf16 %v1577_v60, %v1576_v58  ;;  %v514_v60 = vmul.f32 0.0625, %v482_v43 }
  0x8d   : > { %v546_v11 = vfloor.f32 %v514_v60 }
  0x92   : > { %3845 = vmatmul.msk.bf16.gmra.mxu0 %vm376_vm1, %v2139_v28 }
  0x94   : > { %3794 = vmatmul.msk.bf16.gmra.mxu1 %vm376_vm1, %v2138_v22 }
  0x97   : > { %3811 = vmatmul.msk.bf16.gmra.mxu2 %vm376_vm1, %v1599_v30  ;;  %v4231_v38 = vpop.f32.mrf.mxu0  ;;  %v2118_v30 = vld [vmem:[#allocation2 + $0x88] sm:$0xff] }
  0x9a   : > { %3828 = vmatmul.msk.bf16.gmra.mxu3 %vm376_vm1, %v4120_v36 }
  0x9f   : > { %v4242_v42 = vpop.f32.mrf.mxu0 }
  0xa0   : > { %6095 = vst [vmem:[#allocation4_spill] sm:$0xff] %v4242_v42 }
  0xa1   : > { %v4229_v37 = vpop.f32.mrf.mxu1 }
  0xa2   : > { %3846 = vmatmul.msk.bf16.gmra.mxu0 %vm376_vm1, %v2140_v33 }
  0xa4   : > { %3795 = vmatmul.msk.bf16.gmra.mxu1 %vm376_vm1, %v2139_v28 }
  0xa7   : > { %3812 = vmatmul.msk.bf16.gmra.mxu2 %vm376_vm1, %v1600_v40  ;;  %v2143_v40 = vpack.c.bf16 %v2119_v31, %v2118_v30 }
  0xa9   : > { %v4240_v41 = vpop.f32.mrf.mxu1 }
  0xaa   : > { %3829 = vmatmul.msk.bf16.gmra.mxu3 %vm376_vm1, %v4165_v2  ;;  %v4238_v36 = vpop.f32.mrf.mxu2  ;;  %6094 = vst [vmem:[#allocation3_spill] sm:$0xff] %v4240_v41 }
  0xad   : > { %v4244_v45 = vpop.f32.mrf.mxu3 }
  0xaf   : > { %v4254_v52 = vpop.f32.mrf.mxu0 }
  0xb1   : > { %v4249_v51 = vpop.f32.mrf.mxu1 }
  0xb2   : > { %v4246_v49 = vpop.f32.mrf.mxu2  ;;  %3847 = vmatmul.msk.bf16.gmra.mxu0 %vm376_vm1, %v2141_v46 }
  0xb4   : > { %3796 = vmatmul.msk.bf16.gmra.mxu1 %vm376_vm1, %v2140_v33  ;;  %v544_v33 = vfloor.f32 %v512_v27  ;;  %v578_v27 = vmul.f32 16.0, %v546_v11 }
  0xb5   : > { %v4252_v2 = vpop.f32.mrf.mxu3 }
  0xb6   : > { %v576_v48 = vmul.f32 16.0, %v544_v33 }
  0xb7   : > { %3813 = vmatmul.msk.bf16.gmra.mxu2 %vm376_vm1, %v1601_v50  ;;  %v4265_v56 = vpop.f32.mrf.mxu0  ;;  %v672_v50 = vfloor.f32 %v640_v34  ;;  %v4342_v34 = vcvt.s32.f32 %v422_v25  ;;  %v1866_v25 = vld [vmem:[#allocation2 + $0x97] sm:$0xff] }
  0xb8   : > { %6097 = vst [vmem:[#allocation6_spill] sm:$0xff] %v4265_v56  ;;  %v608_v63 = vsub.f32 %v448_v18, %v576_v48  ;;  %v6108_v56 = vmov 0.0  }
  0xb9   : > { %v4263_v55 = vpop.f32.mrf.mxu1  ;;  %v704_v0 = vmul.f32 256.0, %v672_v50 }
  0xba   : > { %3830 = vmatmul.msk.bf16.gmra.mxu3 %vm376_vm1, %v4181_v39  ;;  %v4259_v53 = vpop.f32.mrf.mxu2  ;;  %6096 = vst [vmem:[#allocation5_spill] sm:$0xff] %v4263_v55  ;;  %vm768_vm2 = vcmp.gt.f32.partialorder %v608_v63, 0.5  ;;  %v1867_v55 = vld [vmem:[#allocation2 + $0x9f] sm:$0xff]  ;;  %vm832_vm6 = vcmp.lt.f32.partialorder %v608_v63, 14.5 }
  0xbb   : > { %v4331_v24 = vsub.f32 %v448_v18, %v704_v0  ;;  %v4337_v30 = vsel %vm768_vm2, 1.0, %v6010_v5 }
  0xbc   : > { %6105 = vst [vmem:[#allocation14_spill] sm:$0xff] %v4337_v30  ;;  %v1214_v18 = vmul.f32 %v4231_v38, %v4337_v30 }
  0xbd   : > { %v4261_v54 = vpop.f32.mrf.mxu3  ;;  %6103 = vst [vmem:[#allocation12_spill] sm:$0xff] %v4331_v24  ;;  %vm896_vm3 = vcmp.gt.f32.partialorder %v4331_v24, 15.5 }
  0xbe   : > { %v928_v50 = vsel %vm896_vm3, 1.0, %v6010_v5 }
  0xbf   : > { %v4275_v1 = vpop.f32.mrf.mxu0 }
  0xc1   : > { %v4272_v39 = vpop.f32.mrf.mxu1 }
  0xc2   : > { %v4267_v57 = vpop.f32.mrf.mxu2  ;;  %3848 = vmatmul.msk.bf16.gmra.mxu0 %vm376_vm1, %v2142_v3 }
  0xc4   : > { %3797 = vmatmul.msk.bf16.gmra.mxu1 %vm376_vm1, %v2141_v46  ;;  %v4316_v46 = vcvt.s32.f32 %v420_v32 }
  0xc5   : > { %v4270_v61 = vpop.f32.mrf.mxu3 }
  0xc7   : > { %3814 = vmatmul.msk.bf16.gmra.mxu2 %vm376_vm1, %v1602_v62  ;;  %v4286_v8 = vpop.f32.mrf.mxu0  ;;  %v484_v62 = vadd.f32 0.5, %v4316_v46 }
  0xc8   : > { %6099 = vst [vmem:[#allocation8_spill] sm:$0xff] %v4286_v8  ;;  %v1890_v8 = vpack.c.bf16 %v1867_v55, %v1866_v25  ;;  %v4371_v55 = vsel %vm832_vm6, 1.0, %v6108_v56 }
  0xc9   : > { %v4284_v7 = vpop.f32.mrf.mxu1  ;;  %v644_v32 = vmul.f32 0.00390625, %v484_v62  ;;  %6111 = vst [vmem:[#allocation19_spill] sm:$0xff] %v4371_v55 }
  0xca   : > { %3831 = vmatmul.msk.bf16.gmra.mxu3 %vm376_vm1, %v4204_v59  ;;  %v4280_v4 = vpop.f32.mrf.mxu2  ;;  %6098 = vst [vmem:[#allocation7_spill] sm:$0xff] %v4284_v7  ;;  %v1581_v7 = vld [vmem:[#allocation2 + $0x91] sm:$0xff] }
  0xcb   : > { %v676_v0 = vfloor.f32 %v644_v32  ;;  %v2121_v32 = vld [vmem:[#allocation2 + $0xa0] sm:$0xff] }
  0xcd   : > { %v4282_v6 = vpop.f32.mrf.mxu3 }
  0xcf   : > { %v4295_v59 = vpop.f32.mrf.mxu0 }
  0xd1   : > { %v4293_v13 = vpop.f32.mrf.mxu1 }
  0xd2   : > { %v4289_v9 = vpop.f32.mrf.mxu2  ;;  %3849 = vmatmul.msk.bf16.gmra.mxu0 %vm376_vm1, %v2143_v40 }
  0xd4   : > { %3798 = vmatmul.msk.bf16.gmra.mxu1 %vm376_vm1, %v2142_v3 }
  0xd5   : > { %v4291_v10 = vpop.f32.mrf.mxu3 }
  0xd7   : > { %3815 = vmatmul.msk.bf16.gmra.mxu2 %vm376_vm1, %v1603_v19  ;;  %v4307_v23 = vpop.f32.mrf.mxu0  ;;  %v516_v19 = vmul.f32 0.0625, %v484_v62 }
  0xd8   : > { %6100 = vst [vmem:[#allocation9_spill] sm:$0xff] %v4307_v23  ;;  %v1246_v23 = vmul.f32 %v1214_v18, %v928_v50 }
  0xd9   : > { %v4305_v22 = vpop.f32.mrf.mxu1  ;;  %v548_v31 = vfloor.f32 %v516_v19  ;;  %v486_v19 = vadd.f32 0.5, %v4342_v34 }
  0xda   : > { %v4299_v17 = vpop.f32.mrf.mxu2  ;;  %3832 = vmatmul.msk.bf16.gmra.mxu3 %vm376_vm1, %v1889_v12  ;;  %v674_v12 = vfloor.f32 %v642_v15  ;;  %v1580_v15 = vld [vmem:[#allocation2 + $0x89] sm:$0xff] }
  0xdb   : > { %v580_v60 = vmul.f32 16.0, %v548_v31  ;;  %v2120_v31 = vld [vmem:[#allocation2 + $0x98] sm:$0xff]  ;;  %v518_v24 = vmul.f32 0.0625, %v486_v19 }
  0xdc   : > { %v706_v43 = vmul.f32 256.0, %v674_v12  ;;  %v708_v12 = vmul.f32 256.0, %v676_v0  ;;  %v646_v0 = vmul.f32 0.00390625, %v486_v19 }
  0xdd   : > { %v4302_v20 = vpop.f32.mrf.mxu3  ;;  %v550_v63 = vfloor.f32 %v518_v24 }
  0xde   : > { %v4352_v38 = vsub.f32 %v450_v29, %v706_v43  ;;  %v4367_v43 = vsub.f32 %v4316_v46, %v708_v12 }
  0xdf   : > { %v4319_v47 = vpop.f32.mrf.mxu0  ;;  %v582_v19 = vmul.f32 16.0, %v550_v63 }
  0xe0   : > { %6107 = vst [vmem:[#allocation16_spill] sm:$0xff] %v4352_v38  ;;  %vm898_vm5 = vcmp.gt.f32.partialorder %v4352_v38, 15.5  ;;  %vm900_vm8 = vcmp.gt.f32.partialorder %v4367_v43, 15.5  ;;  %v1868_v38 = vld [vmem:[#allocation2 + $0xa7] sm:$0xff] }
  0xe1   : > { %v1420_v44 = vpop.f32.mrf.mxu1  ;;  %6110 = vst [vmem:[#allocation18_spill] sm:$0xff] %v4367_v43 }
  0xe2   : > { %v4310_v28 = vpop.f32.mrf.mxu2  ;;  %v1500_v62 = vmul.f32 %v1420_v44, %v928_v50  ;;  %v1604_v44 = vpack.c.bf16 %v1581_v7, %v1580_v15 }
  0xe4   : > { %3799 = vmatmul.msk.bf16.gmra.mxu1 %vm376_vm1, %v2143_v40  ;;  %v4346_v40 = vsub.f32 %v450_v29, %v578_v27  ;;  %v4356_v27 = vsub.f32 %v4316_v46, %v580_v60  ;;  %v1532_v5 = vadd.f32 %v1500_v62, %v1246_v23  ;;  %v2144_v29 = vpack.c.bf16 %v2121_v32, %v2120_v31 }
  0xe5   : > { %v4314_v35 = vpop.f32.mrf.mxu3  ;;  %v424_v23 = vadd.s32 64, %v4297_v14  ;;  %v930_v46 = vsel %vm898_vm5, 1.0, %v6108_v56 }
  0xe6   : > { %vm770_vm4 = vcmp.gt.f32.partialorder %v4346_v40, 0.5  ;;  %vm772_vm7 = vcmp.gt.f32.partialorder %v4356_v27, 0.5  ;;  %3850 = vmatmul.msk.bf16.gmra.mxu0 %vm376_vm1, %v2144_v29  ;;  %vm834_vm9 = vcmp.lt.f32.partialorder %v4346_v40, 14.5  ;;  %vm836_vm10 = vcmp.lt.f32.partialorder %v4356_v27, 14.5 }
  0xe7   : > { %v4329_v21 = vpop.f32.mrf.mxu0  ;;  %3816 = vmatmul.msk.bf16.gmra.mxu2 %vm376_vm1, %v1604_v44  ;;  %v4386_v15 = vsel %vm772_vm7, 1.0, %v6108_v56  ;;  %v4391_v12 = vcvt.s32.f32 %v424_v23  ;;  %v678_v44 = vfloor.f32 %v646_v0  ;;  %v1583_v23 = vld [vmem:[#allocation2 + $0xa1] sm:$0xff]  ;;  %v614_v0 = vsub.f32 %v4342_v34, %v582_v19 }
  0xe8   : > { %6102 = vst [vmem:[#allocation11_spill] sm:$0xff] %v4329_v21  ;;  %v1218_v24 = vmul.f32 %v4275_v1, %v4386_v15  ;;  %v4411_v19 = vsel %vm836_vm10, 1.0, %v6108_v56 }
  0xe9   : > { %v4327_v16 = vpop.f32.mrf.mxu1  ;;  %6114 = vst [vmem:[#allocation22_spill] sm:$0xff] %v4386_v15  ;;  %v488_v1 = vadd.f32 0.5, %v4391_v12  ;;  %vm774_vm11 = vcmp.gt.f32.partialorder %v614_v0, 0.5  ;;  %vm838_vm13 = vcmp.lt.f32.partialorder %v614_v0, 14.5 }
  0xea   : > { %v4322_v58 = vpop.f32.mrf.mxu2  ;;  %6101 = vst [vmem:[#allocation10_spill] sm:$0xff] %v4327_v16  ;;  %3833 = vmatmul.msk.bf16.gmra.mxu3 %vm376_vm1, %v1890_v8 }
  0xeb   : > { %v1754_v8 = vmul.f32 %v4322_v58, %v4371_v55  ;;  %6117 = vst [vmem:[#allocation25_spill] sm:$0xff] %v4411_v19 }
  0xed   : > { %v4325_v3 = vpop.f32.mrf.mxu3  ;;  %v1786_v25 = vmul.f32 %v1754_v8, %v928_v50  ;;  %v1582_v8 = vld [vmem:[#allocation2 + $0x99] sm:$0xff] }
  0xef   : > { %v4349_v11 = vpop.f32.mrf.mxu0  ;;  %v1818_v31 = vadd.f32 %v1786_v25, %v1532_v5  ;;  %v4400_v5 = vsel %vm834_vm9, 1.0, %v6108_v56 }
  0xf1   : > { %v1425_v48 = vpop.f32.mrf.mxu1 }
  0xf2   : > { %v4334_v26 = vpop.f32.mrf.mxu2 }
  0xf3   : > { %6104 = vst [vmem:[#allocation13_spill] sm:$0xff] %v4334_v26 }
  0xf4   : > { %3800 = vmatmul.msk.bf16.gmra.mxu1 %vm376_vm1, %v2144_v29  ;;  %v1502_v29 = vmul.f32 %v1425_v48, %v930_v46 }
  0xf5   : > { %v4340_v33 = vpop.f32.mrf.mxu3 }
  0xf6   : > { %6106 = vst [vmem:[#allocation15_spill] sm:$0xff] %v4340_v33  ;;  %v4359_v33 = vsel %vm770_vm4, 1.0, %v6108_v56 }
  0xf7   : > { %v4373_v7 = vpop.f32.mrf.mxu0  ;;  %v1216_v60 = vmul.f32 %v4254_v52, %v4359_v33  ;;  %v2040_v52 = vmul.f32 %v4325_v3, %v4337_v30 }
  0xf8   : > { %6112 = vst [vmem:[#allocation20_spill] sm:$0xff] %v4373_v7  ;;  %v932_v7 = vsel %vm900_vm8, 1.0, %v6108_v56 }
  0xf9   : > { %v4364_v18 = vpop.f32.mrf.mxu1  ;;  %v1248_v58 = vmul.f32 %v1216_v60, %v930_v46  ;;  %v2072_v50 = vadd.f32 %v2040_v52, %v1818_v31  ;;  %v1869_v60 = vld [vmem:[#allocation2 + $0xaf] sm:$0xff]  ;;  %v1250_v48 = vmul.f32 %v1218_v24, %v932_v7  ;;  %v710_v52 = vmul.f32 256.0, %v678_v44 }
  0xfa   : > { %v1679_v41 = vpop.f32.mrf.mxu2  ;;  %6109 = vst [vmem:[#allocation17_spill] sm:$0xff] %v4364_v18  ;;  %v2122_v31 = vld [vmem:[#allocation2 + $0xa8] sm:$0xff] }
  0xfb   : > { %v1534_v43 = vadd.f32 %v1502_v29, %v1248_v58  ;;  %v1756_v63 = vmul.f32 %v1679_v41, %v4400_v5  ;;  %v1605_v58 = vpack.c.bf16 %v1583_v23, %v1582_v8  ;;  %v1891_v29 = vpack.c.bf16 %v1869_v60, %v1868_v38 }
  0xfc   : > { %v520_v41 = vmul.f32 0.0625, %v488_v1  ;;  %v4408_v24 = vsub.f32 %v4342_v34, %v710_v52  ;;  %v4421_v27 = vadd.f32 %v4319_v47, %v2072_v50  ;;  %v4424_v34 = vsel %vm774_vm11, 1.0, %v6108_v56  ;;  %v1870_v52 = vld [vmem:[#allocation2 + $0xb7] sm:$0xff] }
  0xfd   : > { %v1965_v21 = vpop.f32.mrf.mxu3  ;;  %3817 = vmatmul.msk.bf16.gmra.mxu2 %vm376_vm1, %v1605_v58  ;;  %3834 = vmatmul.msk.bf16.gmra.mxu3 %vm376_vm1, %v1891_v29  ;;  %6120 = vst [vmem:[#allocation28_spill] sm:$0xff] %v4424_v34  ;;  %v1220_v8 = vmul.f32 %v4295_v59, %v4424_v34  ;;  %v4446_v59 = vsel %vm838_vm13, 1.0, %v6108_v56 }
  0xfe   : > { %v2042_v30 = vmul.f32 %v1965_v21, %v4359_v33  ;;  %6116 = vst [vmem:[#allocation24_spill] sm:$0xff] %v4408_v24  ;;  %vm902_vm12 = vcmp.gt.f32.partialorder %v4408_v24, 15.5 }
  0xff   : > { %v2224_v25 = vpop.f32.mrf.mxu0  ;;  %6124 = vst [vmem:[#allocation32_spill] sm:$0xff] %v4446_v59 }
 0x101   : > { %v1430_v3 = vpop.f32.mrf.mxu1 }
 0x102   : > { %v4383_v62 = vpop.f32.mrf.mxu2  ;;  %v1504_v40 = vmul.f32 %v1430_v3, %v932_v7 }
 0x103   : > { %6113 = vst [vmem:[#allocation21_spill] sm:$0xff] %v4383_v62  ;;  %v1788_v62 = vmul.f32 %v1756_v63, %v930_v46 }
 0x104   : > { %v1536_v55 = vadd.f32 %v1504_v40, %v1250_v48 }
 0x105   : > { %v4393_v32 = vpop.f32.mrf.mxu3  ;;  %v1820_v26 = vadd.f32 %v1788_v62, %v1534_v43 }
 0x106   : > { %6115 = vst [vmem:[#allocation23_spill] sm:$0xff] %v4393_v32  ;;  %v2123_v32 = vld [vmem:[#allocation2 + $0xb0] sm:$0xff] }
 0x107   : > { %v2145_v16 = vpack.c.bf16 %v2123_v32, %v2122_v31  ;;  %v2074_v38 = vadd.f32 %v2042_v30, %v1820_v26  ;;  %v4418_v43 = vpop.f32.mrf.mxu0  ;;  %v552_v26 = vfloor.f32 %v520_v41  ;;  %v648_v30 = vmul.f32 0.00390625, %v488_v1  ;;  %v1584_v1 = vld [vmem:[#allocation2 + $0xa9] sm:$0xff]  ;;  %v1871_v31 = vld [vmem:[#allocation2 + $0xbf] sm:$0xff] }
 0x108   : > { %6119 = vst [vmem:[#allocation27_spill] sm:$0xff] %v4418_v43 }
 0x109   : > { %v4416_v46 = vpop.f32.mrf.mxu1  ;;  %3851 = vmatmul.msk.bf16.gmra.mxu0 %vm376_vm1, %v2145_v16  ;;  %3801 = vmatmul.msk.bf16.gmra.mxu1 %vm376_vm1, %v2145_v16  ;;  %v4434_v50 = vadd.f32 %v4349_v11, %v2074_v38  ;;  %v934_v16 = vsel %vm902_vm12, 1.0, %v6108_v56  ;;  %v680_v23 = vfloor.f32 %v648_v30  ;;  %v1585_v11 = vld [vmem:[#allocation2 + $0xb1] sm:$0xff] }
 0x10a   : > { %v1684_v18 = vpop.f32.mrf.mxu2  ;;  %6118 = vst [vmem:[#allocation26_spill] sm:$0xff] %v4416_v46  ;;  %v2124_v38 = vld [vmem:[#allocation2 + $0xb8] sm:$0xff] }
 0x10b   : > { %v1758_v21 = vmul.f32 %v1684_v18, %v4411_v19  ;;  %v426_v18 = vadd.s32 80, %v4297_v14  ;;  %v712_v0 = vmul.f32 256.0, %v680_v23 }
 0x10d   : > { %v1970_v42 = vpop.f32.mrf.mxu3  ;;  %v1790_v62 = vmul.f32 %v1758_v21, %v932_v7  ;;  %v4441_v60 = vcvt.s32.f32 %v426_v18  ;;  %v2125_v21 = vld [vmem:[#allocation2 + $0xc0] sm:$0xff] }
 0x10e   : > { %v2044_v32 = vmul.f32 %v1970_v42, %v4386_v15  ;;  %v584_v42 = vmul.f32 16.0, %v552_v26  ;;  %v1892_v26 = vpack.c.bf16 %v1871_v31, %v1870_v52  ;;  %v2146_v18 = vpack.c.bf16 %v2125_v21, %v2124_v38 }
 0x10f   : > { %v1822_v47 = vadd.f32 %v1790_v62, %v1536_v55  ;;  %v1252_v55 = vmul.f32 %v1220_v8, %v934_v16  ;;  %v2229_v58 = vpop.f32.mrf.mxu0  ;;  %v490_v41 = vadd.f32 0.5, %v4441_v60 }
 0x110   : > { %v616_v29 = vsub.f32 %v4391_v12, %v584_v42  ;;  %3835 = vmatmul.msk.bf16.gmra.mxu3 %vm376_vm1, %v1892_v26 }
 0x111   : > { %v2076_v7 = vadd.f32 %v2044_v32, %v1822_v47  ;;  %v1435_v63 = vpop.f32.mrf.mxu1  ;;  %v650_v52 = vmul.f32 0.00390625, %v490_v41 }
 0x112   : > { %v4431_v44 = vpop.f32.mrf.mxu2  ;;  %v1506_v40 = vmul.f32 %v1435_v63, %v934_v16  ;;  %vm776_vm14 = vcmp.gt.f32.partialorder %v616_v29, 0.5  ;;  %v522_v63 = vmul.f32 0.0625, %v490_v41  ;;  %vm840_vm0 = vcmp.lt.f32.partialorder %v616_v29, 14.5  ;;  %v2126_v29 = vld [vmem:[#allocation2 + $0xc8] sm:$0xff] }
 0x113   : > { %6121 = vst [vmem:[#allocation29_spill] sm:$0xff] %v4431_v44  ;;  %v4443_v48 = vadd.f32 %v2224_v25, %v2076_v7  ;;  %v1606_v25 = vpack.c.bf16 %v1585_v11, %v1584_v1  ;;  %v4452_v7 = vsub.f32 %v4391_v12, %v712_v0  ;;  %v4460_v1 = vsel %vm776_vm14, 1.0, %v6108_v56 }
 0x114   : > { %v1538_v62 = vadd.f32 %v1506_v40, %v1252_v55  ;;  %6127 = vst [vmem:[#allocation35_spill] sm:$0xff] %v4460_v1  ;;  %v554_v11 = vfloor.f32 %v522_v63  ;;  %v1222_v0 = vmul.f32 %v4229_v37, %v4460_v1  ;;  %v1873_v63 = vld [vmem:[#allocation2 + $0xcf] sm:$0xff]  ;;  %v4480_v37 = vsel %vm840_vm0, 1.0, %v6108_v56 }
 0x115   : > { %v4439_v3 = vpop.f32.mrf.mxu3  ;;  %6123 = vst [vmem:[#allocation31_spill] sm:$0xff] %v4443_v48  ;;  %3818 = vmatmul.msk.bf16.gmra.mxu2 %vm376_vm1, %v1606_v25  ;;  %vm904_vm15 = vcmp.gt.f32.partialorder %v4452_v7, 15.5  ;;  %v682_v25 = vfloor.f32 %v650_v52 }
 0x116   : > { %6122 = vst [vmem:[#allocation30_spill] sm:$0xff] %v4439_v3  ;;  %v936_v38 = vsel %vm904_vm15, 1.0, %v6108_v56 }
 0x117   : > { %6125 = vst [vmem:[#allocation33_spill] sm:$0xff] %v4452_v7  ;;  %v4468_v40 = vpop.f32.mrf.mxu0  ;;  %v714_v7 = vmul.f32 256.0, %v682_v25 }
 0x118   : > { %6129 = vst [vmem:[#allocation37_spill] sm:$0xff] %v4468_v40 }
 0x119   : > { %v4457_v55 = vpop.f32.mrf.mxu1  ;;  %3852 = vmatmul.msk.bf16.gmra.mxu0 %vm376_vm1, %v2146_v18  ;;  %3802 = vmatmul.msk.bf16.gmra.mxu1 %vm376_vm1, %v2146_v18  ;;  %v1254_v18 = vmul.f32 %v1222_v0, %v936_v38  ;;  %6132 = vst [vmem:[#allocation40_spill] sm:$0xff] %v4480_v37  ;;  %v4486_v24 = vsub.f32 %v4441_v60, %v714_v7 }
 0x11a   : > { %v1689_v32 = vpop.f32.mrf.mxu2  ;;  %6126 = vst [vmem:[#allocation34_spill] sm:$0xff] %v4457_v55 }
 0x11b   : > { %v1760_v30 = vmul.f32 %v1689_v32, %v4446_v59  ;;  %v586_v32 = vmul.f32 16.0, %v554_v11  ;;  %v2127_v11 = vld [vmem:[#allocation2 + $0xd0] sm:$0xff]  ;;  %6133 = vst [vmem:[#allocation41_spill] sm:$0xff] %v4486_v24  ;;  %vm906_vm3 = vcmp.gt.f32.partialorder %v4486_v24, 15.5 }
 0x11d   : > { %v1792_v47 = vmul.f32 %v1760_v30, %v934_v16  ;;  %v1975_v8 = vpop.f32.mrf.mxu3  ;;  %v428_v16 = vadd.s32 96, %v4297_v14  ;;  %v1586_v30 = vld [vmem:[#allocation2 + $0xb9] sm:$0xff] }
 0x11e   : > { %v2046_v42 = vmul.f32 %v1975_v8, %v4424_v34  ;;  %v1872_v8 = vld [vmem:[#allocation2 + $0xc7] sm:$0xff] }
 0x11f   : > { %v1824_v23 = vadd.f32 %v1792_v47, %v1538_v62  ;;  %v4473_v21 = vcvt.s32.f32 %v428_v16  ;;  %v1587_v47 = vld [vmem:[#allocation2 + $0xc1] sm:$0xff]  ;;  %v618_v16 = vsub.f32 %v4441_v60, %v586_v32  ;;  %v1893_v40 = vpack.c.bf16 %v1873_v63, %v1872_v8  ;;  %v2234_v34 = vpop.f32.mrf.mxu0 }
 0x121   : > { %v2078_v12 = vadd.f32 %v2046_v42, %v1824_v23  ;;  %v1440_v41 = vpop.f32.mrf.mxu1  ;;  %v492_v23 = vadd.f32 0.5, %v4473_v21  ;;  %vm778_vm2 = vcmp.gt.f32.partialorder %v618_v16, 0.5  ;;  %3836 = vmatmul.msk.bf16.gmra.mxu3 %vm376_vm1, %v1893_v40  ;;  %vm842_vm4 = vcmp.lt.f32.partialorder %v618_v16, 14.5 }
 0x122   : > { %v4466_v31 = vpop.f32.mrf.mxu2  ;;  %v1508_v42 = vmul.f32 %v1440_v41, %v936_v38 }
 0x123   : > { %6128 = vst [vmem:[#allocation36_spill] sm:$0xff] %v4466_v31  ;;  %v4477_v26 = vadd.f32 %v2229_v58, %v2078_v12  ;;  %v1607_v12 = vpack.c.bf16 %v1587_v47, %v1586_v30  ;;  %v652_v8 = vmul.f32 0.00390625, %v492_v23 }
 0x124   : > { %v1540_v52 = vadd.f32 %v1508_v42, %v1254_v18  ;;  %v4494_v18 = vsel %vm778_vm2, 1.0, %v6108_v56 }
 0x125   : > { %v4475_v62 = vpop.f32.mrf.mxu3  ;;  %6131 = vst [vmem:[#allocation39_spill] sm:$0xff] %v4477_v26  ;;  %v524_v26 = vmul.f32 0.0625, %v492_v23  ;;  %3819 = vmatmul.msk.bf16.gmra.mxu2 %vm376_vm1, %v1607_v12  ;;  %v1224_v40 = vmul.f32 %v4249_v51, %v4494_v18  ;;  %v684_v42 = vfloor.f32 %v652_v8  ;;  %v1589_v12 = vld [vmem:[#allocation2 + $0xd1] sm:$0xff] }
 0x126   : > { %6130 = vst [vmem:[#allocation38_spill] sm:$0xff] %v4475_v62  ;;  %v2147_v62 = vpack.c.bf16 %v2127_v11, %v2126_v29  ;;  %v1588_v29 = vld [vmem:[#allocation2 + $0xc9] sm:$0xff]  ;;  %v2128_v8 = vld [vmem:[#allocation2 + $0xd8] sm:$0xff] }
 0x127   : > { %6135 = vst [vmem:[#allocation43_spill] sm:$0xff] %v4494_v18  ;;  %v556_v47 = vfloor.f32 %v524_v26  ;;  %v4511_v11 = vpop.f32.mrf.mxu0  ;;  %v1608_v24 = vpack.c.bf16 %v1589_v12, %v1588_v29 }
 0x128   : > { %6139 = vst [vmem:[#allocation47_spill] sm:$0xff] %v4511_v11 }
 0x129   : > { %v4491_v30 = vpop.f32.mrf.mxu1  ;;  %3853 = vmatmul.msk.bf16.gmra.mxu0 %vm376_vm1, %v2147_v62  ;;  %3803 = vmatmul.msk.bf16.gmra.mxu1 %vm376_vm1, %v2147_v62  ;;  %v588_v63 = vmul.f32 16.0, %v556_v47  ;;  %v716_v47 = vmul.f32 256.0, %v684_v42  ;;  %v432_v42 = vadd.s32 128, %v4297_v14 }
 0x12a   : > { %v1694_v58 = vpop.f32.mrf.mxu2  ;;  %6134 = vst [vmem:[#allocation42_spill] sm:$0xff] %v4491_v30 }
 0x12b   : > { %v1762_v0 = vmul.f32 %v1694_v58, %v4480_v37 }
 0x12d   : > { %v1794_v41 = vmul.f32 %v1762_v0, %v936_v38  ;;  %v1980_v59 = vpop.f32.mrf.mxu3  ;;  %v938_v38 = vsel %vm906_vm3, 1.0, %v6108_v56  ;;  %v1874_v0 = vld [vmem:[#allocation2 + $0xd7] sm:$0xff] }
 0x12e   : > { %v2048_v32 = vmul.f32 %v1980_v59, %v4460_v1  ;;  %v430_v59 = vadd.s32 112, %v4297_v14  ;;  %v1256_v58 = vmul.f32 %v1224_v40, %v938_v38 }
 0x12f   : > { %v1826_v25 = vadd.f32 %v1794_v41, %v1540_v52  ;;  %v1875_v41 = vld [vmem:[#allocation2 + $0xdf] sm:$0xff] }
 0x130   : > { %v4507_v23 = vcvt.s32.f32 %v430_v59  ;;  %v1894_v11 = vpack.c.bf16 %v1875_v41, %v1874_v0 }
 0x131   : > { %v2080_v60 = vadd.f32 %v2048_v32, %v1826_v25  ;;  %v1445_v52 = vpop.f32.mrf.mxu1  ;;  %v4514_v32 = vsel %vm842_vm4, 1.0, %v6108_v56  ;;  %v620_v25 = vsub.f32 %v4473_v21, %v588_v63 }
 0x132   : > { %v4500_v7 = vpop.f32.mrf.mxu2  ;;  %v1510_v51 = vmul.f32 %v1445_v52, %v938_v38  ;;  %6140 = vst [vmem:[#allocation48_spill] sm:$0xff] %v4514_v32  ;;  %v494_v16 = vadd.f32 0.5, %v4507_v23  ;;  %3837 = vmatmul.msk.bf16.gmra.mxu3 %vm376_vm1, %v1894_v11  ;;  %v4536_v11 = vcvt.s32.f32 %v432_v42 }
 0x133   : > { %6136 = vst [vmem:[#allocation44_spill] sm:$0xff] %v4500_v7  ;;  %v4509_v62 = vadd.f32 %v2234_v34, %v2080_v60  ;;  %v2129_v34 = vld [vmem:[#allocation2 + $0xe0] sm:$0xff]  ;;  %vm780_vm5 = vcmp.gt.f32.partialorder %v620_v25, 0.5  ;;  %vm844_vm7 = vcmp.lt.f32.partialorder %v620_v25, 14.5  ;;  %v1877_v25 = vld [vmem:[#allocation2 + $0xef] sm:$0xff] }
 0x134   : > { %v1542_v60 = vadd.f32 %v1510_v51, %v1256_v58  ;;  %v2148_v52 = vpack.c.bf16 %v2129_v34, %v2128_v8  ;;  %v526_v37 = vmul.f32 0.0625, %v494_v16  ;;  %v4529_v12 = vsel %vm780_vm5, 1.0, %v6108_v56  ;;  %v270_v8 = vld [vmem:[%s4031_s11 + $0xf0] sm:$0xff] }
 0x135   : > { %v4505_v26 = vpop.f32.mrf.mxu3  ;;  %6138 = vst [vmem:[#allocation46_spill] sm:$0xff] %v4509_v62  ;;  %v4520_v62 = vsub.f32 %v4473_v21, %v716_v47  ;;  %3820 = vmatmul.msk.bf16.gmra.mxu2 %vm376_vm1, %v1608_v24  ;;  %v654_v21 = vmul.f32 0.00390625, %v494_v16  ;;  %v431_v51 = vadd.s32 120, %v4297_v14 }
 0x136   : > { %6137 = vst [vmem:[#allocation45_spill] sm:$0xff] %v4505_v26  ;;  %v558_v0 = vfloor.f32 %v526_v37  ;;  %v3942_v37 = vld [vmem:[%s6005_s1] ss:$0 sm:$0xff] }
 0x137   : > { %6141 = vst [vmem:[#allocation49_spill] sm:$0xff] %v4520_v62  ;;  %vm908_vm6 = vcmp.gt.f32.partialorder %v4520_v62, 15.5  ;;  %v686_v47 = vfloor.f32 %v654_v21  ;;  %v4551_v42 = vcvt.s32.f32 %v431_v51  ;;  %v1876_v21 = vld [vmem:[#allocation2 + $0xe7] sm:$0xff]  ;;  %v2131_v51 = vld [vmem:[#allocation2 + $0xf0] sm:$0xff] }
 0x138   : > { %6143 = vst [vmem:[#allocation51_spill] sm:$0xff] %v4529_v12  ;;  %v940_v41 = vsel %vm908_vm6, 1.0, %v6108_v56  ;;  %v590_v34 = vmul.f32 16.0, %v558_v0  ;;  %v4554_v0 = vsel %vm844_vm7, 1.0, %v6108_v56  ;;  %v1895_v7 = vpack.c.bf16 %v1877_v25, %v1876_v21 }
 0x139   : > { %v4526_v58 = vpop.f32.mrf.mxu1  ;;  %3854 = vmatmul.msk.bf16.gmra.mxu0 %vm376_vm1, %v2148_v52  ;;  %3804 = vmatmul.msk.bf16.gmra.mxu1 %vm376_vm1, %v2148_v52  ;;  %v1590_v52 = vld [vmem:[#allocation2 + $0xd9] sm:$0xff]  ;;  %6147 = vst [vmem:[#allocation55_spill] sm:$0xff] %v4554_v0  ;;  %v434_v25 = vadd.s32 144, %v4297_v14 }
 0x13a   : > { %v1699_v59 = vpop.f32.mrf.mxu2  ;;  %6142 = vst [vmem:[#allocation50_spill] sm:$0xff] %v4526_v58 }
 0x13b   : > { %v1764_v40 = vmul.f32 %v1699_v59, %v4514_v32 }
 0x13d   : > { %v1796_v26 = vmul.f32 %v1764_v40, %v938_v38  ;;  %v1985_v1 = vpop.f32.mrf.mxu3  ;;  %v2239_v38 = vpop.f32.mrf.mxu0 }
 0x13e   : > { %v2050_v63 = vmul.f32 %v1985_v1, %v4494_v18 }
 0x13f   : > { %v1828_v29 = vadd.f32 %v1796_v26, %v1542_v60  ;;  %v1226_v26 = vmul.f32 %v4272_v39, %v4529_v12  ;;  %v306_v60 = vmul.f32 %v3942_v37, %v270_v8  ;;  %v496_v39 = vadd.f32 0.5, %v4536_v11  ;;  %v3943_v8 = vld [vmem:[%s6006_s2] ss:$0 sm:$0xff] }
 0x141   : > { %v2082_v1 = vadd.f32 %v2050_v63, %v1828_v29  ;;  %v1258_v40 = vmul.f32 %v1226_v26, %v940_v41  ;;  %v1450_v63 = vpop.f32.mrf.mxu1  ;;  %v1591_v29 = vld [vmem:[#allocation2 + $0xe1] sm:$0xff]  ;;  %v4561_v26 = vsub.f32 %v4507_v23, %v590_v34 }
 0x142   : > { %v4534_v24 = vpop.f32.mrf.mxu2  ;;  %v1512_v62 = vmul.f32 %v1450_v63, %v940_v41  ;;  %v528_v63 = vmul.f32 0.0625, %v496_v39  ;;  %v1609_v30 = vpack.c.bf16 %v1591_v29, %v1590_v52  ;;  %3838 = vmatmul.msk.bf16.gmra.mxu3 %vm376_vm1, %v1895_v7 }
 0x143   : > { %6144 = vst [vmem:[#allocation52_spill] sm:$0xff] %v4534_v24  ;;  %v4548_v59 = vadd.f32 %v2239_v38, %v2082_v1  ;;  %v342_v38 = vadd.f32 %v3943_v8, %v306_v60  ;;  %v718_v1 = vmul.f32 256.0, %v686_v47  ;;  %v495_v60 = vadd.f32 0.5, %v4551_v42 }
 0x144   : > { %v1544_v18 = vadd.f32 %v1512_v62, %v1258_v40  ;;  %vm782_vm8 = vcmp.gt.f32.partialorder %v4561_v26, 0.5  ;;  %v560_v40 = vfloor.f32 %v528_v63  ;;  %v1593_v63 = vld [vmem:[#allocation2 + $0xf1] sm:$0xff]  ;;  %vm846_vm10 = vcmp.lt.f32.partialorder %v4561_v26, 14.5 }
 0x145   : > { %v4542_v16 = vpop.f32.mrf.mxu3  ;;  %6146 = vst [vmem:[#allocation54_spill] sm:$0xff] %v4548_v59  ;;  %v271_v59 = vld [vmem:[%s4031_s11 + $0xf8] sm:$0xff]  ;;  %v374_v58 = vmax.f32 %v342_v38, 0.0  ;;  %v4563_v55 = vpop.f32.mrf.mxu0  ;;  %v4569_v62 = vsub.f32 %v4507_v23, %v718_v1  ;;  %3821 = vmatmul.msk.bf16.gmra.mxu2 %vm376_vm1, %v1609_v30  ;;  %v4579_v23 = vsel %vm782_vm8, 1.0, %v6108_v56  ;;  %v655_v7 = vmul.f32 0.00390625, %v495_v60 }
 0x146   : > { %6145 = vst [vmem:[#allocation53_spill] sm:$0xff] %v4542_v16  ;;  %v2130_v16 = vld [vmem:[#allocation2 + $0xe8] sm:$0xff]  ;;  %v307_v24 = vmul.f32 %v3942_v37, %v271_v59  ;;  %v592_v30 = vmul.f32 16.0, %v560_v40  ;;  %v2133_v40 = vld [vmem:[#allocation2 + $0x100] sm:$0xff] }
 0x147   : > { %6148 = vst [vmem:[#allocation56_spill] sm:$0xff] %v4563_v55  ;;  %v2149_v34 = vpack.c.bf16 %v2131_v51, %v2130_v16  ;;  %vm910_vm9 = vcmp.gt.f32.partialorder %v4569_v62, 15.5 }
 0x148   : > { %413 = vst.msk [vmem:[#allocation2 + $0x108] sm:$0xff] %vm376_vm1, %v374_v58  ;;  %v343_v47 = vadd.f32 %v3943_v8, %v307_v24  ;;  %v527_v58 = vmul.f32 0.0625, %v495_v60  ;;  %v4592_v21 = vsub.f32 %v4536_v11, %v592_v30  ;;  %v1592_v8 = vld [vmem:[#allocation2 + $0xe9] sm:$0xff]  ;;  %v1878_v60 = vld [vmem:[#allocation2 + $0xf7] sm:$0xff] }
 0x149   : > { %6149 = vst [vmem:[#allocation57_spill] sm:$0xff] %v4569_v62  ;;  %v4575_v52 = vpop.f32.mrf.mxu1  ;;  %3855 = vmatmul.msk.bf16.gmra.mxu0 %vm376_vm1, %v2149_v34  ;;  %3805 = vmatmul.msk.bf16.gmra.mxu1 %vm376_vm1, %v2149_v34 }
 0x14a   : > { %v1704_v32 = vpop.f32.mrf.mxu2  ;;  %v375_v59 = vmax.f32 %v343_v47, 0.0  ;;  %6150 = vst [vmem:[#allocation58_spill] sm:$0xff] %v4575_v52  ;;  %v1879_v47 = vld [vmem:[#allocation2 + $0xff] sm:$0xff]  ;;  %vm784_vm11 = vcmp.gt.f32.partialorder %v4592_v21, 0.5  ;;  %vm848_vm3 = vcmp.lt.f32.partialorder %v4592_v21, 14.5 }
 0x14b   : > { %v1766_v43 = vmul.f32 %v1704_v32, %v4554_v0  ;;  %6151 = vst [vmem:[#allocation59_spill] sm:$0xff] %v4579_v23  ;;  %v4609_v26 = vsel %vm784_vm11, 1.0, %v6108_v56  ;;  %v2327_v0 = vld [vmem:[#allocation2 + $0x21] sm:$0xff] }
 0x14c   : > { %414 = vst.msk [vmem:[#allocation2 + $0x110] sm:$0xff] %vm376_vm1, %v375_v59  ;;  %v2132_v59 = vld [vmem:[#allocation2 + $0xf8] sm:$0xff] }
 0x14d   : > { %v1798_v31 = vmul.f32 %v1766_v43, %v940_v41  ;;  %v1990_v48 = vpop.f32.mrf.mxu3  ;;  %v656_v43 = vmul.f32 0.00390625, %v496_v39  ;;  %v942_v41 = vsel %vm910_vm9, 1.0, %v6108_v56  ;;  %v2244_v16 = vpop.f32.mrf.mxu0  ;;  %6157 = vst [vmem:[#allocation65_spill] sm:$0xff] %v4609_v26 }
 0x14e   : > { %v2052_v37 = vmul.f32 %v1990_v48, %v4529_v12  ;;  %v2326_v12 = vld [vmem:[#allocation2 + $0x19] sm:$0xff] }
 0x14f   : > { %v1830_v32 = vadd.f32 %v1798_v31, %v1544_v18  ;;  %v1228_v31 = vmul.f32 %v4293_v13, %v4579_v23  ;;  %v559_v18 = vfloor.f32 %v527_v58  ;;  %v688_v24 = vfloor.f32 %v656_v43 }
 0x150   : > { %v687_v13 = vfloor.f32 %v655_v7  ;;  %v1610_v58 = vpack.c.bf16 %v1593_v63, %v1592_v8  ;;  %v1896_v43 = vpack.c.bf16 %v1879_v47, %v1878_v60  ;;  %v2150_v7 = vpack.c.bf16 %v2133_v40, %v2132_v59 }
 0x151   : > { %v2084_v48 = vadd.f32 %v2052_v37, %v1830_v32  ;;  %v1455_v38 = vpop.f32.mrf.mxu1  ;;  %v1260_v1 = vmul.f32 %v1228_v31, %v942_v41  ;;  %v591_v51 = vmul.f32 16.0, %v559_v18  ;;  %v720_v37 = vmul.f32 256.0, %v688_v24 }
 0x152   : > { %v4587_v39 = vpop.f32.mrf.mxu2  ;;  %v1514_v34 = vmul.f32 %v1455_v38, %v942_v41  ;;  %v719_v31 = vmul.f32 256.0, %v687_v13  ;;  %v4604_v24 = vsel %vm846_vm10, 1.0, %v6108_v56  ;;  %3839 = vmatmul.msk.bf16.gmra.mxu3 %vm376_vm1, %v1896_v43  ;;  %v433_v13 = vadd.s32 136, %v4297_v14 }
 0x153   : > { %6152 = vst [vmem:[#allocation60_spill] sm:$0xff] %v4587_v39  ;;  %v4589_v29 = vadd.f32 %v2244_v16, %v2084_v48  ;;  %v4597_v48 = vcvt.s32.f32 %v434_v25  ;;  %v623_v30 = vsub.f32 %v4551_v42, %v591_v51  ;;  %v4601_v18 = vsub.f32 %v4536_v11, %v720_v37 }
 0x154   : > { %v1546_v32 = vadd.f32 %v1514_v34, %v1260_v1  ;;  %6155 = vst [vmem:[#allocation63_spill] sm:$0xff] %v4604_v24  ;;  %v4615_v11 = vsub.f32 %v4551_v42, %v719_v31  ;;  %v1230_v60 = vmul.f32 %v4238_v36, %v4609_v26  ;;  %v4636_v40 = vcvt.s32.f32 %v433_v13 }
 0x155   : > { %6153 = vst [vmem:[#allocation61_spill] sm:$0xff] %v4589_v29  ;;  %v4606_v16 = vpop.f32.mrf.mxu3  ;;  %3822 = vmatmul.msk.bf16.gmra.mxu2 %vm376_vm1, %v1610_v58  ;;  %v498_v38 = vadd.f32 0.5, %v4597_v48  ;;  %vm783_vm12 = vcmp.gt.f32.partialorder %v623_v30, 0.5  ;;  %v4617_v1 = vpop.f32.mrf.mxu0  ;;  %vm912_vm13 = vcmp.gt.f32.partialorder %v4601_v18, 15.5  ;;  %vm847_vm14 = vcmp.lt.f32.partialorder %v623_v30, 14.5  ;;  %v1594_v30 = vld [vmem:[#allocation2 + $0xf9] sm:$0xff] }
 0x156   : > { %6154 = vst [vmem:[#allocation62_spill] sm:$0xff] %v4601_v18  ;;  %v4627_v42 = vsel %vm783_vm12, 1.0, %v6108_v56  ;;  %v4630_v47 = vsel %vm912_vm13, 1.0, %v6108_v56  ;;  %vm911_vm15 = vcmp.gt.f32.partialorder %v4615_v11, 15.5  ;;  %v4634_v59 = vsel %vm847_vm14, 1.0, %v6108_v56  ;;  %v1881_v18 = vld [vmem:[#allocation2 + $0x10f] sm:$0xff] }
 0x157   : > { %6156 = vst [vmem:[#allocation64_spill] sm:$0xff] %v4606_v16  ;;  %v530_v34 = vmul.f32 0.0625, %v498_v38  ;;  %v1262_v36 = vmul.f32 %v1230_v60, %v4630_v47  ;;  %v658_v58 = vmul.f32 0.00390625, %v498_v38  ;;  %v943_v43 = vsel %vm911_vm15, 1.0, %v6108_v56  ;;  %v2135_v16 = vld [vmem:[#allocation2 + $0x110] sm:$0xff] }
 0x158   : > { %6158 = vst [vmem:[#allocation66_spill] sm:$0xff] %v4615_v11  ;;  %v497_v62 = vadd.f32 0.5, %v4636_v40 }
 0x159   : > { %v1457_v8 = vpop.f32.mrf.mxu1  ;;  %6159 = vst [vmem:[#allocation67_spill] sm:$0xff] %v4617_v1  ;;  %3856 = vmatmul.msk.bf16.gmra.mxu0 %vm376_vm1, %v2150_v7  ;;  %3806 = vmatmul.msk.bf16.gmra.mxu1 %vm376_vm1, %v2150_v7 }
 0x15a   : > { %v1709_v25 = vpop.f32.mrf.mxu2  ;;  %6160 = vst [vmem:[#allocation68_spill] sm:$0xff] %v4627_v42  ;;  %v1515_v38 = vmul.f32 %v1457_v8, %v943_v43  ;;  %v2358_v8 = vpack.c.bf16 %v2327_v0, %v2326_v12  ;;  %v657_v0 = vmul.f32 0.00390625, %v497_v62 }
 0x15b   : > { %v1768_v51 = vmul.f32 %v1709_v25, %v4604_v24  ;;  %6161 = vst [vmem:[#allocation69_spill] sm:$0xff] %v4634_v59  ;;  %v562_v25 = vfloor.f32 %v530_v34 }
 0x15d   : > { %v1800_v63 = vmul.f32 %v1768_v51, %v942_v41  ;;  %v1229_v41 = vmul.f32 %v4305_v22, %v4627_v42  ;;  %v436_v51 = vadd.s32 160, %v4297_v14  ;;  %v1995_v11 = vpop.f32.mrf.mxu3  ;;  %v2134_v22 = vld [vmem:[#allocation2 + $0x108] sm:$0xff]  ;;  %v2249_v29 = vpop.f32.mrf.mxu0 }
 0x15e   : > { %v2054_v60 = vmul.f32 %v1995_v11, %v4579_v23  ;;  %v2151_v15 = vpack.c.bf16 %v2135_v16, %v2134_v22  ;;  %v2866_v22 = vld [vmem:[#allocation2 + $0x28] sm:$0xff] }
 0x15f   : > { %v1832_v37 = vadd.f32 %v1800_v63, %v1546_v32  ;;  %v1595_v32 = vld [vmem:[#allocation2 + $0x101] sm:$0xff]  ;;  %v1261_v1 = vmul.f32 %v1229_v41, %v943_v43  ;;  %v529_v41 = vmul.f32 0.0625, %v497_v62 }
 0x160   : > { %v1880_v63 = vld [vmem:[#allocation2 + $0x107] sm:$0xff]  ;;  %v1611_v52 = vpack.c.bf16 %v1595_v32, %v1594_v30 }
 0x161   : > { %v1460_v7 = vpop.f32.mrf.mxu1  ;;  %v1897_v55 = vpack.c.bf16 %v1881_v18, %v1880_v63  ;;  %v2086_v39 = vadd.f32 %v2054_v60, %v1832_v37  ;;  %v1547_v11 = vadd.f32 %v1515_v38, %v1261_v1  ;;  %v561_v12 = vfloor.f32 %v529_v41 }
 0x162   : > { %v1711_v31 = vpop.f32.mrf.mxu2  ;;  %v1516_v24 = vmul.f32 %v1460_v7, %v4630_v47  ;;  %v4649_v7 = vcvt.s32.f32 %v436_v51  ;;  %v438_v63 = vadd.s32 176, %v4297_v14 }
 0x163   : > { %v1769_v13 = vmul.f32 %v1711_v31, %v4634_v59  ;;  %v594_v31 = vmul.f32 16.0, %v562_v25  ;;  %v690_v59 = vfloor.f32 %v658_v58  ;;  %v4651_v23 = vadd.f32 %v2249_v29, %v2086_v39  ;;  %3840 = vmatmul.msk.bf16.gmra.mxu3 %vm376_vm1, %v1897_v55  ;;  %v2580_v25 = vld [vmem:[#allocation2 + $0x27] sm:$0xff] }
 0x164   : > { %v4647_v34 = vadd.f32 %v1516_v24, %v1262_v36  ;;  %v500_v36 = vadd.f32 0.5, %v4649_v7 }
 0x165   : > { %v1801_v3 = vmul.f32 %v1769_v13, %v943_v43  ;;  %6162 = vst [vmem:[#allocation70_spill] sm:$0xff] %v4651_v23  ;;  %3823 = vmatmul.msk.bf16.gmra.mxu2 %vm376_vm1, %v1611_v52  ;;  %v1997_v18 = vpop.f32.mrf.mxu3  ;;  %v4657_v37 = vsub.f32 %v4597_v48, %v594_v31  ;;  %v722_v58 = vmul.f32 256.0, %v690_v59  ;;  %v435_v52 = vadd.s32 152, %v4297_v14  ;;  %v2581_v13 = vld [vmem:[#allocation2 + $0x2f] sm:$0xff] }
 0x166   : > { %v2055_v16 = vmul.f32 %v1997_v18, %v4627_v42  ;;  %v532_v55 = vmul.f32 0.0625, %v500_v36  ;;  %v689_v43 = vfloor.f32 %v657_v0  ;;  %v660_v30 = vmul.f32 0.00390625, %v500_v36  ;;  %v3120_v31 = vld [vmem:[#allocation2 + $0x29] sm:$0xff] }
 0x167   : > { %v1833_v24 = vadd.f32 %v1801_v3, %v1547_v11  ;;  %v2251_v3 = vpop.f32.mrf.mxu0  ;;  %v4666_v1 = vsub.f32 %v4597_v48, %v722_v58  ;;  %vm786_vm0 = vcmp.gt.f32.partialorder %v4657_v37, 0.5  ;;  %v4674_v51 = vcvt.s32.f32 %v435_v52  ;;  %v2867_v48 = vld [vmem:[#allocation2 + $0x30] sm:$0xff] }
 0x168   : > { %v4672_v62 = vsel %vm786_vm0, 1.0, %v6108_v56  ;;  %v564_v32 = vfloor.f32 %v532_v55  ;;  %v721_v38 = vmul.f32 256.0, %v689_v43  ;;  %v3121_v11 = vld [vmem:[#allocation2 + $0x31] sm:$0xff]  ;;  %v692_v41 = vfloor.f32 %v660_v30 }
 0x169   : > { %3857 = vmatmul.msk.bf16.gmra.mxu0 %vm376_vm1, %v2151_v15  ;;  %3859 = vmatmul.msk.bf16.vlgmr.msra.gmra.mxu1 %vm376_vm1, %v2358_v8  ;;  %v2087_v39 = vadd.f32 %v2055_v16, %v1833_v24  ;;  %v4663_v29 = vpop.f32.mrf.mxu1  ;;  %6163 = vst [vmem:[#allocation71_spill] sm:$0xff] %v4666_v1  ;;  %v593_v15 = vmul.f32 16.0, %v561_v12  ;;  %vm914_vm2 = vcmp.gt.f32.partialorder %v4666_v1, 15.5  ;;  %v1232_v8 = vmul.f32 %v4259_v53, %v4672_v62 }
 0x16a   : > { %6165 = vst [vmem:[#allocation73_spill] sm:$0xff] %v4672_v62  ;;  %v2612_v24 = vpack.c.bf16 %v2581_v13, %v2580_v25  ;;  %v2898_v36 = vpack.c.bf16 %v2867_v48, %v2866_v22  ;;  %v4682_v18 = vsel %vm914_vm2, 1.0, %v6108_v56  ;;  %v499_v58 = vadd.f32 0.5, %v4674_v51  ;;  %v1714_v22 = vpop.f32.mrf.mxu2 }
 0x16b   : > { %v4669_v59 = vadd.f32 %v2251_v3, %v2087_v39  ;;  %v625_v60 = vsub.f32 %v4636_v40, %v593_v15  ;;  %v596_v16 = vmul.f32 16.0, %v564_v32  ;;  %v4685_v12 = vcvt.s32.f32 %v438_v63 }
 0x16c   : > { %v3152_v0 = vpack.c.bf16 %v3121_v11, %v3120_v31  ;;  %v440_v39 = vadd.s32 192, %v4297_v14  ;;  %v4690_v52 = vsub.f32 %v4636_v40, %v721_v38  ;;  %v1264_v3 = vmul.f32 %v1232_v8, %v4682_v18 }
 0x16d   : > { %6164 = vst [vmem:[#allocation72_spill] sm:$0xff] %v4669_v59  ;;  %vm785_vm4 = vcmp.gt.f32.partialorder %v625_v60, 0.5  ;;  %v724_v15 = vmul.f32 256.0, %v692_v41  ;;  %v531_v30 = vmul.f32 0.0625, %v499_v58  ;;  %v4697_v21 = vsub.f32 %v4649_v7, %v596_v16  ;;  %v2000_v48 = vpop.f32.mrf.mxu3  ;;  %v3123_v59 = vld [vmem:[#allocation2 + $0x41] sm:$0xff] }
 0x16e   : > { %6166 = vst [vmem:[#allocation74_spill] sm:$0xff] %v4690_v52  ;;  %v502_v25 = vadd.f32 0.5, %v4685_v12  ;;  %v4701_v40 = vsel %vm848_vm3, 1.0, %v6108_v56  ;;  %v4708_v63 = vsel %vm785_vm4, 1.0, %v6108_v56  ;;  %v659_v13 = vmul.f32 0.00390625, %v499_v58 }
 0x16f   : > { %v2254_v53 = vpop.f32.mrf.mxu0  ;;  %6167 = vst [vmem:[#allocation75_spill] sm:$0xff] %v4701_v40  ;;  %v4710_v38 = vcvt.s32.f32 %v440_v39  ;;  %vm913_vm5 = vcmp.gt.f32.partialorder %v4690_v52, 15.5  ;;  %v4714_v31 = vsub.f32 %v4649_v7, %v724_v15  ;;  %v1770_v11 = vmul.f32 %v1714_v22, %v4701_v40  ;;  %v3122_v40 = vld [vmem:[#allocation2 + $0x39] sm:$0xff] }
 0x170   : > { %v563_v8 = vfloor.f32 %v531_v30  ;;  %vm788_vm6 = vcmp.gt.f32.partialorder %v4697_v21, 0.5  ;;  %v437_v41 = vadd.s32 168, %v4297_v14  ;;  %v2056_v16 = vmul.f32 %v2000_v48, %v4609_v26  ;;  %v2869_v48 = vld [vmem:[#allocation2 + $0x40] sm:$0xff] }
 0x171   : > { %v1465_v55 = vpop.f32.mrf.mxu1  ;;  %6168 = vst [vmem:[#allocation76_spill] sm:$0xff] %v4714_v31  ;;  %v1802_v58 = vmul.f32 %v1770_v11, %v4630_v47  ;;  %vm849_vm7 = vcmp.lt.f32.partialorder %v625_v60, 14.5  ;;  %v691_v7 = vfloor.f32 %v659_v13  ;;  %v662_v39 = vmul.f32 0.00390625, %v502_v25  ;;  %v2868_v13 = vld [vmem:[#allocation2 + $0x38] sm:$0xff] }
 0x172   : > { %v1518_v43 = vmul.f32 %v1465_v55, %v4682_v18  ;;  %v4729_v15 = vsel %vm788_vm6, 1.0, %v6108_v56  ;;  %vm916_vm8 = vcmp.gt.f32.partialorder %v4714_v31, 15.5  ;;  %v595_v47 = vmul.f32 16.0, %v563_v8 }
 0x173   : > { %3893 = vmatmul.msk.bf16.vlgmr.msra.gmra.mxu3 %vm376_vm1, %v2898_v36  ;;  %v1231_v36 = vmul.f32 %v4246_v49, %v4708_v63  ;;  %6169 = vst [vmem:[#allocation77_spill] sm:$0xff] %v4729_v15  ;;  %v1834_v49 = vadd.f32 %v1802_v58, %v4647_v34  ;;  %v4733_v30 = vcvt.s32.f32 %v437_v41  ;;  %v4736_v22 = vsel %vm849_vm7, 1.0, %v6108_v56 }
 0x174   : > { %v4704_v32 = vadd.f32 %v1518_v43, %v1264_v3  ;;  %v2582_v43 = vld [vmem:[#allocation2 + $0x37] sm:$0xff]  ;;  %v504_v11 = vadd.f32 0.5, %v4710_v38  ;;  %v723_v31 = vmul.f32 256.0, %v691_v7  ;;  %v4741_v34 = vsel %vm916_vm8, 1.0, %v6108_v56 }
 0x175   : > { %3876 = vmatmul.msk.bf16.vlgmr.msra.gmra.mxu2 %vm376_vm1, %v2612_v24  ;;  %v534_v24 = vmul.f32 0.0625, %v502_v25  ;;  %v2583_v25 = vld [vmem:[#allocation2 + $0x3f] sm:$0xff]  ;;  %v2088_v52 = vadd.f32 %v2056_v16, %v1834_v49  ;;  %v1234_v8 = vmul.f32 %v4280_v4, %v4729_v15  ;;  %v694_v41 = vfloor.f32 %v662_v39  ;;  %v2002_v58 = vpop.f32.mrf.mxu3 }
 0x176   : > { %v2613_v23 = vpack.c.bf16 %v2583_v25, %v2582_v43  ;;  %v2899_v19 = vpack.c.bf16 %v2869_v48, %v2868_v13  ;;  %v501_v16 = vadd.f32 0.5, %v4733_v30  ;;  %v3153_v44 = vpack.c.bf16 %v3123_v59, %v3122_v40 }
 0x177   : > { %v4724_v55 = vpop.f32.mrf.mxu0  ;;  %v566_v60 = vfloor.f32 %v534_v24  ;;  %v1716_v24 = vpop.f32.mrf.mxu2  ;;  %vm850_vm9 = vcmp.lt.f32.partialorder %v4657_v37, 14.5  ;;  %v536_v4 = vmul.f32 0.0625, %v504_v11  ;;  %v4752_v39 = vsub.f32 %v4674_v51, %v723_v31 }
 0x178   : > { %v1771_v42 = vmul.f32 %v1716_v24, %v4736_v22  ;;  %v1266_v24 = vmul.f32 %v1234_v8, %v4741_v34  ;;  %v661_v31 = vmul.f32 0.00390625, %v501_v16  ;;  %v439_v48 = vadd.s32 184, %v4297_v14 }
 0x179   : > { %3910 = vmatmul.msk.bf16.vlgmr.msra.gmra.mxu0 %vm376_vm1, %v3152_v0  ;;  %3860 = vmatmul.msk.bf16.gmra.mxu1 %vm376_vm1, %v3152_v0  ;;  %v945_v0 = vsel %vm913_vm5, 1.0, %v6108_v56  ;;  %v4726_v3 = vpop.f32.mrf.mxu1  ;;  %v598_v7 = vmul.f32 16.0, %v566_v60  ;;  %6170 = vst [vmem:[#allocation78_spill] sm:$0xff] %v4752_v39  ;;  %vm915_vm11 = vcmp.gt.f32.partialorder %v4752_v39, 15.5  ;;  %v664_v8 = vmul.f32 0.00390625, %v504_v11  ;;  %v3125_v39 = vld [vmem:[#allocation2 + $0x51] sm:$0xff] }
 0x17a   : > { %v1263_v1 = vmul.f32 %v1231_v36, %v945_v0  ;;  %v1517_v26 = vmul.f32 %v4663_v29, %v945_v0  ;;  %v4746_v36 = vadd.f32 %v2254_v53, %v2088_v52  ;;  %v627_v29 = vsub.f32 %v4674_v51, %v595_v47 }
 0x17b   : > { %v1803_v46 = vmul.f32 %v1771_v42, %v945_v0  ;;  %v726_v53 = vmul.f32 256.0, %v694_v41  ;;  %v2057_v47 = vmul.f32 %v2002_v58, %v4708_v63  ;;  %v533_v42 = vmul.f32 0.0625, %v501_v16 }
 0x17c   : > { %v1549_v49 = vadd.f32 %v1517_v26, %v1263_v1  ;;  %vm787_vm10 = vcmp.gt.f32.partialorder %v627_v29, 0.5  ;;  %v4762_v37 = vsub.f32 %v4685_v12, %v598_v7  ;;  %v4765_v1 = vsel %vm850_vm9, 1.0, %v6108_v56 }
 0x17d   : > { %6171 = vst [vmem:[#allocation79_spill] sm:$0xff] %v4765_v1  ;;  %v4773_v40 = vsel %vm787_vm10, 1.0, %v6108_v56  ;;  %v4776_v0 = vsub.f32 %v4685_v12, %v726_v53  ;;  %v565_v13 = vfloor.f32 %v533_v42  ;;  %vm851_vm13 = vcmp.lt.f32.partialorder %v627_v29, 14.5  ;;  %v2584_v29 = vld [vmem:[#allocation2 + $0x47] sm:$0xff]  ;;  %v2585_v53 = vld [vmem:[#allocation2 + $0x4f] sm:$0xff] }
 0x17e   : > { %v1835_v25 = vadd.f32 %v1803_v46, %v1549_v49  ;;  %6172 = vst [vmem:[#allocation80_spill] sm:$0xff] %v4773_v40  ;;  %vm790_vm12 = vcmp.gt.f32.partialorder %v4762_v37, 0.5  ;;  %v442_v16 = vadd.s32 208, %v4297_v14  ;;  %v1233_v12 = vmul.f32 %v4267_v57, %v4773_v40 }
 0x17f   : > { %6173 = vst [vmem:[#allocation81_spill] sm:$0xff] %v4776_v0  ;;  %v4797_v11 = vsel %vm790_vm12, 1.0, %v6108_v56  ;;  %vm918_vm14 = vcmp.gt.f32.partialorder %v4776_v0, 15.5  ;;  %v4804_v57 = vsel %vm851_vm13, 1.0, %v6108_v56  ;;  %v696_v42 = vfloor.f32 %v664_v8 }
 0x180   : > { %v2089_v59 = vadd.f32 %v2057_v47, %v1835_v25  ;;  %v2005_v51 = vpop.f32.mrf.mxu3  ;;  %6175 = vst [vmem:[#allocation83_spill] sm:$0xff] %v4797_v11  ;;  %v2870_v25 = vld [vmem:[#allocation2 + $0x48] sm:$0xff]  ;;  %v2871_v47 = vld [vmem:[#allocation2 + $0x50] sm:$0xff]  ;;  %v2614_v8 = vpack.c.bf16 %v2585_v53, %v2584_v29  ;;  %vm852_vm15 = vcmp.lt.f32.partialorder %v4697_v21, 14.5  ;;  %vm854_vm6 = vcmp.lt.f32.partialorder %v4762_v37, 14.5 }
 0x181   : > { %v2058_v58 = vmul.f32 %v2005_v51, %v4672_v62  ;;  %6176 = vst [vmem:[#allocation84_spill] sm:$0xff] %v4804_v57  ;;  %v4807_v51 = vcvt.s32.f32 %v442_v16  ;;  %v441_v16 = vadd.s32 200, %v4297_v14  ;;  %v728_v29 = vmul.f32 256.0, %v696_v42 }
 0x183   : > { %3894 = vmatmul.msk.bf16.gmra.mxu3 %vm376_vm1, %v2899_v19  ;;  %v1719_v19 = vpop.f32.mrf.mxu2  ;;  %v506_v53 = vadd.f32 0.5, %v4807_v51  ;;  %v4841_v42 = vcvt.s32.f32 %v441_v16 }
 0x184   : > { %v1772_v60 = vmul.f32 %v1719_v19, %v4765_v1 }
 0x185   : > { %3877 = vmatmul.msk.bf16.gmra.mxu2 %vm376_vm1, %v2613_v23  ;;  %v568_v23 = vfloor.f32 %v536_v4  ;;  %v597_v4 = vmul.f32 16.0, %v565_v13 }
 0x186   : > { %v4755_v43 = vpop.f32.mrf.mxu0  ;;  %v1470_v52 = vpop.f32.mrf.mxu1  ;;  %v1804_v41 = vmul.f32 %v1772_v60, %v4682_v18 }
 0x187   : > { %v1520_v26 = vmul.f32 %v1470_v52, %v4741_v34  ;;  %v4801_v52 = vcvt.s32.f32 %v439_v48 }
 0x188   : > { %v1836_v18 = vadd.f32 %v1804_v41, %v4704_v32  ;;  %v4812_v32 = vsel %vm918_vm14, 1.0, %v6108_v56  ;;  %v2007_v48 = vpop.f32.mrf.mxu3  ;;  %v3124_v41 = vld [vmem:[#allocation2 + $0x49] sm:$0xff] }
 0x189   : > { %3911 = vmatmul.msk.bf16.gmra.mxu0 %vm376_vm1, %v3153_v44  ;;  %v4768_v46 = vadd.f32 %v1520_v26, %v1266_v24  ;;  %3861 = vmatmul.msk.bf16.gmra.mxu1 %vm376_vm1, %v3153_v44  ;;  %v4782_v44 = vadd.f32 %v4724_v55, %v2089_v59  ;;  %v947_v55 = vsel %vm915_vm11, 1.0, %v6108_v56  ;;  %v693_v24 = vfloor.f32 %v661_v31 }
 0x18a   : > { %v600_v26 = vmul.f32 16.0, %v568_v23  ;;  %v2090_v59 = vadd.f32 %v2058_v58, %v1836_v18  ;;  %v1519_v19 = vmul.f32 %v4726_v3, %v947_v55  ;;  %v1265_v60 = vmul.f32 %v1233_v12, %v947_v55 }
 0x18b   : > { %6174 = vst [vmem:[#allocation82_spill] sm:$0xff] %v4782_v44  ;;  %v1236_v31 = vmul.f32 %v4299_v17, %v4797_v11  ;;  %v1721_v13 = vpop.f32.mrf.mxu2  ;;  %v2900_v58 = vpack.c.bf16 %v2871_v47, %v2870_v25  ;;  %v629_v12 = vsub.f32 %v4733_v30, %v597_v4  ;;  %v725_v18 = vmul.f32 256.0, %v693_v24 }
 0x18c   : > { %v1773_v23 = vmul.f32 %v1721_v13, %v4804_v57  ;;  %v4818_v3 = vadd.f32 %v4755_v43, %v2090_v59  ;;  %v503_v0 = vadd.f32 0.5, %v4801_v52  ;;  %v1551_v62 = vadd.f32 %v1519_v19, %v1265_v60 }
 0x18d   : > { %v3154_v1 = vpack.c.bf16 %v3125_v39, %v3124_v41  ;;  %v4825_v44 = vsub.f32 %v4710_v38, %v600_v26  ;;  %v1268_v43 = vmul.f32 %v1236_v31, %v4812_v32  ;;  %v2059_v24 = vmul.f32 %v2007_v48, %v4773_v40 }
 0x18e   : > { %v4789_v7 = vpop.f32.mrf.mxu0  ;;  %v4791_v49 = vpop.f32.mrf.mxu1  ;;  %6177 = vst [vmem:[#allocation85_spill] sm:$0xff] %v4818_v3  ;;  %v1805_v17 = vmul.f32 %v1773_v23, %v947_v55  ;;  %v4836_v39 = vsub.f32 %v4733_v30, %v725_v18  ;;  %vm789_vm0 = vcmp.gt.f32.partialorder %v629_v12, 0.5  ;;  %v535_v55 = vmul.f32 0.0625, %v503_v0 }
 0x18f   : > { %v4839_v26 = vsel %vm852_vm15, 1.0, %v6108_v56  ;;  %v4848_v19 = vsub.f32 %v4710_v38, %v728_v29  ;;  %v538_v60 = vmul.f32 0.0625, %v506_v53  ;;  %vm792_vm2 = vcmp.gt.f32.partialorder %v4825_v44, 0.5 }
 0x190   : > { %v1837_v4 = vadd.f32 %v1805_v17, %v1551_v62  ;;  %6178 = vst [vmem:[#allocation86_spill] sm:$0xff] %v4836_v39  ;;  %v4852_v13 = vsel %vm789_vm0, 1.0, %v6108_v56  ;;  %vm917_vm3 = vcmp.gt.f32.partialorder %v4836_v39, 15.5  ;;  %v567_v41 = vfloor.f32 %v535_v55  ;;  %v2873_v55 = vld [vmem:[#allocation2 + $0x60] sm:$0xff] }
 0x191   : > { %6179 = vst [vmem:[#allocation87_spill] sm:$0xff] %v4839_v26  ;;  %v663_v23 = vmul.f32 0.00390625, %v503_v0  ;;  %v505_v38 = vadd.f32 0.5, %v4841_v42  ;;  %vm853_vm4 = vcmp.lt.f32.partialorder %v629_v12, 14.5  ;;  %vm920_vm5 = vcmp.gt.f32.partialorder %v4848_v19, 15.5 }
 0x192   : > { %v2091_v59 = vadd.f32 %v2059_v24, %v1837_v4  ;;  %6180 = vst [vmem:[#allocation88_spill] sm:$0xff] %v4848_v19  ;;  %v570_v16 = vfloor.f32 %v538_v60  ;;  %v666_v18 = vmul.f32 0.00390625, %v506_v53  ;;  %v1235_v17 = vmul.f32 %v4289_v9, %v4852_v13  ;;  %v2587_v24 = vld [vmem:[#allocation2 + $0x5f] sm:$0xff] }
 0x193   : > { %3895 = vmatmul.msk.bf16.gmra.mxu3 %vm376_vm1, %v2900_v58  ;;  %v2010_v31 = vpop.f32.mrf.mxu3  ;;  %v599_v53 = vmul.f32 16.0, %v567_v41  ;;  %v695_v4 = vfloor.f32 %v663_v23  ;;  %v4878_v9 = vsel %vm853_vm4, 1.0, %v6108_v56  ;;  %v537_v60 = vmul.f32 0.0625, %v505_v38 }
 0x194   : > { %v2060_v58 = vmul.f32 %v2010_v31, %v4729_v15  ;;  %v698_v41 = vfloor.f32 %v666_v18  ;;  %v3126_v15 = vld [vmem:[#allocation2 + $0x59] sm:$0xff]  ;;  %vm856_vm13 = vcmp.lt.f32.partialorder %v4825_v44, 14.5 }
 0x195   : > { %3878 = vmatmul.msk.bf16.gmra.mxu2 %vm376_vm1, %v2614_v8  ;;  %v4857_v8 = vadd.f32 %v4789_v7, %v2091_v59  ;;  %v4872_v7 = vsel %vm792_vm2, 1.0, %v6108_v56  ;;  %v4883_v59 = vsel %vm920_vm5, 1.0, %v6108_v56 }
 0x196   : > { %v4829_v25 = vpop.f32.mrf.mxu0  ;;  %v1475_v47 = vpop.f32.mrf.mxu1  ;;  %6182 = vst [vmem:[#allocation90_spill] sm:$0xff] %v4872_v7  ;;  %v1238_v31 = vmul.f32 %v4244_v45, %v4872_v7 }
 0x197   : > { %v1522_v21 = vmul.f32 %v1475_v47, %v4812_v32  ;;  %6181 = vst [vmem:[#allocation89_spill] sm:$0xff] %v4857_v8  ;;  %v444_v47 = vadd.s32 224, %v4297_v14 }
 0x198   : > { %v1724_v30 = vpop.f32.mrf.mxu2 }
 0x199   : > { %3912 = vmatmul.msk.bf16.gmra.mxu0 %vm376_vm1, %v3154_v1  ;;  %v4844_v62 = vadd.f32 %v1522_v21, %v1268_v43  ;;  %3862 = vmatmul.msk.bf16.gmra.mxu1 %vm376_vm1, %v3154_v1  ;;  %v1774_v48 = vmul.f32 %v1724_v30, %v4839_v26  ;;  %v2586_v43 = vld [vmem:[#allocation2 + $0x57] sm:$0xff]  ;;  %v3127_v26 = vld [vmem:[#allocation2 + $0x61] sm:$0xff] }
 0x19a   : > { %v2872_v21 = vld [vmem:[#allocation2 + $0x58] sm:$0xff]  ;;  %v2615_v40 = vpack.c.bf16 %v2587_v24, %v2586_v43  ;;  %v3155_v18 = vpack.c.bf16 %v3127_v26, %v3126_v15  ;;  %v730_v43 = vmul.f32 256.0, %v698_v41 }
 0x19b   : > { %v1806_v1 = vmul.f32 %v1774_v48, %v4741_v34  ;;  %v949_v34 = vsel %vm917_vm3, 1.0, %v6108_v56  ;;  %v602_v48 = vmul.f32 16.0, %v570_v16  ;;  %v2012_v39 = vpop.f32.mrf.mxu3  ;;  %v2901_v19 = vpack.c.bf16 %v2873_v55, %v2872_v21 }
 0x19c   : > { %v1267_v23 = vmul.f32 %v1235_v17, %v949_v34  ;;  %v1270_v17 = vmul.f32 %v1238_v31, %v4883_v59  ;;  %v569_v21 = vfloor.f32 %v537_v60  ;;  %v2061_v55 = vmul.f32 %v2012_v39, %v4852_v13 }
 0x19d   : > { %v1838_v12 = vadd.f32 %v1806_v1, %v4768_v46  ;;  %v1521_v46 = vmul.f32 %v4791_v49, %v949_v34  ;;  %v631_v49 = vsub.f32 %v4801_v52, %v599_v53  ;;  %v4898_v3 = vsub.f32 %v4807_v51, %v602_v48 }
 0x19e   : > { %v4865_v29 = vpop.f32.mrf.mxu0  ;;  %v4867_v0 = vpop.f32.mrf.mxu1  ;;  %v601_v60 = vmul.f32 16.0, %v569_v21  ;;  %v2589_v21 = vld [vmem:[#allocation2 + $0x6f] sm:$0xff] }
 0x19f   : > { %v2092_v30 = vadd.f32 %v2060_v58, %v1838_v12  ;;  %v4892_v58 = vcvt.s32.f32 %v444_v47  ;;  %v727_v12 = vmul.f32 256.0, %v695_v4  ;;  %v1553_v45 = vadd.f32 %v1521_v46, %v1267_v23 }
 0x1a0   : > { %v1726_v1 = vpop.f32.mrf.mxu2  ;;  %vm791_vm7 = vcmp.gt.f32.partialorder %v631_v49, 0.5  ;;  %vm794_vm8 = vcmp.gt.f32.partialorder %v4898_v3, 0.5  ;;  %vm855_vm10 = vcmp.lt.f32.partialorder %v631_v49, 14.5  ;;  %v2588_v49 = vld [vmem:[#allocation2 + $0x67] sm:$0xff]  ;;  %vm858_vm3 = vcmp.lt.f32.partialorder %v4898_v3, 14.5 }
 0x1a1   : > { %v1775_v8 = vmul.f32 %v1726_v1, %v4878_v9  ;;  %v4890_v57 = vadd.f32 %v4829_v25, %v2092_v30  ;;  %v508_v37 = vadd.f32 0.5, %v4892_v58  ;;  %v4908_v26 = vsub.f32 %v4801_v52, %v727_v12 }
 0x1a2   : > { %v4922_v30 = vsel %vm791_vm7, 1.0, %v6108_v56 }
 0x1a3   : > { %v1807_v16 = vmul.f32 %v1775_v8, %v949_v34  ;;  %3896 = vmatmul.msk.bf16.gmra.mxu3 %vm376_vm1, %v2901_v19  ;;  %6183 = vst [vmem:[#allocation91_spill] sm:$0xff] %v4908_v26  ;;  %v4911_v8 = vsel %vm854_vm6, 1.0, %v6108_v56  ;;  %v665_v34 = vmul.f32 0.00390625, %v505_v38  ;;  %v443_v19 = vadd.s32 216, %v4297_v14 }
 0x1a4   : > { %v2015_v52 = vpop.f32.mrf.mxu3  ;;  %v540_v46 = vmul.f32 0.0625, %v508_v37  ;;  %vm919_vm9 = vcmp.gt.f32.partialorder %v4908_v26, 15.5  ;;  %v668_v1 = vmul.f32 0.00390625, %v508_v37  ;;  %v1237_v12 = vmul.f32 %v4310_v28, %v4922_v30 }
 0x1a5   : > { %v1839_v47 = vadd.f32 %v1807_v16, %v1553_v45  ;;  %3879 = vmatmul.msk.bf16.gmra.mxu2 %vm376_vm1, %v2615_v40  ;;  %v4918_v40 = vsub.f32 %v4807_v51, %v730_v43  ;;  %v697_v51 = vfloor.f32 %v665_v34  ;;  %v2062_v41 = vmul.f32 %v2015_v52, %v4797_v11 }
 0x1a6   : > { %v4900_v24 = vpop.f32.mrf.mxu0  ;;  %v1480_v25 = vpop.f32.mrf.mxu1  ;;  %v4933_v23 = vcvt.s32.f32 %v443_v19  ;;  %v572_v43 = vfloor.f32 %v540_v46  ;;  %v4951_v28 = vsel %vm855_vm10, 1.0, %v6108_v56  ;;  %v3128_v46 = vld [vmem:[#allocation2 + $0x69] sm:$0xff]  ;;  %v2616_v26 = vpack.c.bf16 %v2589_v21, %v2588_v49 }
 0x1a7   : > { %v1524_v15 = vmul.f32 %v1480_v25, %v4883_v59  ;;  %v2093_v53 = vadd.f32 %v2061_v55, %v1839_v47  ;;  %6184 = vst [vmem:[#allocation92_spill] sm:$0xff] %v4918_v40  ;;  %vm922_vm11 = vcmp.gt.f32.partialorder %v4918_v40, 15.5  ;;  %v446_v25 = vadd.s32 240, %v4297_v14  ;;  %v2874_v47 = vld [vmem:[#allocation2 + $0x68] sm:$0xff]  ;;  %v2875_v55 = vld [vmem:[#allocation2 + $0x70] sm:$0xff] }
 0x1a8   : > { %v1729_v4 = vpop.f32.mrf.mxu2  ;;  %v4956_v37 = vsel %vm922_vm11, 1.0, %v6108_v56  ;;  %v507_v19 = vadd.f32 0.5, %v4933_v23  ;;  %v2902_v40 = vpack.c.bf16 %v2875_v55, %v2874_v47 }
 0x1a9   : > { %3913 = vmatmul.msk.bf16.gmra.mxu0 %vm376_vm1, %v3155_v18  ;;  %v4914_v39 = vadd.f32 %v1524_v15, %v1270_v17  ;;  %3863 = vmatmul.msk.bf16.gmra.mxu1 %vm376_vm1, %v3155_v18  ;;  %v1776_v38 = vmul.f32 %v1729_v4, %v4911_v8  ;;  %v4928_v31 = vadd.f32 %v4865_v29, %v2093_v53  ;;  %v4942_v29 = vsel %vm794_vm8, 1.0, %v6108_v56 }
 0x1aa   : > { %6185 = vst [vmem:[#allocation93_spill] sm:$0xff] %v4942_v29  ;;  %v4947_v17 = vsub.f32 %v4841_v42, %v601_v60  ;;  %v729_v15 = vmul.f32 256.0, %v697_v51  ;;  %v1240_v53 = vmul.f32 %v4261_v54, %v4942_v29  ;;  %v700_v4 = vfloor.f32 %v668_v1 }
 0x1ab   : > { %v1808_v48 = vmul.f32 %v1776_v38, %v4812_v32  ;;  %v951_v32 = vsel %vm919_vm9, 1.0, %v6108_v56  ;;  %v539_v49 = vmul.f32 0.0625, %v507_v19 }
 0x1ac   : > { %v1523_v34 = vmul.f32 %v4867_v0, %v951_v32  ;;  %v1269_v52 = vmul.f32 %v1237_v12, %v951_v32  ;;  %v2017_v38 = vpop.f32.mrf.mxu3  ;;  %vm793_vm12 = vcmp.gt.f32.partialorder %v4947_v17, 0.5  ;;  %v604_v0 = vmul.f32 16.0, %v572_v43 }
 0x1ad   : > { %v1840_v18 = vadd.f32 %v1808_v48, %v4844_v62  ;;  %v3129_v48 = vld [vmem:[#allocation2 + $0x71] sm:$0xff]  ;;  %v4971_v12 = vsub.f32 %v4841_v42, %v729_v15  ;;  %v4981_v44 = vsel %vm793_vm12, 1.0, %v6108_v56  ;;  %v667_v15 = vmul.f32 0.00390625, %v507_v19 }
 0x1ae   : > { %v4937_v45 = vpop.f32.mrf.mxu0  ;;  %v4939_v16 = vpop.f32.mrf.mxu1  ;;  %v1555_v54 = vadd.f32 %v1523_v34, %v1269_v52  ;;  %v3156_v1 = vpack.c.bf16 %v3129_v48, %v3128_v46  ;;  %6187 = vst [vmem:[#allocation95_spill] sm:$0xff] %v4981_v44  ;;  %v4984_v42 = vsub.f32 %v4892_v58, %v604_v0  ;;  %v1239_v52 = vmul.f32 %v4252_v2, %v4981_v44 }
 0x1af   : > { %v2094_v62 = vadd.f32 %v2062_v41, %v1840_v18  ;;  %v4967_v41 = vcvt.s32.f32 %v446_v25  ;;  %6186 = vst [vmem:[#allocation94_spill] sm:$0xff] %v4971_v12  ;;  %v4988_v25 = vsel %vm856_vm13, 1.0, %v6108_v56  ;;  %vm921_vm14 = vcmp.gt.f32.partialorder %v4971_v12, 15.5  ;;  %v3131_v12 = vld [vmem:[#allocation2 + $0x81] sm:$0xff] }
 0x1b0   : > { %v1731_v60 = vpop.f32.mrf.mxu2  ;;  %6188 = vst [vmem:[#allocation96_spill] sm:$0xff] %v4988_v25  ;;  %vm796_vm15 = vcmp.gt.f32.partialorder %v4984_v42, 0.5  ;;  %v445_v46 = vadd.s32 232, %v4297_v14  ;;  %v699_v0 = vfloor.f32 %v667_v15  ;;  %vm857_vm0 = vcmp.lt.f32.partialorder %v4947_v17, 14.5 }
 0x1b1   : > { %v1777_v51 = vmul.f32 %v1731_v60, %v4951_v28  ;;  %v4964_v11 = vadd.f32 %v4900_v24, %v2094_v62  ;;  %v1272_v60 = vmul.f32 %v1240_v53, %v4956_v37  ;;  %v732_v24 = vmul.f32 256.0, %v700_v4 }
 0x1b2   : > { %v2063_v62 = vmul.f32 %v2017_v38, %v4922_v30  ;;  %v510_v43 = vadd.f32 0.5, %v4967_v41  ;;  %v953_v2 = vsel %vm921_vm14, 1.0, %v6108_v56  ;;  %v5020_v17 = vsel %vm857_vm0, 1.0, %v6108_v56 }
 0x1b3   : > { %v1809_v18 = vmul.f32 %v1777_v51, %v951_v32  ;;  %3897 = vmatmul.msk.bf16.gmra.mxu3 %vm376_vm1, %v2902_v40  ;;  %v571_v40 = vfloor.f32 %v539_v49  ;;  %v4998_v38 = vsub.f32 %v4892_v58, %v732_v24  ;;  %v2590_v24 = vld [vmem:[#allocation2 + $0x77] sm:$0xff]  ;;  %v1271_v15 = vmul.f32 %v1239_v52, %v953_v2 }
 0x1b4   : > { %v542_v48 = vmul.f32 0.0625, %v510_v43  ;;  %vm860_vm9 = vcmp.lt.f32.partialorder %v4984_v42, 14.5 }
 0x1b5   : > { %v1841_v55 = vadd.f32 %v1809_v18, %v1555_v54  ;;  %3880 = vmatmul.msk.bf16.gmra.mxu2 %vm376_vm1, %v2616_v26  ;;  %v2020_v4 = vpop.f32.mrf.mxu3  ;;  %6189 = vst [vmem:[#allocation97_spill] sm:$0xff] %v4998_v38  ;;  %v603_v58 = vmul.f32 16.0, %v571_v40  ;;  %vm924_vm2 = vcmp.gt.f32.partialorder %v4998_v38, 15.5  ;;  %v3130_v38 = vld [vmem:[#allocation2 + $0x79] sm:$0xff] }
 0x1b6   : > { %v2274_v21 = vpop.f32.mrf.mxu0  ;;  %v1485_v47 = vpop.f32.mrf.mxu1  ;;  %v2064_v18 = vmul.f32 %v2020_v4, %v4872_v7 }
 0x1b7   : > { %v1526_v32 = vmul.f32 %v1485_v47, %v4956_v37  ;;  %v2095_v34 = vadd.f32 %v2063_v62, %v1841_v55  ;;  %v5013_v47 = vsel %vm796_vm15, 1.0, %v6108_v56  ;;  %v574_v55 = vfloor.f32 %v542_v48  ;;  %v2591_v62 = vld [vmem:[#allocation2 + $0x7f] sm:$0xff] }
 0x1b8   : > { %v1734_v53 = vpop.f32.mrf.mxu2  ;;  %6191 = vst [vmem:[#allocation99_spill] sm:$0xff] %v5013_v47  ;;  %v5024_v4 = vsub.f32 %v4933_v23, %v603_v58 }
 0x1b9   : > { %3914 = vmatmul.msk.bf16.gmra.mxu0 %vm376_vm1, %v3156_v1  ;;  %v4991_v26 = vadd.f32 %v1526_v32, %v1272_v60  ;;  %3864 = vmatmul.msk.bf16.gmra.mxu1 %vm376_vm1, %v3156_v1  ;;  %v1778_v19 = vmul.f32 %v1734_v53, %v4988_v25  ;;  %v5004_v51 = vadd.f32 %v4937_v45, %v2095_v34  ;;  %v670_v1 = vmul.f32 0.00390625, %v510_v43  ;;  %v2876_v32 = vld [vmem:[#allocation2 + $0x78] sm:$0xff]  ;;  %v2877_v43 = vld [vmem:[#allocation2 + $0x80] sm:$0xff] }
 0x1ba   : > { %v731_v34 = vmul.f32 256.0, %v699_v0  ;;  %v1525_v53 = vmul.f32 %v4939_v16, %v953_v2  ;;  %v2617_v0 = vpack.c.bf16 %v2591_v62, %v2590_v24  ;;  %v606_v58 = vmul.f32 16.0, %v574_v55 }
 0x1bb   : > { %6190 = vst [vmem:[#allocation98_spill] sm:$0xff] %v5004_v51  ;;  %v1810_v54 = vmul.f32 %v1778_v19, %v4883_v59  ;;  %v5017_v59 = vcvt.s32.f32 %v445_v46  ;;  %v1242_v19 = vmul.f32 %v4282_v6, %v5013_v47  ;;  %v702_v46 = vfloor.f32 %v670_v1 }
 0x1bc   : > { %v1557_v7 = vadd.f32 %v1525_v53, %v1271_v15  ;;  %v3157_v51 = vpack.c.bf16 %v3131_v12, %v3130_v38  ;;  %v5037_v6 = vsub.f32 %v4933_v23, %v731_v34  ;;  %vm795_vm4 = vcmp.gt.f32.partialorder %v5024_v4, 0.5 }
 0x1bd   : > { %v1842_v45 = vadd.f32 %v1810_v54, %v4914_v39  ;;  %v5027_v39 = vsel %vm924_vm2, 1.0, %v6108_v56  ;;  %v2022_v54 = vpop.f32.mrf.mxu3  ;;  %v509_v16 = vadd.f32 0.5, %v5017_v59  ;;  %v734_v62 = vmul.f32 256.0, %v702_v46 }
 0x1be   : > { %v2276_v60 = vpop.f32.mrf.mxu0  ;;  %v5010_v49 = vpop.f32.mrf.mxu1  ;;  %6192 = vst [vmem:[#allocation100_spill] sm:$0xff] %v5037_v6  ;;  %v1274_v1 = vmul.f32 %v1242_v19, %v5027_v39  ;;  %v5046_v23 = vsub.f32 %v4967_v41, %v606_v58  ;;  %v5049_v38 = vsel %vm858_vm3, 1.0, %v6108_v56  ;;  %vm923_vm5 = vcmp.gt.f32.partialorder %v5037_v6, 15.5 }
 0x1bf   : > { %v2096_v40 = vadd.f32 %v2064_v18, %v1842_v45  ;;  %v2903_v18 = vpack.c.bf16 %v2877_v43, %v2876_v32  ;;  %v2065_v32 = vmul.f32 %v2022_v54, %v4981_v44  ;;  %v541_v3 = vmul.f32 0.0625, %v509_v16  ;;  %6193 = vst [vmem:[#allocation101_spill] sm:$0xff] %v5049_v38 }
 0x1c0   : > { %v1736_v48 = vpop.f32.mrf.mxu2  ;;  %v669_v15 = vmul.f32 0.00390625, %v509_v16  ;;  %v5062_v34 = vsub.f32 %v4967_v41, %v734_v62  ;;  %vm798_vm6 = vcmp.gt.f32.partialorder %v5046_v23, 0.5  ;;  %vm859_vm7 = vcmp.lt.f32.partialorder %v5024_v4, 14.5 }
 0x1c1   : > { %v1779_v52 = vmul.f32 %v1736_v48, %v5020_v17  ;;  %v5032_v45 = vadd.f32 %v2274_v21, %v2096_v40  ;;  %v573_v53 = vfloor.f32 %v541_v3  ;;  %v955_v16 = vsel %vm923_vm5, 1.0, %v6108_v56 }
 0x1c2   : > { %6195 = vst [vmem:[#allocation103_spill] sm:$0xff] %v5062_v34  ;;  %v5079_v58 = vsel %vm798_vm6, 1.0, %v6108_v56  ;;  %vm926_vm8 = vcmp.gt.f32.partialorder %v5062_v34, 15.5  ;;  %v701_v4 = vfloor.f32 %v669_v15  ;;  %v5086_v62 = vsel %vm859_vm7, 1.0, %v6108_v56 }
 0x1c3   : > { %v1811_v25 = vmul.f32 %v1779_v52, %v953_v2  ;;  %3898 = vmatmul.msk.bf16.gmra.mxu3 %vm376_vm1, %v2903_v18  ;;  %v417_v52 = vadd.s32 8, %v4297_v14  ;;  %6197 = vst [vmem:[#allocation105_spill] sm:$0xff] %v5079_v58  ;;  %v1527_v3 = vmul.f32 %v5010_v49, %v955_v16  ;;  %vm862_vm13 = vcmp.lt.f32.partialorder %v5046_v23, 14.5 }
 0x1c4   : > { %6198 = vst [vmem:[#allocation106_spill] sm:$0xff] %v5086_v62  ;;  %v5156_v23 = vsel %vm862_vm13, 1.0, %v6108_v56 }
 0x1c5   : > { %v1843_v21 = vadd.f32 %v1811_v25, %v1557_v7  ;;  %3881 = vmatmul.msk.bf16.gmra.mxu2 %vm376_vm1, %v2617_v0  ;;  %v5058_v7 = vsel %vm795_vm4, 1.0, %v6108_v56  ;;  %v2025_v43 = vpop.f32.mrf.mxu3  ;;  %6206 = vst [vmem:[#allocation114_spill] sm:$0xff] %v5156_v23 }
 0x1c6   : > { %v2279_v48 = vpop.f32.mrf.mxu0  ;;  %v1490_v24 = vpop.f32.mrf.mxu1  ;;  %6194 = vst [vmem:[#allocation102_spill] sm:$0xff] %v5058_v7  ;;  %v2066_v54 = vmul.f32 %v2025_v43, %v4942_v29  ;;  %v1241_v41 = vmul.f32 %v4270_v61, %v5058_v7  ;;  %v2593_v61 = vld [vmem:[#allocation2 + $0x8f] sm:$0xff]  ;;  %v5092_v43 = vsel %vm926_vm8, 1.0, %v6108_v56 }
 0x1c7   : > { %v1528_v12 = vmul.f32 %v1490_v24, %v5027_v39  ;;  %v2097_v2 = vadd.f32 %v2065_v32, %v1843_v21  ;;  %v2878_v21 = vld [vmem:[#allocation2 + $0x88] sm:$0xff]  ;;  %v2879_v32 = vld [vmem:[#allocation2 + $0x90] sm:$0xff] }
 0x1c8   : > { %v1739_v25 = vpop.f32.mrf.mxu2  ;;  %v2904_v6 = vpack.c.bf16 %v2879_v32, %v2878_v21 }
 0x1c9   : > { %3915 = vmatmul.msk.bf16.gmra.mxu0 %vm376_vm1, %v3157_v51  ;;  %v5052_v55 = vadd.f32 %v1528_v12, %v1274_v1  ;;  %3865 = vmatmul.msk.bf16.gmra.mxu1 %vm376_vm1, %v3157_v51  ;;  %v1780_v40 = vmul.f32 %v1739_v25, %v5049_v38  ;;  %v447_v51 = vadd.s32 248, %v4297_v14  ;;  %v5067_v19 = vadd.f32 %v2276_v60, %v2097_v2  ;;  %v2592_v60 = vld [vmem:[#allocation2 + $0x87] sm:$0xff] }
 0x1ca   : > { %v605_v1 = vmul.f32 16.0, %v573_v53  ;;  %v5089_v2 = vcvt.s32.f32 %v417_v52  ;;  %v1273_v25 = vmul.f32 %v1241_v41, %v955_v16  ;;  %v3132_v53 = vld [vmem:[#allocation2 + $0x89] sm:$0xff]  ;;  %v2618_v34 = vpack.c.bf16 %v2593_v61, %v2592_v60 }
 0x1cb   : > { %6196 = vst [vmem:[#allocation104_spill] sm:$0xff] %v5067_v19  ;;  %v1812_v46 = vmul.f32 %v1780_v40, %v4956_v37  ;;  %v5083_v24 = vcvt.s32.f32 %v447_v51  ;;  %v3133_v51 = vld [vmem:[#allocation2 + $0x91] sm:$0xff]  ;;  %v733_v52 = vmul.f32 256.0, %v701_v4  ;;  %v5112_v4 = vsel %vm860_vm9, 1.0, %v6108_v56 }
 0x1cc   : > { %v637_v49 = vsub.f32 %v5017_v59, %v605_v1  ;;  %v3158_v38 = vpack.c.bf16 %v3133_v51, %v3132_v53  ;;  %6200 = vst [vmem:[#allocation108_spill] sm:$0xff] %v5112_v4 }
 0x1cd   : > { %v1844_v37 = vadd.f32 %v1812_v46, %v4991_v26  ;;  %v1244_v26 = vmul.f32 %v4302_v20, %v5079_v58  ;;  %v2027_v40 = vpop.f32.mrf.mxu3  ;;  %v511_v41 = vadd.f32 0.5, %v5083_v24 }
 0x1ce   : > { %v2281_v0 = vpop.f32.mrf.mxu0  ;;  %v5075_v18 = vpop.f32.mrf.mxu1  ;;  %vm797_vm10 = vcmp.gt.f32.partialorder %v637_v49, 0.5  ;;  %vm861_vm12 = vcmp.lt.f32.partialorder %v637_v49, 14.5  ;;  %v2595_v49 = vld [vmem:[#allocation2 + $0x9f] sm:$0xff] }
 0x1cf   : > { %v2098_v12 = vadd.f32 %v2066_v54, %v1844_v37  ;;  %v1559_v37 = vadd.f32 %v1527_v3, %v1273_v25  ;;  %v1276_v20 = vmul.f32 %v1244_v26, %v5092_v43  ;;  %v543_v42 = vmul.f32 0.0625, %v511_v41 }
 0x1d0   : > { %v1741_v15 = vpop.f32.mrf.mxu2 }
 0x1d1   : > { %v1781_v46 = vmul.f32 %v1741_v15, %v5086_v62  ;;  %v5097_v54 = vadd.f32 %v2279_v48, %v2098_v12  ;;  %v481_v15 = vadd.f32 0.5, %v5089_v2  ;;  %v2067_v48 = vmul.f32 %v2027_v40, %v5058_v7 }
 0x1d2   : > { %v575_v32 = vfloor.f32 %v543_v42  ;;  %v671_v12 = vmul.f32 0.00390625, %v511_v41  ;;  %v419_v40 = vadd.s32 24, %v4297_v14 }
 0x1d3   : > { %v1813_v29 = vmul.f32 %v1781_v46, %v955_v16  ;;  %3899 = vmatmul.msk.bf16.gmra.mxu3 %vm376_vm1, %v2904_v6  ;;  %v5109_v16 = vsub.f32 %v5017_v59, %v733_v52  ;;  %v513_v6 = vmul.f32 0.0625, %v481_v15 }
 0x1d5   : > { %v1845_v60 = vadd.f32 %v1813_v29, %v1559_v37  ;;  %3882 = vmatmul.msk.bf16.gmra.mxu2 %vm376_vm1, %v2618_v34  ;;  %6199 = vst [vmem:[#allocation107_spill] sm:$0xff] %v5109_v16  ;;  %v2030_v21 = vpop.f32.mrf.mxu3  ;;  %vm925_vm11 = vcmp.gt.f32.partialorder %v5109_v16, 15.5  ;;  %v545_v37 = vfloor.f32 %v513_v6 }
 0x1d6   : > { %v2284_v19 = vpop.f32.mrf.mxu0  ;;  %v1495_v44 = vpop.f32.mrf.mxu1  ;;  %v2068_v26 = vmul.f32 %v2030_v21, %v5013_v47  ;;  %v957_v52 = vsel %vm925_vm11, 1.0, %v6108_v56 }
 0x1d7   : > { %v1530_v1 = vmul.f32 %v1495_v44, %v5092_v43  ;;  %v2099_v61 = vadd.f32 %v2067_v48, %v1845_v60  ;;  %v5119_v44 = vsel %vm797_vm10, 1.0, %v6108_v56  ;;  %v5135_v60 = vsel %vm861_vm12, 1.0, %v6108_v56  ;;  %v2881_v48 = vld [vmem:[#allocation2 + $0xa0] sm:$0xff] }
 0x1d8   : > { %v1744_v34 = vpop.f32.mrf.mxu2  ;;  %6201 = vst [vmem:[#allocation109_spill] sm:$0xff] %v5119_v44  ;;  %v1243_v53 = vmul.f32 %v4291_v10, %v5119_v44  ;;  %v1529_v10 = vmul.f32 %v5075_v18, %v957_v52  ;;  %v577_v47 = vmul.f32 16.0, %v545_v37  ;;  %vm3644_vm10 = vcmask 27648  }
 0x1d9   : > { %3916 = vmatmul.msk.bf16.gmra.mxu0 %vm376_vm1, %v3158_v38  ;;  %v5115_v29 = vadd.f32 %v1530_v1, %v1276_v20  ;;  %3866 = vmatmul.msk.bf16.gmra.mxu1 %vm376_vm1, %v3158_v38  ;;  %v1782_v59 = vmul.f32 %v1744_v34, %v5112_v4  ;;  %v5123_v3 = vadd.f32 %v2281_v0, %v2099_v61  ;;  %v641_v38 = vmul.f32 0.00390625, %v481_v15  ;;  %v2594_v0 = vld [vmem:[#allocation2 + $0x97] sm:$0xff] }
 0x1da   : > { %v607_v20 = vmul.f32 16.0, %v575_v32  ;;  %6203 = vst [vmem:[#allocation111_spill] sm:$0xff] %v5135_v60  ;;  %v2880_v15 = vld [vmem:[#allocation2 + $0x98] sm:$0xff]  ;;  %v5138_v61 = vcvt.s32.f32 %v419_v40  ;;  %v1275_v34 = vmul.f32 %v1243_v53, %v957_v52  ;;  %v2619_v32 = vpack.c.bf16 %v2595_v49, %v2594_v0 }
 0x1db   : > { %6202 = vst [vmem:[#allocation110_spill] sm:$0xff] %v5123_v3  ;;  %v1814_v25 = vmul.f32 %v1782_v59, %v5027_v39  ;;  %v703_v39 = vfloor.f32 %v671_v12  ;;  %v673_v42 = vfloor.f32 %v641_v38  ;;  %v2905_v12 = vpack.c.bf16 %v2881_v48, %v2880_v15 }
 0x1dc   : > { %v639_v4 = vsub.f32 %v5083_v24, %v607_v20  ;;  %v483_v53 = vadd.f32 0.5, %v5138_v61 }
 0x1dd   : > { %v1846_v41 = vadd.f32 %v1814_v25, %v5052_v55  ;;  %v2032_v59 = vpop.f32.mrf.mxu3  ;;  %v3134_v55 = vld [vmem:[#allocation2 + $0x99] sm:$0xff]  ;;  %v3135_v25 = vld [vmem:[#allocation2 + $0xa1] sm:$0xff]  ;;  %v705_v40 = vmul.f32 256.0, %v673_v42 }
 0x1de   : > { %v2286_v51 = vpop.f32.mrf.mxu0  ;;  %v5130_v46 = vpop.f32.mrf.mxu1  ;;  %v3159_v38 = vpack.c.bf16 %v3135_v25, %v3134_v55  ;;  %v2069_v0 = vmul.f32 %v2032_v59, %v5119_v44  ;;  %vm799_vm14 = vcmp.gt.f32.partialorder %v639_v4, 0.5  ;;  %vm863_vm3 = vcmp.lt.f32.partialorder %v639_v4, 14.5  ;;  %v2596_v4 = vld [vmem:[#allocation2 + $0xa7] sm:$0xff] }
 0x1df   : > { %v2100_v1 = vadd.f32 %v2068_v26, %v1846_v41  ;;  %v735_v26 = vmul.f32 256.0, %v703_v39  ;;  %v1561_v41 = vadd.f32 %v1529_v10, %v1275_v34  ;;  %v5161_v20 = vsub.f32 %v5089_v2, %v705_v40 }
 0x1e0   : > { %v1746_v21 = vpop.f32.mrf.mxu2  ;;  %v515_v39 = vmul.f32 0.0625, %v483_v53  ;;  %v421_v10 = vadd.s32 40, %v4297_v14 }
 0x1e1   : > { %v1783_v6 = vmul.f32 %v1746_v21, %v5135_v60  ;;  %v5141_v16 = vadd.f32 %v2284_v19, %v2100_v1  ;;  %v609_v19 = vsub.f32 %v5089_v2, %v577_v47  ;;  %v5164_v47 = vsel %vm799_vm14, 1.0, %v6108_v56 }
 0x1e2   : > { %6207 = vst [vmem:[#allocation115_spill] sm:$0xff] %v5164_v47  ;;  %v643_v1 = vmul.f32 0.00390625, %v483_v53  ;;  %vm897_vm4 = vcmp.gt.f32.partialorder %v5161_v20, 15.5  ;;  %v547_v34 = vfloor.f32 %v515_v39  ;;  %v1245_v59 = vmul.f32 %v4314_v35, %v5164_v47  ;;  %v2882_v35 = vld [vmem:[#allocation2 + $0xa8] sm:$0xff]  ;;  %v6210_v39 = vld [vmem:[#allocation13_spill] sm:$0xff] }
 0x1e3   : > { %6204 = vst [vmem:[#allocation112_spill] sm:$0xff] %v5141_v16  ;;  %v1815_v18 = vmul.f32 %v1783_v6, %v957_v52  ;;  %3900 = vmatmul.msk.bf16.gmra.mxu3 %vm376_vm1, %v2905_v12  ;;  %v5153_v52 = vsub.f32 %v5083_v24, %v735_v26  ;;  %vm769_vm15 = vcmp.gt.f32.partialorder %v609_v19, 0.5  ;;  %vm833_vm2 = vcmp.lt.f32.partialorder %v609_v19, 14.5 }
 0x1e4   : > { %v5179_v25 = vsel %vm769_vm15, 1.0, %v6108_v56  ;;  %v675_v12 = vfloor.f32 %v643_v1  ;;  %v5187_v26 = vsel %vm863_vm3, 1.0, %v6108_v56  ;;  %v5190_v40 = vcvt.s32.f32 %v421_v10  ;;  %v3136_v1 = vld [vmem:[#allocation2 + $0xa9] sm:$0xff] }
 0x1e5   : > { %v1847_v21 = vadd.f32 %v1815_v18, %v1561_v41  ;;  %3883 = vmatmul.msk.bf16.gmra.mxu2 %vm376_vm1, %v2619_v32  ;;  %6205 = vst [vmem:[#allocation113_spill] sm:$0xff] %v5153_v52  ;;  %vm927_vm0 = vcmp.gt.f32.partialorder %v5153_v52, 15.5  ;;  %v5183_v32 = vsel %vm833_vm2, 1.0, %v6108_v56  ;;  %v2597_v41 = vld [vmem:[#allocation2 + $0xaf] sm:$0xff]  ;;  %vm961_vm9 = vcmp.lt.f32.partialorder %v5161_v20, 239.5 }
 0x1e6   : > { %v2289_v3 = vpop.f32.mrf.mxu0  ;;  %v5146_v7 = vpop.f32.mrf.mxu1  ;;  %v959_v6 = vsel %vm927_vm0, 1.0, %v6108_v56  ;;  %v2883_v18 = vld [vmem:[#allocation2 + $0xb0] sm:$0xff] }
 0x1e7   : > { %v2101_v37 = vadd.f32 %v2069_v0, %v1847_v21  ;;  %v2035_v15 = vpop.f32.mrf.mxu3  ;;  %v1531_v21 = vmul.f32 %v5130_v46, %v959_v6  ;;  %v6209_v0 = vld [vmem:[#allocation4_spill] sm:$0xff]  ;;  %v2906_v10 = vpack.c.bf16 %v2883_v18, %v2882_v35  ;;  %v6211_v46 = vld [vmem:[#allocation10_spill] sm:$0xff]  ;;  %v6213_v35 = vld [vmem:[#allocation19_spill] sm:$0xff] }
 0x1e8   : > { %v1749_v49 = vpop.f32.mrf.mxu2  ;;  %v2070_v42 = vmul.f32 %v2035_v15, %v5079_v58  ;;  %v1215_v19 = vmul.f32 %v6209_v0, %v5179_v25  ;;  %v2620_v58 = vpack.c.bf16 %v2597_v41, %v2596_v4  ;;  %v485_v0 = vadd.f32 0.5, %v5190_v40 }
 0x1e9   : > { %3917 = vmatmul.msk.bf16.gmra.mxu0 %vm376_vm1, %v3159_v38  ;;  %3867 = vmatmul.msk.bf16.gmra.mxu1 %vm376_vm1, %v3159_v38  ;;  %v1784_v24 = vmul.f32 %v1749_v49, %v5156_v23  ;;  %v5167_v48 = vadd.f32 %v2286_v51, %v2101_v37  ;;  %v929_v38 = vsel %vm897_vm4, 1.0, %v6108_v56  ;;  %v579_v37 = vmul.f32 16.0, %v547_v34 }
 0x1ea   : > { %v1755_v49 = vmul.f32 %v6210_v39, %v5183_v32  ;;  %v1247_v44 = vmul.f32 %v1215_v19, %v929_v38  ;;  %v2516_v18 = vmul.f32 %v5146_v7, %v6213_v35  ;;  %v6216_v7 = vld [vmem:[#allocation15_spill] sm:$0xff] }
 0x1eb   : > { %6208 = vst [vmem:[#allocation116_spill] sm:$0xff] %v5167_v48  ;;  %v1816_v2 = vmul.f32 %v1784_v24, %v5092_v43  ;;  %v611_v62 = vsub.f32 %v5138_v61, %v579_v37 }
 0x1ec   : > { %v1787_v39 = vmul.f32 %v1755_v49, %v929_v38 }
 0x1ed   : > { %v1848_v43 = vadd.f32 %v1816_v2, %v5115_v29  ;;  %v1277_v29 = vmul.f32 %v1245_v59, %v959_v6  ;;  %v3137_v2 = vld [vmem:[#allocation2 + $0xb1] sm:$0xff]  ;;  %vm771_vm6 = vcmp.gt.f32.partialorder %v611_v62, 0.5  ;;  %vm835_vm8 = vcmp.lt.f32.partialorder %v611_v62, 14.5 }
 0x1ee   : > { %v2291_v51 = vpop.f32.mrf.mxu0  ;;  %v5176_v55 = vpop.f32.mrf.mxu1  ;;  %v3160_v48 = vpack.c.bf16 %v3137_v2, %v3136_v1  ;;  %v5226_v2 = vsel %vm771_vm6, 1.0, %v6108_v56 }
 0x1ef   : > { %v2102_v53 = vadd.f32 %v2070_v42, %v1848_v43  ;;  %v2037_v24 = vpop.f32.mrf.mxu3  ;;  %v707_v42 = vmul.f32 256.0, %v675_v12  ;;  %v1501_v43 = vmul.f32 %v6211_v46, %v929_v38  ;;  %v1563_v34 = vadd.f32 %v1531_v21, %v1277_v29 }
 0x1f0   : > { %v1751_v15 = vpop.f32.mrf.mxu2  ;;  %v2071_v4 = vmul.f32 %v2037_v24, %v5164_v47  ;;  %v2041_v29 = vmul.f32 %v6216_v7, %v5179_v25  ;;  %v3139_v7 = vld [vmem:[#allocation2 + $0xc1] sm:$0xff] }
 0x1f1   : > { %v1785_v52 = vmul.f32 %v1751_v15, %v5187_v26  ;;  %v5198_v23 = vadd.f32 %v2289_v3, %v2102_v53  ;;  %v6212_v3 = vld [vmem:[#allocation12_spill] sm:$0xff]  ;;  %v5210_v12 = vsub.f32 %v5138_v61, %v707_v42  ;;  %v6214_v61 = vld [vmem:[#allocation14_spill] sm:$0xff] }
 0x1f2   : > { %vm960_vm5 = vcmp.lt.f32.partialorder %v6212_v3, 239.5  ;;  %v2885_v3 = vld [vmem:[#allocation2 + $0xc0] sm:$0xff] }
 0x1f3   : > { %v1817_v59 = vmul.f32 %v1785_v52, %v959_v6  ;;  %3901 = vmatmul.msk.bf16.gmra.mxu3 %vm376_vm1, %v2906_v10  ;;  %v1533_v52 = vadd.f32 %v1501_v43, %v1247_v44  ;;  %v517_v6 = vmul.f32 0.0625, %v485_v0  ;;  %v992_v53 = vsel %vm960_vm5, 1.0, %v6108_v56 }
 0x1f4   : > { %vm899_vm7 = vcmp.gt.f32.partialorder %v5210_v12, 15.5  ;;  %v645_v10 = vmul.f32 0.00390625, %v485_v0  ;;  %v5232_v43 = vsel %vm835_vm8, 1.0, %v6108_v56  ;;  %v2517_v0 = vmul.f32 %v5176_v55, %v5183_v32 }
 0x1f5   : > { %v1849_v15 = vadd.f32 %v1817_v59, %v1563_v34  ;;  %3884 = vmatmul.msk.bf16.gmra.mxu2 %vm376_vm1, %v2620_v58  ;;  %v1819_v38 = vadd.f32 %v1787_v39, %v1533_v52  ;;  %v549_v49 = vfloor.f32 %v517_v6  ;;  %v2598_v59 = vld [vmem:[#allocation2 + $0xb7] sm:$0xff]  ;;  %v931_v39 = vsel %vm899_vm7, 1.0, %v6108_v56  ;;  %v6217_v52 = vld [vmem:[#allocation6_spill] sm:$0xff] }
 0x1f6   : > { %v3230_v60 = vpop.f32.mrf.mxu0  ;;  %v5202_v16 = vpop.f32.mrf.mxu1  ;;  %v1217_v6 = vmul.f32 %v6217_v52, %v5226_v2  ;;  %vm963_vm15 = vcmp.lt.f32.partialorder %v5210_v12, 239.5  ;;  %v6227_v12 = vld [vmem:[#allocation18_spill] sm:$0xff] }
 0x1f7   : > { %v2103_v41 = vadd.f32 %v2071_v4, %v1849_v15  ;;  %v2976_v58 = vpop.f32.mrf.mxu3  ;;  %v3310_v19 = vmul.f32 %v3230_v60, %v6213_v35  ;;  %v423_v60 = vadd.s32 56, %v4297_v14  ;;  %v2599_v15 = vld [vmem:[#allocation2 + $0xbf] sm:$0xff]  ;;  %vm964_vm0 = vcmp.lt.f32.partialorder %v6227_v12, 239.5 }
 0x1f8   : > { %v2690_v21 = vpop.f32.mrf.mxu2  ;;  %v3056_v1 = vmul.f32 %v2976_v58, %v992_v53  ;;  %v2884_v4 = vld [vmem:[#allocation2 + $0xb8] sm:$0xff]  ;;  %v6219_v58 = vld [vmem:[#allocation11_spill] sm:$0xff] }
 0x1f9   : > { %3918 = vmatmul.msk.bf16.gmra.mxu0 %vm376_vm1, %v3160_v48  ;;  %3868 = vmatmul.msk.bf16.gmra.mxu1 %vm376_vm1, %v3160_v48  ;;  %v2770_v37 = vmul.f32 %v2690_v21, %v6214_v61  ;;  %v5219_v44 = vadd.f32 %v2291_v51, %v2103_v41  ;;  %v2548_v48 = vadd.f32 %v2516_v18, %v4421_v27  ;;  %v425_v27 = vadd.s32 72, %v4297_v14 }
 0x1fa   : > { %v2073_v51 = vadd.f32 %v2041_v29, %v1819_v38  ;;  %v3342_v62 = vmul.f32 %v3310_v19, %v992_v53  ;;  %v581_v41 = vmul.f32 16.0, %v549_v49  ;;  %v677_v18 = vfloor.f32 %v645_v10 }
 0x1fb   : > { %6215 = vst [vmem:[#allocation4_spill] sm:$0xff] %v5219_v44  ;;  %v2802_v24 = vmul.f32 %v2770_v37, %v992_v53  ;;  %v5244_v38 = vcvt.s32.f32 %v423_v60  ;;  %v6218_v53 = vld [vmem:[#allocation21_spill] sm:$0xff]  ;;  %v993_v60 = vsel %vm961_vm9, 1.0, %v6108_v56 }
 0x1fc   : > { %v1757_v21 = vmul.f32 %v6218_v53, %v5232_v43  ;;  %v2295_v19 = vadd.f32 %v6219_v58, %v2073_v51  ;;  %v3138_v37 = vld [vmem:[#allocation2 + $0xb9] sm:$0xff]  ;;  %v709_v53 = vmul.f32 256.0, %v677_v18  ;;  %v2518_v18 = vmul.f32 %v5202_v16, %v4400_v5 }
 0x1fd   : > { %v2834_v34 = vadd.f32 %v2802_v24, %v2548_v48  ;;  %v2621_v48 = vpack.c.bf16 %v2599_v15, %v2598_v59  ;;  %v2907_v24 = vpack.c.bf16 %v2885_v3, %v2884_v4  ;;  %v3161_v59 = vpack.c.bf16 %v3139_v7, %v3138_v37  ;;  %v6221_v58 = vld [vmem:[#allocation16_spill] sm:$0xff] }
 0x1fe   : > { %v3232_v42 = vpop.f32.mrf.mxu0  ;;  %v5229_v46 = vpop.f32.mrf.mxu1  ;;  %v2549_v10 = vadd.f32 %v2517_v0, %v2295_v19  ;;  %v1249_v15 = vmul.f32 %v1217_v6, %v931_v39  ;;  %v613_v4 = vsub.f32 %v5190_v40, %v581_v41  ;;  %v1789_v3 = vmul.f32 %v1757_v21, %v931_v39 }
 0x1ff   : > { %v3088_v35 = vadd.f32 %v3056_v1, %v2834_v34  ;;  %v2978_v61 = vpop.f32.mrf.mxu3  ;;  %v6220_v1 = vld [vmem:[#allocation17_spill] sm:$0xff]  ;;  %vm962_vm11 = vcmp.lt.f32.partialorder %v6221_v58, 239.5 }
 0x200   : > { %v2692_v55 = vpop.f32.mrf.mxu2  ;;  %v1503_v34 = vmul.f32 %v6220_v1, %v931_v39  ;;  %v3057_v20 = vmul.f32 %v2978_v61, %v993_v60  ;;  %vm773_vm12 = vcmp.gt.f32.partialorder %v613_v4, 0.5  ;;  %v994_v19 = vsel %vm962_vm11, 1.0, %v6108_v56 }
 0x201   : > { %v5249_v29 = vadd.f32 %v3342_v62, %v3088_v35  ;;  %v2771_v49 = vmul.f32 %v2692_v55, %v5179_v25  ;;  %v3311_v25 = vmul.f32 %v3232_v42, %v5183_v32  ;;  %v5272_v32 = vcvt.s32.f32 %v425_v27 }
 0x202   : > { %v487_v42 = vadd.f32 0.5, %v5244_v38  ;;  %v1535_v6 = vadd.f32 %v1503_v34, %v1249_v15  ;;  %v5281_v27 = vsub.f32 %v5190_v40, %v709_v53  ;;  %vm837_vm13 = vcmp.lt.f32.partialorder %v613_v4, 14.5  ;;  %v2601_v53 = vld [vmem:[#allocation2 + $0xcf] sm:$0xff] }
 0x203   : > { %v3612_v51 = vpack.c.bf16 %v5249_v29, %v5249_v29  ;;  %v2803_v62 = vmul.f32 %v2771_v49, %v993_v60  ;;  %3902 = vmatmul.msk.bf16.gmra.mxu3 %vm376_vm1, %v2907_v24  ;;  %v3343_v39 = vmul.f32 %v3311_v25, %v993_v60  ;;  %v5288_v16 = vadd.f32 0.5, %v5272_v32  ;;  %v6222_v24 = vld [vmem:[#allocation23_spill] sm:$0xff] }
 0x204   : > { %v1821_v21 = vadd.f32 %v1789_v3, %v1535_v6  ;;  %v2043_v1 = vmul.f32 %v6222_v24, %v5226_v2  ;;  %v2550_v40 = vadd.f32 %v2518_v18, %v4434_v50  ;;  %vm901_vm14 = vcmp.gt.f32.partialorder %v5281_v27, 15.5  ;;  %v2600_v3 = vld [vmem:[#allocation2 + $0xc7] sm:$0xff] }
 0x205   : > { %3645 = vst.msk [vmem:[%s5256_s6] sm:$0xf] %vm3644_vm10, %v3612_v51  ;;  %v2835_v0 = vadd.f32 %v2803_v62, %v2549_v10  ;;  %3885 = vmatmul.msk.bf16.gmra.mxu2 %vm376_vm1, %v2621_v48  ;;  %v519_v48 = vmul.f32 0.0625, %v487_v42  ;;  %v2519_v4 = vmul.f32 %v5229_v46, %v5232_v43  ;;  %v521_v58 = vmul.f32 0.0625, %v5288_v16 }
 0x206   : > { %v3235_v52 = vpop.f32.mrf.mxu0  ;;  %v5265_v35 = vpop.f32.mrf.mxu1  ;;  %v2075_v51 = vadd.f32 %v2043_v1, %v1821_v21  ;;  %v6224_v21 = vld [vmem:[#allocation29_spill] sm:$0xff]  ;;  %vm965_vm5 = vcmp.lt.f32.partialorder %v5281_v27, 239.5 }
 0x207   : > { %v3089_v41 = vadd.f32 %v3057_v20, %v2835_v0  ;;  %v2981_v61 = vpop.f32.mrf.mxu3  ;;  %v3312_v7 = vmul.f32 %v3235_v52, %v4400_v5  ;;  %v5297_v5 = vsel %vm773_vm12, 1.0, %v6108_v56  ;;  %v551_v52 = vfloor.f32 %v519_v48  ;;  %v2886_v0 = vld [vmem:[#allocation2 + $0xc8] sm:$0xff]  ;;  %v2887_v20 = vld [vmem:[#allocation2 + $0xd0] sm:$0xff] }
 0x208   : > { %v2695_v55 = vpop.f32.mrf.mxu2  ;;  %v3058_v60 = vmul.f32 %v2981_v61, %v994_v19  ;;  %v3141_v48 = vld [vmem:[#allocation2 + $0xd1] sm:$0xff] }
 0x209   : > { %3919 = vmatmul.msk.bf16.gmra.mxu0 %vm376_vm1, %v3161_v59  ;;  %3869 = vmatmul.msk.bf16.gmra.mxu1 %vm376_vm1, %v3161_v59  ;;  %v5283_v37 = vadd.f32 %v3343_v39, %v3089_v41  ;;  %v2772_v49 = vmul.f32 %v2695_v55, %v4359_v33  ;;  %v647_v33 = vmul.f32 0.00390625, %v487_v42  ;;  %v5303_v59 = vsel %vm837_vm13, 1.0, %v6108_v56  ;;  %v6223_v42 = vld [vmem:[#allocation8_spill] sm:$0xff] }
 0x20a   : > { %v3344_v15 = vmul.f32 %v3312_v7, %v994_v19  ;;  %v1219_v6 = vmul.f32 %v6223_v42, %v5297_v5  ;;  %v933_v41 = vsel %vm901_vm14, 1.0, %v6108_v56  ;;  %v6225_v55 = vld [vmem:[#allocation20_spill] sm:$0xff]  ;;  %v995_v42 = vsel %vm963_vm15, 1.0, %v6108_v56 }
 0x20b   : > { %v3613_v34 = vpack.c.bf16 %v5283_v37, %v5283_v37  ;;  %v2804_v10 = vmul.f32 %v2772_v49, %v994_v19  ;;  %v679_v18 = vfloor.f32 %v647_v33  ;;  %v1759_v19 = vmul.f32 %v6224_v21, %v5303_v59  ;;  %v3140_v49 = vld [vmem:[#allocation2 + $0xc9] sm:$0xff] }
 0x20c   : > { %v2297_v61 = vadd.f32 %v6225_v55, %v2075_v51  ;;  %v553_v55 = vfloor.f32 %v521_v58 }
 0x20d   : > { %3646 = vst.msk [vmem:[%s5256_s6 + $0x4] sm:$0xf] %vm3644_vm10, %v3613_v34  ;;  %v2836_v50 = vadd.f32 %v2804_v10, %v2550_v40  ;;  %v2622_v34 = vpack.c.bf16 %v2601_v53, %v2600_v3  ;;  %v2908_v40 = vpack.c.bf16 %v2887_v20, %v2886_v0  ;;  %v583_v10 = vmul.f32 16.0, %v551_v52 }
 0x20e   : > { %v3237_v25 = vpop.f32.mrf.mxu0  ;;  %v5299_v62 = vpop.f32.mrf.mxu1  ;;  %v2551_v33 = vadd.f32 %v2519_v4, %v2297_v61  ;;  %v711_v3 = vmul.f32 256.0, %v679_v18  ;;  %v1791_v53 = vmul.f32 %v1759_v19, %v933_v41  ;;  %v6228_v18 = vld [vmem:[#allocation25_spill] sm:$0xff]  ;;  %v585_v19 = vmul.f32 16.0, %v553_v55 }
 0x20f   : > { %v3090_v39 = vadd.f32 %v3058_v60, %v2836_v50  ;;  %v2983_v7 = vpop.f32.mrf.mxu3  ;;  %v6226_v60 = vld [vmem:[#allocation26_spill] sm:$0xff]  ;;  %v3313_v21 = vmul.f32 %v3237_v25, %v5232_v43  ;;  %v615_v43 = vsub.f32 %v5244_v38, %v583_v10  ;;  %v2521_v12 = vmul.f32 %v5299_v62, %v5303_v59 }
 0x210   : > { %v2697_v46 = vpop.f32.mrf.mxu2  ;;  %v1505_v50 = vmul.f32 %v6226_v60, %v933_v41  ;;  %v3059_v20 = vmul.f32 %v2983_v7, %v995_v42  ;;  %v5340_v61 = vsub.f32 %v5244_v38, %v711_v3  ;;  %v996_v7 = vsel %vm964_vm0, 1.0, %v6108_v56  ;;  %v6230_v38 = vld [vmem:[#allocation30_spill] sm:$0xff] }
 0x211   : > { %v5317_v24 = vadd.f32 %v3344_v15, %v3090_v39  ;;  %v2773_v1 = vmul.f32 %v2697_v46, %v5226_v2  ;;  %v3162_v39 = vpack.c.bf16 %v3141_v48, %v3140_v49  ;;  %v1251_v2 = vmul.f32 %v1219_v6, %v933_v41 }
 0x212   : > { %v3345_v58 = vmul.f32 %v3313_v21, %v995_v42  ;;  %v2520_v41 = vmul.f32 %v5265_v35, %v6228_v18  ;;  %v6229_v35 = vld [vmem:[#allocation22_spill] sm:$0xff]  ;;  %v427_v60 = vadd.s32 88, %v4297_v14  ;;  %vm775_vm2 = vcmp.gt.f32.partialorder %v615_v43, 0.5 }
 0x213   : > { %v3614_v51 = vpack.c.bf16 %v5317_v24, %v5317_v24  ;;  %v2805_v15 = vmul.f32 %v2773_v1, %v995_v42  ;;  %3903 = vmatmul.msk.bf16.gmra.mxu3 %vm376_vm1, %v2908_v40  ;;  %v1537_v25 = vadd.f32 %v1505_v50, %v1251_v2  ;;  %v649_v1 = vmul.f32 0.00390625, %v5288_v16  ;;  %v6231_v42 = vld [vmem:[#allocation31_spill] sm:$0xff] }
 0x214   : > { %v2045_v50 = vmul.f32 %v6230_v38, %v5297_v5  ;;  %vm839_vm3 = vcmp.lt.f32.partialorder %v615_v43, 14.5  ;;  %vm903_vm4 = vcmp.gt.f32.partialorder %v5340_v61, 15.5  ;;  %v5358_v2 = vsel %vm775_vm2, 1.0, %v6108_v56  ;;  %v2603_v43 = vld [vmem:[#allocation2 + $0xdf] sm:$0xff] }
 0x215   : > { %3647 = vst.msk [vmem:[%s5256_s6 + $0x8] sm:$0xf] %vm3644_vm10, %v3614_v51  ;;  %v2837_v4 = vadd.f32 %v2805_v15, %v2551_v33  ;;  %3886 = vmatmul.msk.bf16.gmra.mxu2 %vm376_vm1, %v2622_v34  ;;  %v1823_v46 = vadd.f32 %v1791_v53, %v1537_v25  ;;  %v2552_v51 = vadd.f32 %v2520_v41, %v6231_v42  ;;  %v5361_v3 = vsel %vm839_vm3, 1.0, %v6108_v56  ;;  %v2888_v25 = vld [vmem:[#allocation2 + $0xd8] sm:$0xff]  ;;  %v3143_v38 = vld [vmem:[#allocation2 + $0xe1] sm:$0xff] }
 0x216   : > { %v3240_v0 = vpop.f32.mrf.mxu0  ;;  %v5327_v52 = vpop.f32.mrf.mxu1  ;;  %vm967_vm11 = vcmp.lt.f32.partialorder %v5340_v61, 239.5 }
 0x217   : > { %v3091_v6 = vadd.f32 %v3059_v20, %v2837_v4  ;;  %v2986_v48 = vpop.f32.mrf.mxu3  ;;  %v3314_v40 = vmul.f32 %v3240_v0, %v6228_v18  ;;  %v2077_v15 = vadd.f32 %v2045_v50, %v1823_v46  ;;  %v2602_v4 = vld [vmem:[#allocation2 + $0xd7] sm:$0xff]  ;;  %v5365_v20 = vcvt.s32.f32 %v427_v60 }
 0x218   : > { %v2700_v49 = vpop.f32.mrf.mxu2  ;;  %v3060_v21 = vmul.f32 %v2986_v48, %v996_v7  ;;  %v681_v18 = vfloor.f32 %v649_v1  ;;  %v935_v46 = vsel %vm903_vm4, 1.0, %v6108_v56  ;;  %v6233_v48 = vld [vmem:[#allocation36_spill] sm:$0xff] }
 0x219   : > { %3920 = vmatmul.msk.bf16.gmra.mxu0 %vm376_vm1, %v3162_v39  ;;  %3870 = vmatmul.msk.bf16.gmra.mxu1 %vm376_vm1, %v3162_v39  ;;  %v5344_v34 = vadd.f32 %v3345_v58, %v3091_v6  ;;  %v2774_v10 = vmul.f32 %v2700_v49, %v6229_v35  ;;  %v3346_v53 = vmul.f32 %v3314_v40, %v996_v7  ;;  %v2889_v58 = vld [vmem:[#allocation2 + $0xe0] sm:$0xff]  ;;  %v6234_v40 = vld [vmem:[#allocation27_spill] sm:$0xff] }
 0x21a   : > { %v5370_v6 = vsub.f32 %v5272_v32, %v585_v19  ;;  %v1761_v62 = vmul.f32 %v6233_v48, %v5361_v3  ;;  %v2299_v35 = vadd.f32 %v6234_v40, %v2077_v15  ;;  %v3142_v19 = vld [vmem:[#allocation2 + $0xd9] sm:$0xff]  ;;  %v2909_v42 = vpack.c.bf16 %v2889_v58, %v2888_v25 }
 0x21b   : > { %v3615_v33 = vpack.c.bf16 %v5344_v34, %v5344_v34  ;;  %v2806_v16 = vmul.f32 %v2774_v10, %v996_v7  ;;  %v6232_v7 = vld [vmem:[#allocation9_spill] sm:$0xff]  ;;  %v997_v15 = vsel %vm965_vm5, 1.0, %v6108_v56  ;;  %v3163_v48 = vpack.c.bf16 %v3143_v38, %v3142_v19 }
 0x21c   : > { %v1221_v49 = vmul.f32 %v6232_v7, %v5358_v2  ;;  %vm777_vm7 = vcmp.gt.f32.partialorder %v5370_v6, 0.5  ;;  %vm841_vm8 = vcmp.lt.f32.partialorder %v5370_v6, 14.5 }
 0x21d   : > { %3648 = vst.msk [vmem:[%s5256_s6 + $0xc] sm:$0xf] %vm3644_vm10, %v3615_v33  ;;  %v2838_v0 = vadd.f32 %v2806_v16, %v2552_v51  ;;  %v2623_v33 = vpack.c.bf16 %v2603_v43, %v2602_v4  ;;  %v491_v51 = vadd.f32 0.5, %v5365_v20  ;;  %v6235_v16 = vld [vmem:[#allocation34_spill] sm:$0xff]  ;;  %v1793_v4 = vmul.f32 %v1761_v62, %v935_v46 }
 0x21e   : > { %v3242_v39 = vpop.f32.mrf.mxu0  ;;  %v5355_v55 = vpop.f32.mrf.mxu1  ;;  %v1253_v40 = vmul.f32 %v1221_v49, %v935_v46 }
 0x21f   : > { %v3092_v41 = vadd.f32 %v3060_v21, %v2838_v0  ;;  %v2988_v60 = vpop.f32.mrf.mxu3  ;;  %v1507_v21 = vmul.f32 %v6235_v16, %v935_v46  ;;  %v2553_v0 = vadd.f32 %v2521_v12, %v2299_v35  ;;  %v6236_v35 = vld [vmem:[#allocation24_spill] sm:$0xff]  ;;  %v523_v27 = vmul.f32 0.0625, %v491_v51 }
 0x220   : > { %v2702_v10 = vpop.f32.mrf.mxu2  ;;  %v3061_v58 = vmul.f32 %v2988_v60, %v997_v15  ;;  %vm966_vm6 = vcmp.lt.f32.partialorder %v6236_v35, 239.5  ;;  %v6237_v46 = vld [vmem:[#allocation32_spill] sm:$0xff] }
 0x221   : > { %v5381_v1 = vadd.f32 %v3346_v53, %v3092_v41  ;;  %v2775_v50 = vmul.f32 %v2702_v10, %v5297_v5  ;;  %v3315_v53 = vmul.f32 %v3242_v39, %v5303_v59  ;;  %v713_v5 = vmul.f32 256.0, %v681_v18 }
 0x222   : > { %v1539_v59 = vadd.f32 %v1507_v21, %v1253_v40  ;;  %v2522_v49 = vmul.f32 %v5327_v52, %v6237_v46  ;;  %v998_v60 = vsel %vm966_vm6, 1.0, %v6108_v56  ;;  %v5413_v52 = vsel %vm777_vm7, 1.0, %v6108_v56 }
 0x223   : > { %v3616_v7 = vpack.c.bf16 %v5381_v1, %v5381_v1  ;;  %v2807_v41 = vmul.f32 %v2775_v50, %v997_v15  ;;  %3904 = vmatmul.msk.bf16.gmra.mxu3 %vm376_vm1, %v2909_v42  ;;  %v3347_v39 = vmul.f32 %v3315_v53, %v997_v15  ;;  %v5405_v62 = vsub.f32 %v5272_v32, %v713_v5  ;;  %v6238_v42 = vld [vmem:[#allocation28_spill] sm:$0xff] }
 0x224   : > { %v1825_v10 = vadd.f32 %v1793_v4, %v1539_v59  ;;  %v555_v21 = vfloor.f32 %v523_v27  ;;  %v651_v5 = vmul.f32 0.00390625, %v491_v51  ;;  %v429_v40 = vadd.s32 104, %v4297_v14  ;;  %v2604_v27 = vld [vmem:[#allocation2 + $0xe7] sm:$0xff] }
 0x225   : > { %3649 = vst.msk [vmem:[%s5256_s6 + $0x10] sm:$0xf] %vm3644_vm10, %v3616_v7  ;;  %v2839_v12 = vadd.f32 %v2807_v41, %v2553_v0  ;;  %3887 = vmatmul.msk.bf16.gmra.mxu2 %vm376_vm1, %v2623_v33  ;;  %v6239_v0 = vld [vmem:[#allocation38_spill] sm:$0xff]  ;;  %v6240_v7 = vld [vmem:[#allocation39_spill] sm:$0xff]  ;;  %vm905_vm9 = vcmp.gt.f32.partialorder %v5405_v62, 15.5  ;;  %vm969_vm0 = vcmp.lt.f32.partialorder %v5405_v62, 239.5 }
 0x226   : > { %v3245_v43 = vpop.f32.mrf.mxu0  ;;  %v5392_v25 = vpop.f32.mrf.mxu1  ;;  %v2047_v32 = vmul.f32 %v6239_v0, %v5358_v2  ;;  %v2554_v53 = vadd.f32 %v2522_v49, %v6240_v7  ;;  %v587_v59 = vmul.f32 16.0, %v555_v21  ;;  %v2890_v51 = vld [vmem:[#allocation2 + $0xe8] sm:$0xff]  ;;  %v937_v14 = vsel %vm905_vm9, 1.0, %v6108_v56  ;;  %v6241_v49 = vld [vmem:[#allocation3_spill] sm:$0xff] }
 0x227   : > { %v3093_v18 = vadd.f32 %v3061_v58, %v2839_v12  ;;  %v2991_v38 = vpop.f32.mrf.mxu3  ;;  %v3316_v33 = vmul.f32 %v3245_v43, %v6237_v46  ;;  %v5426_v58 = vsel %vm841_vm8, 1.0, %v6108_v56  ;;  %v2891_v46 = vld [vmem:[#allocation2 + $0xf0] sm:$0xff] }
 0x228   : > { %v2705_v19 = vpop.f32.mrf.mxu2  ;;  %v2079_v4 = vadd.f32 %v2047_v32, %v1825_v10  ;;  %v1223_v10 = vmul.f32 %v6241_v49, %v5413_v52  ;;  %v3144_v32 = vld [vmem:[#allocation2 + $0xe9] sm:$0xff] }
 0x229   : > { %3921 = vmatmul.msk.bf16.gmra.mxu0 %vm376_vm1, %v3163_v48  ;;  %3871 = vmatmul.msk.bf16.gmra.mxu1 %vm376_vm1, %v3163_v48  ;;  %v5408_v50 = vadd.f32 %v3347_v39, %v3093_v18  ;;  %v2776_v16 = vmul.f32 %v2705_v19, %v6238_v42  ;;  %v3062_v48 = vmul.f32 %v2991_v38, %v998_v60  ;;  %v2605_v18 = vld [vmem:[#allocation2 + $0xef] sm:$0xff]  ;;  %v5438_v38 = vcvt.s32.f32 %v429_v40 }
 0x22a   : > { %v3348_v6 = vmul.f32 %v3316_v33, %v998_v60  ;;  %v2523_v39 = vmul.f32 %v5355_v55, %v5361_v3  ;;  %v6242_v33 = vld [vmem:[#allocation44_spill] sm:$0xff]  ;;  %v6243_v55 = vld [vmem:[#allocation37_spill] sm:$0xff]  ;;  %v6244_v40 = vld [vmem:[#allocation42_spill] sm:$0xff] }
 0x22b   : > { %v3617_v15 = vpack.c.bf16 %v5408_v50, %v5408_v50  ;;  %v2808_v41 = vmul.f32 %v2776_v16, %v998_v60  ;;  %v683_v60 = vfloor.f32 %v651_v5  ;;  %v1763_v42 = vmul.f32 %v6242_v33, %v5426_v58 }
 0x22c   : > { %v2301_v16 = vadd.f32 %v6243_v55, %v2079_v4  ;;  %v619_v5 = vsub.f32 %v5365_v20, %v587_v59  ;;  %v999_v4 = vsel %vm967_vm11, 1.0, %v6108_v56 }
 0x22d   : > { %3650 = vst.msk [vmem:[%s5256_s6 + $0x14] sm:$0xf] %vm3644_vm10, %v3617_v15  ;;  %v2840_v35 = vadd.f32 %v2808_v41, %v2554_v53  ;;  %v3145_v15 = vld [vmem:[#allocation2 + $0xf1] sm:$0xff]  ;;  %v2624_v41 = vpack.c.bf16 %v2605_v18, %v2604_v27  ;;  %v715_v27 = vmul.f32 256.0, %v683_v60  ;;  %v493_v18 = vadd.f32 0.5, %v5438_v38 }
 0x22e   : > { %v3247_v43 = vpop.f32.mrf.mxu0  ;;  %v5423_v12 = vpop.f32.mrf.mxu1  ;;  %v2555_v49 = vadd.f32 %v2523_v39, %v2301_v16  ;;  %v3164_v55 = vpack.c.bf16 %v3145_v15, %v3144_v32  ;;  %v6245_v16 = vld [vmem:[#allocation33_spill] sm:$0xff]  ;;  %vm779_vm13 = vcmp.gt.f32.partialorder %v619_v5, 0.5  ;;  %v6246_v60 = vld [vmem:[#allocation40_spill] sm:$0xff]  ;;  %vm843_vm14 = vcmp.lt.f32.partialorder %v619_v5, 14.5 }
 0x22f   : > { %v3094_v19 = vadd.f32 %v3062_v48, %v2840_v35  ;;  %v2993_v0 = vpop.f32.mrf.mxu3  ;;  %v2910_v48 = vpack.c.bf16 %v2891_v46, %v2890_v51  ;;  %v1509_v35 = vmul.f32 %v6244_v40, %v937_v14  ;;  %v1795_v51 = vmul.f32 %v1763_v42, %v937_v14  ;;  %v6247_v40 = vld [vmem:[#allocation35_spill] sm:$0xff] }
 0x230   : > { %v2707_v21 = vpop.f32.mrf.mxu2  ;;  %v3063_v61 = vmul.f32 %v2993_v0, %v999_v4  ;;  %vm968_vm12 = vcmp.lt.f32.partialorder %v6245_v16, 239.5  ;;  %v5467_v42 = vsub.f32 %v5365_v20, %v715_v27  ;;  %v653_v27 = vmul.f32 0.00390625, %v493_v18 }
 0x231   : > { %v5443_v7 = vadd.f32 %v3348_v6, %v3094_v19  ;;  %v2777_v53 = vmul.f32 %v2707_v21, %v5358_v2  ;;  %v3317_v6 = vmul.f32 %v3247_v43, %v5361_v3  ;;  %v1255_v2 = vmul.f32 %v1223_v10, %v937_v14 }
 0x232   : > { %v2524_v14 = vmul.f32 %v5392_v25, %v6246_v60  ;;  %v525_v21 = vmul.f32 0.0625, %v493_v18  ;;  %v1000_v32 = vsel %vm968_vm12, 1.0, %v6108_v56  ;;  %vm907_vm15 = vcmp.gt.f32.partialorder %v5467_v42, 15.5 }
 0x233   : > { %v3618_v33 = vpack.c.bf16 %v5443_v7, %v5443_v7  ;;  %v2809_v19 = vmul.f32 %v2777_v53, %v999_v4  ;;  %3905 = vmatmul.msk.bf16.gmra.mxu3 %vm376_vm1, %v2910_v48  ;;  %v1541_v3 = vadd.f32 %v1509_v35, %v1255_v2  ;;  %v3349_v43 = vmul.f32 %v3317_v6, %v999_v4 }
 0x234   : > { %v5475_v35 = vsel %vm779_vm13, 1.0, %v6108_v56  ;;  %v557_v2 = vfloor.f32 %v525_v21  ;;  %v939_v18 = vsel %vm907_vm15, 1.0, %v6108_v56  ;;  %v6250_v21 = vld [vmem:[#allocation5_spill] sm:$0xff]  ;;  %vm971_vm6 = vcmp.lt.f32.partialorder %v5467_v42, 239.5 }
 0x235   : > { %3651 = vst.msk [vmem:[%s5256_s6 + $0x18] sm:$0xf] %vm3644_vm10, %v3618_v33  ;;  %v2841_v39 = vadd.f32 %v2809_v19, %v2555_v49  ;;  %3888 = vmatmul.msk.bf16.gmra.mxu2 %vm376_vm1, %v2624_v41  ;;  %v1827_v0 = vadd.f32 %v1795_v51, %v1541_v3  ;;  %v6248_v49 = vld [vmem:[#allocation45_spill] sm:$0xff]  ;;  %v6249_v33 = vld [vmem:[#allocation46_spill] sm:$0xff]  ;;  %v2606_v3 = vld [vmem:[#allocation2 + $0xf7] sm:$0xff] }
 0x236   : > { %v3250_v59 = vpop.f32.mrf.mxu0  ;;  %v5455_v46 = vpop.f32.mrf.mxu1  ;;  %v2049_v20 = vmul.f32 %v6248_v49, %v5413_v52  ;;  %v2556_v6 = vadd.f32 %v2524_v14, %v6249_v33  ;;  %v2893_v14 = vld [vmem:[#allocation2 + $0x100] sm:$0xff] }
 0x237   : > { %v3095_v10 = vadd.f32 %v3063_v61, %v2841_v39  ;;  %v2996_v53 = vpop.f32.mrf.mxu3  ;;  %v3318_v48 = vmul.f32 %v3250_v59, %v6246_v60  ;;  %v5486_v61 = vsel %vm843_vm14, 1.0, %v6108_v56  ;;  %v2892_v60 = vld [vmem:[#allocation2 + $0xf8] sm:$0xff]  ;;  %v3147_v33 = vld [vmem:[#allocation2 + $0x101] sm:$0xff] }
 0x238   : > { %v2710_v15 = vpop.f32.mrf.mxu2  ;;  %v2081_v51 = vadd.f32 %v2049_v20, %v1827_v0  ;;  %v1225_v0 = vmul.f32 %v6250_v21, %v5475_v35 }
 0x239   : > { %3922 = vmatmul.msk.bf16.gmra.mxu0 %vm376_vm1, %v3164_v55  ;;  %3872 = vmatmul.msk.bf16.gmra.mxu1 %vm376_vm1, %v3164_v55  ;;  %v5470_v41 = vadd.f32 %v3349_v43, %v3095_v10  ;;  %v2778_v25 = vmul.f32 %v2710_v15, %v6247_v40  ;;  %v3064_v55 = vmul.f32 %v2996_v53, %v1000_v32  ;;  %v2607_v10 = vld [vmem:[#allocation2 + $0xff] sm:$0xff]  ;;  %v589_v53 = vmul.f32 16.0, %v557_v2 }
 0x23a   : > { %v3350_v5 = vmul.f32 %v3318_v48, %v1000_v32  ;;  %v2525_v43 = vmul.f32 %v5423_v12, %v5426_v58  ;;  %v685_v40 = vfloor.f32 %v653_v27  ;;  %v2625_v21 = vpack.c.bf16 %v2607_v10, %v2606_v3 }
 0x23b   : > { %v3619_v4 = vpack.c.bf16 %v5470_v41, %v5470_v41  ;;  %v2810_v19 = vmul.f32 %v2778_v25, %v1000_v32  ;;  %v6251_v32 = vld [vmem:[#allocation52_spill] sm:$0xff]  ;;  %v6252_v25 = vld [vmem:[#allocation47_spill] sm:$0xff]  ;;  %v1001_v27 = vsel %vm969_vm0, 1.0, %v6108_v56  ;;  %v1257_v47 = vmul.f32 %v1225_v0, %v939_v18 }
 0x23c   : > { %v1765_v48 = vmul.f32 %v6251_v32, %v5486_v61  ;;  %v2303_v49 = vadd.f32 %v6252_v25, %v2081_v51  ;;  %v717_v3 = vmul.f32 256.0, %v685_v40  ;;  %v6255_v0 = vld [vmem:[#allocation48_spill] sm:$0xff] }
 0x23d   : > { %3652 = vst.msk [vmem:[%s5256_s6 + $0x1c] sm:$0xf] %vm3644_vm10, %v3619_v4  ;;  %v2842_v16 = vadd.f32 %v2810_v19, %v2556_v6  ;;  %v3146_v4 = vld [vmem:[#allocation2 + $0xf9] sm:$0xff] }
 0x23e   : > { %v3252_v59 = vpop.f32.mrf.mxu0  ;;  %v5483_v39 = vpop.f32.mrf.mxu1  ;;  %v2557_v2 = vadd.f32 %v2525_v43, %v2303_v49  ;;  %v3165_v44 = vpack.c.bf16 %v3147_v33, %v3146_v4  ;;  %v6256_v33 = vld [vmem:[#allocation43_spill] sm:$0xff] }
 0x23f   : > { %v3096_v15 = vadd.f32 %v3064_v55, %v2842_v16  ;;  %v2998_v12 = vpop.f32.mrf.mxu3  ;;  %v2911_v55 = vpack.c.bf16 %v2893_v14, %v2892_v60  ;;  %v6253_v16 = vld [vmem:[#allocation50_spill] sm:$0xff]  ;;  %v3319_v51 = vmul.f32 %v3252_v59, %v5426_v58  ;;  %v6254_v60 = vld [vmem:[#allocation41_spill] sm:$0xff] }
 0x240   : > { %v2712_v20 = vpop.f32.mrf.mxu2  ;;  %v1511_v62 = vmul.f32 %v6253_v16, %v939_v18  ;;  %v3065_v10 = vmul.f32 %v2998_v12, %v1001_v27  ;;  %vm970_vm2 = vcmp.lt.f32.partialorder %v6254_v60, 239.5  ;;  %v5521_v12 = vsub.f32 %v5438_v38, %v717_v3  ;;  %v2895_v60 = vld [vmem:[#allocation2 + $0x110] sm:$0xff] }
 0x241   : > { %v5499_v6 = vadd.f32 %v3350_v5, %v3096_v15  ;;  %v2779_v19 = vmul.f32 %v2712_v20, %v5413_v52  ;;  %v621_v5 = vsub.f32 %v5438_v38, %v589_v53  ;;  %v1797_v15 = vmul.f32 %v1765_v48, %v939_v18 }
 0x242   : > { %v1543_v58 = vadd.f32 %v1511_v62, %v1257_v47  ;;  %v3351_v59 = vmul.f32 %v3319_v51, %v1001_v27  ;;  %v2526_v18 = vmul.f32 %v5455_v46, %v6255_v0  ;;  %v1002_v40 = vsel %vm970_vm2, 1.0, %v6108_v56 }
 0x243   : > { %v3620_v32 = vpack.c.bf16 %v5499_v6, %v5499_v6  ;;  %v2811_v25 = vmul.f32 %v2779_v19, %v1001_v27  ;;  %3906 = vmatmul.msk.bf16.gmra.mxu3 %vm376_vm1, %v2911_v55  ;;  %vm781_vm3 = vcmp.gt.f32.partialorder %v621_v5, 0.5  ;;  %v6257_v19 = vld [vmem:[#allocation53_spill] sm:$0xff]  ;;  %vm845_vm4 = vcmp.lt.f32.partialorder %v621_v5, 14.5  ;;  %v6258_v55 = vld [vmem:[#allocation54_spill] sm:$0xff] }
 0x244   : > { %v1829_v53 = vadd.f32 %v1797_v15, %v1543_v58  ;;  %v2558_v16 = vadd.f32 %v2526_v18, %v6258_v55  ;;  %v5533_v38 = vsel %vm781_vm3, 1.0, %v6108_v56  ;;  %vm909_vm5 = vcmp.gt.f32.partialorder %v5521_v12, 15.5  ;;  %v6260_v18 = vld [vmem:[#allocation60_spill] sm:$0xff] }
 0x245   : > { %3653 = vst.msk [vmem:[%s5256_s6 + $0x20] sm:$0xf] %vm3644_vm10, %v3620_v32  ;;  %v2843_v43 = vadd.f32 %v2811_v25, %v2557_v2  ;;  %3889 = vmatmul.msk.bf16.gmra.mxu2 %vm376_vm1, %v2625_v21  ;;  %v2051_v21 = vmul.f32 %v6257_v19, %v5475_v35  ;;  %v5539_v25 = vsel %vm845_vm4, 1.0, %v6108_v56  ;;  %v2527_v3 = vmul.f32 %v5483_v39, %v5486_v61  ;;  %v3149_v39 = vld [vmem:[#allocation2 + $0x111] sm:$0xff] }
 0x246   : > { %v3255_v52 = vpop.f32.mrf.mxu0  ;;  %v5508_v20 = vpop.f32.mrf.mxu1  ;;  %vm973_vm8 = vcmp.lt.f32.partialorder %v5521_v12, 239.5 }
 0x247   : > { %v3097_v14 = vadd.f32 %v3065_v10, %v2843_v43  ;;  %v3001_v49 = vpop.f32.mrf.mxu3  ;;  %v3320_v4 = vmul.f32 %v3255_v52, %v6255_v0  ;;  %v2083_v27 = vadd.f32 %v2051_v21, %v1829_v53  ;;  %v2608_v52 = vld [vmem:[#allocation2 + $0x107] sm:$0xff]  ;;  %v2609_v43 = vld [vmem:[#allocation2 + $0x10f] sm:$0xff]  ;;  %v1767_v53 = vmul.f32 %v6260_v18, %v5539_v25 }
 0x248   : > { %v2715_v48 = vpop.f32.mrf.mxu2  ;;  %v3066_v2 = vmul.f32 %v3001_v49, %v1002_v40  ;;  %v2894_v10 = vld [vmem:[#allocation2 + $0x108] sm:$0xff]  ;;  %v2626_v42 = vpack.c.bf16 %v2609_v43, %v2608_v52  ;;  %v6263_v43 = vld [vmem:[#allocation49_spill] sm:$0xff] }
 0x249   : > { %3923 = vmatmul.msk.bf16.gmra.mxu0 %vm376_vm1, %v3165_v44  ;;  %3873 = vmatmul.msk.bf16.gmra.mxu1 %vm376_vm1, %v3165_v44  ;;  %v5523_v47 = vadd.f32 %v3351_v59, %v3097_v14  ;;  %v2780_v46 = vmul.f32 %v2715_v48, %v6256_v33  ;;  %v3352_v5 = vmul.f32 %v3320_v4, %v1002_v40  ;;  %v941_v59 = vsel %vm909_vm5, 1.0, %v6108_v56  ;;  %v6259_v14 = vld [vmem:[#allocation7_spill] sm:$0xff] }
 0x24a   : > { %v1227_v0 = vmul.f32 %v6259_v14, %v5533_v38  ;;  %v3148_v33 = vld [vmem:[#allocation2 + $0x109] sm:$0xff]  ;;  %v2912_v21 = vpack.c.bf16 %v2895_v60, %v2894_v10  ;;  %vm972_vm7 = vcmp.lt.f32.partialorder %v6263_v43, 239.5 }
 0x24b   : > { %v3621_v44 = vpack.c.bf16 %v5523_v47, %v5523_v47  ;;  %v2812_v62 = vmul.f32 %v2780_v46, %v1002_v40  ;;  %v6261_v40 = vld [vmem:[#allocation56_spill] sm:$0xff]  ;;  %v3166_v14 = vpack.c.bf16 %v3149_v39, %v3148_v33  ;;  %v6265_v33 = vld [vmem:[#allocation51_spill] sm:$0xff] }
 0x24c   : > { %v2305_v48 = vadd.f32 %v6261_v40, %v2083_v27  ;;  %v1259_v18 = vmul.f32 %v1227_v0, %v941_v59  ;;  %v1799_v40 = vmul.f32 %v1767_v53, %v941_v59  ;;  %v1004_v0 = vsel %vm972_vm7, 1.0, %v6108_v56 }
 0x24d   : > { %3654 = vst.msk [vmem:[%s5256_s6 + $0x24] sm:$0xf] %vm3644_vm10, %v3621_v44  ;;  %v2844_v15 = vadd.f32 %v2812_v62, %v2558_v16  ;;  %v6262_v44 = vld [vmem:[#allocation58_spill] sm:$0xff]  ;;  %v1003_v62 = vsel %vm971_vm6, 1.0, %v6108_v56 }
 0x24e   : > { %v3257_v32 = vpop.f32.mrf.mxu0  ;;  %v5535_v51 = vpop.f32.mrf.mxu1  ;;  %v1513_v55 = vmul.f32 %v6262_v44, %v941_v59  ;;  %v2559_v16 = vadd.f32 %v2527_v3, %v2305_v48 }
 0x24f   : > { %v3098_v58 = vadd.f32 %v3066_v2, %v2844_v15  ;;  %v3003_v4 = vpop.f32.mrf.mxu3  ;;  %v3321_v27 = vmul.f32 %v3257_v32, %v5486_v61  ;;  %v6264_v32 = vld [vmem:[#allocation55_spill] sm:$0xff] }
 0x250   : > { %v2717_v49 = vpop.f32.mrf.mxu2  ;;  %v3067_v52 = vmul.f32 %v3003_v4, %v1003_v62  ;;  %v1545_v3 = vadd.f32 %v1513_v55, %v1259_v18  ;;  %v2528_v60 = vmul.f32 %v5508_v20, %v6264_v32  ;;  %v2610_v18 = vld [vmem:[#allocation2 + $0x117] sm:$0xff] }
 0x251   : > { %v5552_v46 = vadd.f32 %v3352_v5, %v3098_v58  ;;  %v2781_v19 = vmul.f32 %v2717_v49, %v5475_v35  ;;  %v3353_v10 = vmul.f32 %v3321_v27, %v1003_v62 }
 0x252   : > { %v1831_v59 = vadd.f32 %v1799_v40, %v1545_v3  ;;  %v2529_v40 = vmul.f32 %v5535_v51, %v5539_v25  ;;  %v6268_v3 = vld [vmem:[#allocation67_spill] sm:$0xff] }
 0x253   : > { %v3622_v2 = vpack.c.bf16 %v5552_v46, %v5552_v46  ;;  %v2813_v15 = vmul.f32 %v2781_v19, %v1003_v62  ;;  %3907 = vmatmul.msk.bf16.gmra.mxu3 %vm376_vm1, %v2912_v21  ;;  %v6266_v19 = vld [vmem:[#allocation64_spill] sm:$0xff]  ;;  %v6267_v21 = vld [vmem:[#allocation61_spill] sm:$0xff] }
 0x254   : > { %v2560_v44 = vadd.f32 %v2528_v60, %v6267_v21  ;;  %v3150_v60 = vld [vmem:[#allocation2 + $0x119] sm:$0xff] }
 0x255   : > { %3655 = vst.msk [vmem:[%s5256_s6 + $0x28] sm:$0xf] %vm3644_vm10, %v3622_v2  ;;  %v2845_v35 = vadd.f32 %v2813_v15, %v2559_v16  ;;  %3890 = vmatmul.msk.bf16.gmra.mxu2 %vm376_vm1, %v2626_v42  ;;  %v2053_v42 = vmul.f32 %v6266_v19, %v5533_v38 }
 0x256   : > { %v3260_v5 = vpop.f32.mrf.mxu0  ;;  %v5560_v58 = vpop.f32.mrf.mxu1 }
 0x257   : > { %v3099_v61 = vadd.f32 %v3067_v52, %v2845_v35  ;;  %v3006_v48 = vpop.f32.mrf.mxu3  ;;  %v3322_v4 = vmul.f32 %v3260_v5, %v6264_v32  ;;  %v2085_v62 = vadd.f32 %v2053_v42, %v1831_v59  ;;  %v2611_v5 = vld [vmem:[#allocation2 + $0x11f] sm:$0xff] }
 0x258   : > { %v2720_v53 = vpop.f32.mrf.mxu2  ;;  %v3068_v16 = vmul.f32 %v3006_v48, %v1004_v0  ;;  %v2896_v35 = vld [vmem:[#allocation2 + $0x118] sm:$0xff]  ;;  %v2897_v52 = vld [vmem:[#allocation2 + $0x120] sm:$0xff]  ;;  %v2627_v48 = vpack.c.bf16 %v2611_v5, %v2610_v18 }
 0x259   : > { %3924 = vmatmul.msk.bf16.gmra.mxu0 %vm376_vm1, %v3166_v14  ;;  %3874 = vmatmul.msk.bf16.gmra.mxu1 %vm376_vm1, %v3166_v14  ;;  %v5572_v49 = vadd.f32 %v3353_v10, %v3099_v61  ;;  %v2782_v39 = vmul.f32 %v2720_v53, %v6265_v33  ;;  %v3354_v15 = vmul.f32 %v3322_v4, %v1004_v0  ;;  %v3151_v59 = vld [vmem:[#allocation2 + $0x121] sm:$0xff]  ;;  %v1005_v33 = vsel %vm973_vm8, 1.0, %v6108_v56 }
 0x25a   : > { %v2307_v10 = vadd.f32 %v6268_v3, %v2085_v62  ;;  %v2913_v4 = vpack.c.bf16 %v2897_v52, %v2896_v35  ;;  %v3167_v42 = vpack.c.bf16 %v3151_v59, %v3150_v60  ;;  %v6271_v35 = vld [vmem:[#allocation59_spill] sm:$0xff]  ;;  %v6272_v3 = vld [vmem:[#allocation70_spill] sm:$0xff] }
 0x25b   : > { %v3623_v20 = vpack.c.bf16 %v5572_v49, %v5572_v49  ;;  %v2814_v55 = vmul.f32 %v2782_v39, %v1004_v0 }
 0x25c   : > { %v2561_v51 = vadd.f32 %v2529_v40, %v2307_v10 }
 0x25d   : > { %3656 = vst.msk [vmem:[%s5256_s6 + $0x2c] sm:$0xf] %vm3644_vm10, %v3623_v20  ;;  %v2846_v14 = vadd.f32 %v2814_v55, %v2560_v44 }
 0x25e   : > { %v3262_v2 = vpop.f32.mrf.mxu0  ;;  %v2473_v27 = vpop.f32.mrf.mxu1 }
 0x25f   : > { %v3100_v43 = vadd.f32 %v3068_v16, %v2846_v14  ;;  %v3008_v32 = vpop.f32.mrf.mxu3  ;;  %v3323_v12 = vmul.f32 %v3262_v2, %v5539_v25  ;;  %v6269_v16 = vld [vmem:[#allocation57_spill] sm:$0xff] }
 0x260   : > { %v2722_v61 = vpop.f32.mrf.mxu2  ;;  %v3069_v55 = vmul.f32 %v3008_v32, %v1005_v33  ;;  %vm974_vm9 = vcmp.lt.f32.partialorder %v6269_v16, 239.5  ;;  %v6276_v16 = vld [vmem:[#allocation72_spill] sm:$0xff] }
 0x261   : > { %v5587_v53 = vadd.f32 %v3354_v15, %v3100_v43  ;;  %v2783_v0 = vmul.f32 %v2722_v61, %v5533_v38  ;;  %v3355_v38 = vmul.f32 %v3323_v12, %v1005_v33  ;;  %v6270_v15 = vld [vmem:[#allocation63_spill] sm:$0xff]  ;;  %v1006_v2 = vsel %vm974_vm9, 1.0, %v6108_v56 }
 0x262   : > { %v2530_v25 = vmul.f32 %v5560_v58, %v6270_v15 }
 0x263   : > { %v3624_v39 = vpack.c.bf16 %v5587_v53, %v5587_v53  ;;  %v2815_v19 = vmul.f32 %v2783_v0, %v1005_v33  ;;  %3908 = vmatmul.msk.bf16.gmra.mxu3 %vm376_vm1, %v2913_v4  ;;  %v6273_v4 = vld [vmem:[#allocation69_spill] sm:$0xff]  ;;  %v6274_v33 = vld [vmem:[#allocation66_spill] sm:$0xff] }
 0x264   : > { %v2562_v10 = vadd.f32 %v2530_v25, %v6272_v3  ;;  %vm975_vm11 = vcmp.lt.f32.partialorder %v6274_v33, 239.5 }
 0x265   : > { %3657 = vst.msk [vmem:[%s5256_s6 + $0x30] sm:$0xf] %vm3644_vm10, %v3624_v39  ;;  %v2847_v44 = vadd.f32 %v2815_v19, %v2561_v51  ;;  %3891 = vmatmul.msk.bf16.gmra.mxu2 %vm376_vm1, %v2627_v48  ;;  %v2531_v51 = vmul.f32 %v2473_v27, %v6273_v4 }
 0x266   : > { %v3265_v20 = vpop.f32.mrf.mxu0  ;;  %v2476_v21 = vpop.f32.mrf.mxu1 }
 0x267   : > { %v3101_v62 = vadd.f32 %v3069_v55, %v2847_v44  ;;  %v3011_v18 = vpop.f32.mrf.mxu3  ;;  %v3324_v5 = vmul.f32 %v3265_v20, %v6270_v15  ;;  %v1007_v44 = vsel %vm975_vm11, 1.0, %v6108_v56 }
 0x268   : > { %v2725_v14 = vpop.f32.mrf.mxu2  ;;  %v3070_v32 = vmul.f32 %v3011_v18, %v1006_v2  ;;  %v6277_v18 = vld [vmem:[#allocation62_spill] sm:$0xff] }
 0x269   : > { %3925 = vmatmul.msk.bf16.gmra.mxu0 %vm376_vm1, %v3167_v42  ;;  %v5603_v40 = vadd.f32 %v3355_v38, %v3101_v62  ;;  %v2784_v52 = vmul.f32 %v2725_v14, %v6271_v35  ;;  %v3356_v59 = vmul.f32 %v3324_v5, %v1006_v2  ;;  %v6275_v42 = vld [vmem:[#allocation68_spill] sm:$0xff]  ;;  %v2563_v38 = vadd.f32 %v2531_v51, %v6276_v16 }
 0x26a   : > { %vm976_vm12 = vcmp.lt.f32.partialorder %v6277_v18, 239.5 }
 0x26b   : > { %v3625_v43 = vpack.c.bf16 %v5603_v40, %v5603_v40  ;;  %v2816_v61 = vmul.f32 %v2784_v52, %v1006_v2  ;;  %v6278_v52 = vld [vmem:[#allocation75_spill] sm:$0xff]  ;;  %v1008_v3 = vsel %vm976_vm12, 1.0, %v6108_v56 }
 0x26d   : > { %3658 = vst.msk [vmem:[%s5256_s6 + $0x34] sm:$0xf] %vm3644_vm10, %v3625_v43  ;;  %v2848_v0 = vadd.f32 %v2816_v61, %v2562_v10  ;;  %v2532_v43 = vmul.f32 %v2476_v21, %v6278_v52 }
 0x26e   : > { %v3267_v58 = vpop.f32.mrf.mxu0  ;;  %v2478_v60 = vpop.f32.mrf.mxu1 }
 0x26f   : > { %v3102_v48 = vadd.f32 %v3070_v32, %v2848_v0  ;;  %v3013_v12 = vpop.f32.mrf.mxu3  ;;  %v3325_v62 = vmul.f32 %v3267_v58, %v6273_v4  ;;  %v2564_v4 = vadd.f32 %v2532_v43, %v4746_v36 }
 0x270   : > { %v2727_v39 = vpop.f32.mrf.mxu2  ;;  %v3071_v14 = vmul.f32 %v3013_v12, %v1007_v44 }
 0x271   : > { %v5614_v19 = vadd.f32 %v3356_v59, %v3102_v48  ;;  %v2785_v20 = vmul.f32 %v2727_v39, %v6275_v42  ;;  %v3357_v5 = vmul.f32 %v3325_v62, %v1007_v44  ;;  %v6279_v59 = vld [vmem:[#allocation65_spill] sm:$0xff] }
 0x273   : > { %v3626_v55 = vpack.c.bf16 %v5614_v19, %v5614_v19  ;;  %v2817_v15 = vmul.f32 %v2785_v20, %v1007_v44  ;;  %v2533_v44 = vmul.f32 %v2478_v60, %v4736_v22 }
 0x275   : > { %3659 = vst.msk [vmem:[%s5256_s6 + $0x38] sm:$0xf] %vm3644_vm10, %v3626_v55  ;;  %v2849_v2 = vadd.f32 %v2817_v15, %v2563_v38  ;;  %v6280_v55 = vld [vmem:[#allocation74_spill] sm:$0xff] }
 0x276   : > { %v3270_v25 = vpop.f32.mrf.mxu0  ;;  %v2481_v27 = vpop.f32.mrf.mxu1  ;;  %vm977_vm13 = vcmp.lt.f32.partialorder %v6280_v55, 239.5 }
 0x277   : > { %v3103_v35 = vadd.f32 %v3071_v14, %v2849_v2  ;;  %v3016_v61 = vpop.f32.mrf.mxu3  ;;  %v3326_v58 = vmul.f32 %v3270_v25, %v6278_v52  ;;  %v1009_v15 = vsel %vm977_vm13, 1.0, %v6108_v56  ;;  %v6281_v2 = vld [vmem:[#allocation82_spill] sm:$0xff] }
 0x278   : > { %v2730_v10 = vpop.f32.mrf.mxu2  ;;  %v3072_v33 = vmul.f32 %v3016_v61, %v1008_v3  ;;  %v2565_v14 = vadd.f32 %v2533_v44, %v6281_v2  ;;  %v6283_v61 = vld [vmem:[#allocation79_spill] sm:$0xff]  ;;  %v6287_v2 = vld [vmem:[#allocation78_spill] sm:$0xff] }
 0x279   : > { %v5627_v32 = vadd.f32 %v3357_v5, %v3103_v35  ;;  %v2786_v0 = vmul.f32 %v2730_v10, %v6279_v59  ;;  %v3358_v21 = vmul.f32 %v3326_v58, %v1008_v3  ;;  %v2534_v58 = vmul.f32 %v2481_v27, %v6283_v61 }
 0x27a   : > { %vm979_vm15 = vcmp.lt.f32.partialorder %v6287_v2, 239.5 }
 0x27b   : > { %v3627_v48 = vpack.c.bf16 %v5627_v32, %v5627_v32  ;;  %v2818_v51 = vmul.f32 %v2786_v0, %v1008_v3  ;;  %v6282_v3 = vld [vmem:[#allocation71_spill] sm:$0xff] }
 0x27c   : > { %vm978_vm14 = vcmp.lt.f32.partialorder %v6282_v3, 239.5 }
 0x27d   : > { %3660 = vst.msk [vmem:[%s5256_s6 + $0x3c] sm:$0xf] %vm3644_vm10, %v3627_v48  ;;  %v2850_v42 = vadd.f32 %v2818_v51, %v2564_v4  ;;  %v1010_v59 = vsel %vm978_vm14, 1.0, %v6108_v56  ;;  %v6284_v51 = vld [vmem:[#allocation73_spill] sm:$0xff]  ;;  %vm3609_vm14 = vcmask 24576  }
 0x27e   : > { %v3272_v39 = vpop.f32.mrf.mxu0  ;;  %v2483_v12 = vpop.f32.mrf.mxu1 }
 0x27f   : > { %v3104_v20 = vadd.f32 %v3072_v33, %v2850_v42  ;;  %v3018_v38 = vpop.f32.mrf.mxu3  ;;  %v3327_v18 = vmul.f32 %v3272_v39, %v4736_v22 }
 0x280   : > { %v2732_v16 = vpop.f32.mrf.mxu2  ;;  %v3073_v43 = vmul.f32 %v3018_v38, %v1009_v15 }
 0x281   : > { %v5638_v62 = vadd.f32 %v3358_v21, %v3104_v20  ;;  %v2787_v36 = vmul.f32 %v2732_v16, %v4708_v63  ;;  %v3359_v63 = vmul.f32 %v3327_v18, %v1009_v15  ;;  %v6285_v21 = vld [vmem:[#allocation85_spill] sm:$0xff] }
 0x282   : > { %v2566_v42 = vadd.f32 %v2534_v58, %v6285_v21 }
 0x283   : > { %v3628_v25 = vpack.c.bf16 %v5638_v62, %v5638_v62  ;;  %v2819_v5 = vmul.f32 %v2787_v36, %v1009_v15  ;;  %v6286_v15 = vld [vmem:[#allocation84_spill] sm:$0xff] }
 0x285   : > { %3661 = vst.msk [vmem:[%s5256_s6 + $0x40] sm:$0xf] %vm3644_vm10, %v3628_v25  ;;  %v2851_v52 = vadd.f32 %v2819_v5, %v2565_v14  ;;  %v2535_v25 = vmul.f32 %v2483_v12, %v6286_v15 }
 0x286   : > { %v3275_v35 = vpop.f32.mrf.mxu0  ;;  %v2486_v60 = vpop.f32.mrf.mxu1 }
 0x287   : > { %v3105_v10 = vadd.f32 %v3073_v43, %v2851_v52  ;;  %v3021_v48 = vpop.f32.mrf.mxu3  ;;  %v3328_v22 = vmul.f32 %v3275_v35, %v6283_v61  ;;  %v6288_v35 = vld [vmem:[#allocation80_spill] sm:$0xff]  ;;  %v1011_v43 = vsel %vm979_vm15, 1.0, %v6108_v56 }
 0x288   : > { %v2735_v0 = vpop.f32.mrf.mxu2  ;;  %v3074_v44 = vmul.f32 %v3021_v48, %v1010_v59 }
 0x289   : > { %v5651_v4 = vadd.f32 %v3359_v63, %v3105_v10  ;;  %v2788_v33 = vmul.f32 %v2735_v0, %v6284_v51  ;;  %v3360_v27 = vmul.f32 %v3328_v22, %v1010_v59  ;;  %v6289_v63 = vld [vmem:[#allocation89_spill] sm:$0xff]  ;;  %v6290_v22 = vld [vmem:[#allocation76_spill] sm:$0xff] }
 0x28a   : > { %v2567_v10 = vadd.f32 %v2535_v25, %v6289_v63  ;;  %vm980_vm0 = vcmp.lt.f32.partialorder %v6290_v22, 239.5  ;;  %v6293_v63 = vld [vmem:[#allocation86_spill] sm:$0xff] }
 0x28b   : > { %v3629_v39 = vpack.c.bf16 %v5651_v4, %v5651_v4  ;;  %v2820_v20 = vmul.f32 %v2788_v33, %v1010_v59  ;;  %vm981_vm2 = vcmp.lt.f32.partialorder %v6293_v63, 239.5 }
 0x28d   : > { %3662 = vst.msk [vmem:[%s5256_s6 + $0x44] sm:$0xf] %vm3644_vm10, %v3629_v39  ;;  %v2852_v38 = vadd.f32 %v2820_v20, %v2566_v42  ;;  %v6291_v39 = vld [vmem:[#allocation87_spill] sm:$0xff]  ;;  %v1012_v42 = vsel %vm980_vm0, 1.0, %v6108_v56 }
 0x28e   : > { %v3277_v55 = vpop.f32.mrf.mxu0  ;;  %v2488_v16 = vpop.f32.mrf.mxu1  ;;  %v2536_v21 = vmul.f32 %v2486_v60, %v6291_v39 }
 0x28f   : > { %v3106_v36 = vadd.f32 %v3074_v44, %v2852_v38  ;;  %v3023_v18 = vpop.f32.mrf.mxu3  ;;  %v3329_v61 = vmul.f32 %v3277_v55, %v6286_v15  ;;  %v6292_v38 = vld [vmem:[#allocation77_spill] sm:$0xff] }
 0x290   : > { %v2737_v14 = vpop.f32.mrf.mxu2  ;;  %v3075_v48 = vmul.f32 %v3023_v18, %v1011_v43  ;;  %v2568_v25 = vadd.f32 %v2536_v21, %v4890_v57 }
 0x291   : > { %v5662_v5 = vadd.f32 %v3360_v27, %v3106_v36  ;;  %v2789_v52 = vmul.f32 %v2737_v14, %v6288_v35  ;;  %v3361_v51 = vmul.f32 %v3329_v61, %v1011_v43 }
 0x293   : > { %v3630_v3 = vpack.c.bf16 %v5662_v5, %v5662_v5  ;;  %v2821_v58 = vmul.f32 %v2789_v52, %v1011_v43 }
 0x295   : > { %3663 = vst.msk [vmem:[%s5256_s6 + $0x48] sm:$0xf] %vm3644_vm10, %v3630_v3  ;;  %v2853_v0 = vadd.f32 %v2821_v58, %v2567_v10  ;;  %v2537_v3 = vmul.f32 %v2488_v16, %v4878_v9  ;;  %v3407_v16 = vsel %vm376_vm1, %v5283_v37, 0.0 }
 0x296   : > { %v3280_v59 = vpop.f32.mrf.mxu0  ;;  %v2491_v12 = vpop.f32.mrf.mxu1 }
 0x297   : > { %v3107_v33 = vadd.f32 %v3075_v48, %v2853_v0  ;;  %v3026_v44 = vpop.f32.mrf.mxu3  ;;  %v3330_v55 = vmul.f32 %v3280_v59, %v6291_v39  ;;  %v1013_v59 = vsel %vm981_vm2, 1.0, %v6108_v56  ;;  %v2569_v48 = vadd.f32 %v2537_v3, %v4928_v31 }
 0x298   : > { %v2740_v20 = vpop.f32.mrf.mxu2  ;;  %v3076_v14 = vmul.f32 %v3026_v44, %v1012_v42  ;;  %v3409_v31 = vsel %vm376_vm1, %v5317_v24, 0.0  ;;  %v3413_v3 = vsel %vm376_vm1, %v5381_v1, 0.0 }
 0x299   : > { %v5675_v27 = vadd.f32 %v3361_v51, %v3107_v33  ;;  %v2790_v36 = vmul.f32 %v2740_v20, %v6292_v38  ;;  %v3362_v60 = vmul.f32 %v3330_v55, %v1012_v42  ;;  %v3406_v20 = vsel %vm376_vm1, %v5249_v29, 0.0 }
 0x29a   : > { %v2538_v55 = vmul.f32 %v2491_v12, %v4911_v8  ;;  %v3408_v38 = vadd.f32 %v3407_v16, %v3406_v20 }
 0x29b   : > { %v3631_v15 = vpack.c.bf16 %v5675_v27, %v5675_v27  ;;  %v2822_v2 = vmul.f32 %v2790_v36, %v1012_v42  ;;  %v6294_v42 = vld [vmem:[#allocation81_spill] sm:$0xff] }
 0x29c   : > { %vm982_vm3 = vcmp.lt.f32.partialorder %v6294_v42, 239.5  ;;  %v2570_v63 = vadd.f32 %v2538_v55, %v4964_v11 }
 0x29d   : > { %3664 = vst.msk [vmem:[%s5256_s6 + $0x4c] sm:$0xf] %vm3644_vm10, %v3631_v15  ;;  %v2854_v52 = vadd.f32 %v2822_v2, %v2568_v25  ;;  %v1014_v36 = vsel %vm982_vm3, 1.0, %v6108_v56  ;;  %v3411_v2 = vsel %vm376_vm1, %v5344_v34, 0.0 }
 0x29e   : > { %v3282_v18 = vpop.f32.mrf.mxu0  ;;  %v2493_v35 = vpop.f32.mrf.mxu1 }
 0x29f   : > { %v3108_v43 = vadd.f32 %v3076_v14, %v2854_v52  ;;  %v3028_v61 = vpop.f32.mrf.mxu3  ;;  %v3331_v22 = vmul.f32 %v3282_v18, %v4878_v9  ;;  %v2539_v16 = vmul.f32 %v2493_v35, %v4951_v28 }
 0x2a0   : > { %v2742_v10 = vpop.f32.mrf.mxu2  ;;  %v3077_v21 = vmul.f32 %v3028_v61, %v1013_v59 }
 0x2a1   : > { %v5686_v58 = vadd.f32 %v3362_v60, %v3108_v43  ;;  %v2791_v57 = vmul.f32 %v2742_v10, %v4852_v13  ;;  %v3363_v44 = vmul.f32 %v3331_v22, %v1013_v59  ;;  %v6295_v60 = vld [vmem:[#allocation83_spill] sm:$0xff]  ;;  %v3410_v43 = vadd.f32 %v3409_v31, %v3408_v38 }
 0x2a2   : > { %v3419_v31 = vsel %vm376_vm1, %v5470_v41, 0.0  ;;  %v3421_v38 = vsel %vm376_vm1, %v5499_v6, 0.0 }
 0x2a3   : > { %v3632_v0 = vpack.c.bf16 %v5686_v58, %v5686_v58  ;;  %v2823_v51 = vmul.f32 %v2791_v57, %v1013_v59  ;;  %v3412_v57 = vadd.f32 %v3411_v2, %v3410_v43  ;;  %v3423_v43 = vsel %vm376_vm1, %v5523_v47, 0.0 }
 0x2a5   : > { %3665 = vst.msk [vmem:[%s5256_s6 + $0x50] sm:$0xf] %vm3644_vm10, %v3632_v0  ;;  %v2855_v39 = vadd.f32 %v2823_v51, %v2569_v48  ;;  %v3415_v0 = vsel %vm376_vm1, %v5408_v50, 0.0  ;;  %v3414_v22 = vadd.f32 %v3413_v3, %v3412_v57  ;;  %v3417_v51 = vsel %vm376_vm1, %v5443_v7, 0.0 }
 0x2a6   : > { %v3285_v33 = vpop.f32.mrf.mxu0  ;;  %v2496_v13 = vpop.f32.mrf.mxu1 }
 0x2a7   : > { %v3109_v9 = vadd.f32 %v3077_v21, %v2855_v39  ;;  %v3031_v25 = vpop.f32.mrf.mxu3  ;;  %v3332_v18 = vmul.f32 %v3285_v33, %v4911_v8  ;;  %v6296_v39 = vld [vmem:[#allocation91_spill] sm:$0xff]  ;;  %v3416_v21 = vadd.f32 %v3415_v0, %v3414_v22  ;;  %v6299_v0 = vld [vmem:[#allocation96_spill] sm:$0xff] }
 0x2a8   : > { %v2745_v15 = vpop.f32.mrf.mxu2  ;;  %v3078_v61 = vmul.f32 %v3031_v25, %v1014_v36  ;;  %vm983_vm4 = vcmp.lt.f32.partialorder %v6296_v39, 239.5  ;;  %v6300_v39 = vld [vmem:[#allocation90_spill] sm:$0xff] }
 0x2a9   : > { %v5707_v14 = vadd.f32 %v3363_v44, %v3109_v9  ;;  %v2792_v52 = vmul.f32 %v2745_v15, %v6295_v60  ;;  %v3364_v8 = vmul.f32 %v3332_v18, %v1014_v36  ;;  %v3418_v55 = vadd.f32 %v3417_v51, %v3416_v21  ;;  %v6297_v15 = vld [vmem:[#allocation98_spill] sm:$0xff] }
 0x2aa   : > { %v1015_v35 = vsel %vm983_vm4, 1.0, %v6108_v56  ;;  %v2571_v25 = vadd.f32 %v2539_v16, %v6297_v15  ;;  %v3427_v51 = vsel %vm376_vm1, %v5572_v49, 0.0  ;;  %v3431_v15 = vsel %vm376_vm1, %v5603_v40, 0.0 }
 0x2ab   : > { %v3633_v12 = vpack.c.bf16 %v5707_v14, %v5707_v14  ;;  %v2824_v10 = vmul.f32 %v2792_v52, %v1014_v36  ;;  %v3420_v60 = vadd.f32 %v3419_v31, %v3418_v55 }
 0x2ad   : > { %3666 = vst.msk [vmem:[%s5256_s6 + $0x54] sm:$0xf] %vm3644_vm10, %v3633_v12  ;;  %v2856_v48 = vadd.f32 %v2824_v10, %v2570_v63  ;;  %v6298_v12 = vld [vmem:[#allocation88_spill] sm:$0xff]  ;;  %v3422_v63 = vadd.f32 %v3421_v38, %v3420_v60  ;;  %v3425_v10 = vsel %vm376_vm1, %v5552_v46, 0.0  ;;  %v3433_v60 = vsel %vm376_vm1, %v5614_v19, 0.0 }
 0x2ae   : > { %v3287_v59 = vpop.f32.mrf.mxu0  ;;  %v2498_v11 = vpop.f32.mrf.mxu1  ;;  %vm984_vm5 = vcmp.lt.f32.partialorder %v6298_v12, 239.5 }
 0x2af   : > { %v3110_v33 = vadd.f32 %v3078_v61, %v2856_v48  ;;  %v3033_v20 = vpop.f32.mrf.mxu3  ;;  %v3333_v2 = vmul.f32 %v3287_v59, %v4951_v28  ;;  %v2540_v28 = vmul.f32 %v2496_v13, %v6299_v0  ;;  %v3424_v59 = vadd.f32 %v3423_v43, %v3422_v63 }
 0x2b0   : > { %v2747_v42 = vpop.f32.mrf.mxu2  ;;  %v3079_v3 = vmul.f32 %v3033_v20, %v1015_v35  ;;  %v3429_v13 = vsel %vm376_vm1, %v5587_v53, 0.0  ;;  %v2541_v43 = vmul.f32 %v2498_v11, %v5020_v17  ;;  %v3435_v63 = vsel %vm376_vm1, %v5627_v32, 0.0 }
 0x2b1   : > { %v5726_v44 = vadd.f32 %v3364_v8, %v3110_v33  ;;  %v2793_v9 = vmul.f32 %v2747_v42, %v4922_v30  ;;  %v3365_v61 = vmul.f32 %v3333_v2, %v1015_v35  ;;  %v1016_v8 = vsel %vm984_vm5, 1.0, %v6108_v56 }
 0x2b2   : > { %v3426_v20 = vadd.f32 %v3425_v10, %v3424_v59 }
 0x2b3   : > { %v3634_v36 = vpack.c.bf16 %v5726_v44, %v5726_v44  ;;  %v2825_v18 = vmul.f32 %v2793_v9, %v1015_v35  ;;  %v2572_v9 = vadd.f32 %v2540_v28, %v5032_v45  ;;  %v3437_v28 = vsel %vm376_vm1, %v5638_v62, 0.0 }
 0x2b4   : > { %v3428_v35 = vadd.f32 %v3427_v51, %v3426_v20  ;;  %v3439_v20 = vsel %vm376_vm1, %v5651_v4, 0.0 }
 0x2b5   : > { %3667 = vst.msk [vmem:[%s5256_s6 + $0x58] sm:$0xf] %vm3644_vm10, %v3634_v36  ;;  %v2857_v30 = vadd.f32 %v2825_v18, %v2571_v25 }
 0x2b6   : > { %v3290_v52 = vpop.f32.mrf.mxu0  ;;  %v2501_v42 = vpop.f32.mrf.mxu1  ;;  %v3430_v18 = vadd.f32 %v3429_v13, %v3428_v35 }
 0x2b7   : > { %v3111_v57 = vadd.f32 %v3079_v3, %v2857_v30  ;;  %v3036_v22 = vpop.f32.mrf.mxu3  ;;  %v3334_v16 = vmul.f32 %v3290_v52, %v6299_v0  ;;  %v6301_v30 = vld [vmem:[#allocation94_spill] sm:$0xff] }
 0x2b8   : > { %v2750_v48 = vpop.f32.mrf.mxu2  ;;  %v3080_v38 = vmul.f32 %v3036_v22, %v1016_v8  ;;  %vm985_vm6 = vcmp.lt.f32.partialorder %v6301_v30, 239.5  ;;  %v3432_v45 = vadd.f32 %v3431_v15, %v3430_v18 }
 0x2b9   : > { %v5747_v33 = vadd.f32 %v3365_v61, %v3111_v57  ;;  %v2794_v21 = vmul.f32 %v2750_v48, %v6300_v39  ;;  %v3366_v25 = vmul.f32 %v3334_v16, %v1016_v8  ;;  %v6302_v61 = vld [vmem:[#allocation95_spill] sm:$0xff]  ;;  %v1017_v59 = vsel %vm985_vm6, 1.0, %v6108_v56 }
 0x2ba   : > { %v3434_v0 = vadd.f32 %v3433_v60, %v3432_v45  ;;  %v6306_v45 = vld [vmem:[#allocation93_spill] sm:$0xff] }
 0x2bb   : > { %v3635_v31 = vpack.c.bf16 %v5747_v33, %v5747_v33  ;;  %v2826_v55 = vmul.f32 %v2794_v21, %v1016_v8  ;;  %v6303_v8 = vld [vmem:[#allocation104_spill] sm:$0xff] }
 0x2bc   : > { %v2573_v48 = vadd.f32 %v2541_v43, %v6303_v8  ;;  %v3436_v39 = vadd.f32 %v3435_v63, %v3434_v0  ;;  %v3445_v63 = vsel %vm376_vm1, %v5686_v58, 0.0 }
 0x2bd   : > { %3668 = vst.msk [vmem:[%s5256_s6 + $0x5c] sm:$0xf] %vm3644_vm10, %v3635_v31  ;;  %v2858_v2 = vadd.f32 %v2826_v55, %v2572_v9  ;;  %v6304_v9 = vld [vmem:[#allocation92_spill] sm:$0xff] }
 0x2be   : > { %v3292_v36 = vpop.f32.mrf.mxu0  ;;  %v2503_v16 = vpop.f32.mrf.mxu1  ;;  %vm986_vm7 = vcmp.lt.f32.partialorder %v6304_v9, 239.5  ;;  %v3438_v55 = vadd.f32 %v3437_v28, %v3436_v39  ;;  %v6307_v39 = vld [vmem:[#allocation106_spill] sm:$0xff] }
 0x2bf   : > { %v3112_v52 = vadd.f32 %v3080_v38, %v2858_v2  ;;  %v3038_v12 = vpop.f32.mrf.mxu3  ;;  %v3335_v22 = vmul.f32 %v3292_v36, %v5020_v17  ;;  %v3441_v38 = vsel %vm376_vm1, %v5662_v5, 0.0  ;;  %v6305_v17 = vld [vmem:[#allocation101_spill] sm:$0xff]  ;;  %v1018_v2 = vsel %vm986_vm7, 1.0, %v6108_v56 }
 0x2c0   : > { %v2752_v3 = vpop.f32.mrf.mxu2  ;;  %v3081_v31 = vmul.f32 %v3038_v12, %v1017_v59  ;;  %v2542_v36 = vmul.f32 %v2501_v42, %v6305_v17 }
 0x2c1   : > { %v5766_v10 = vadd.f32 %v3366_v25, %v3112_v52  ;;  %v2795_v57 = vmul.f32 %v2752_v3, %v6302_v61  ;;  %v3367_v35 = vmul.f32 %v3335_v22, %v1017_v59  ;;  %v3440_v25 = vadd.f32 %v3439_v20, %v3438_v55 }
 0x2c2   : > { %v3443_v52 = vsel %vm376_vm1, %v5675_v27, 0.0  ;;  %v2574_v61 = vadd.f32 %v2542_v36, %v5097_v54  ;;  %v3449_v20 = vsel %vm376_vm1, %v5726_v44, 0.0  ;;  %v6308_v54 = vld [vmem:[#allocation100_spill] sm:$0xff] }
 0x2c3   : > { %v3636_v11 = vpack.c.bf16 %v5766_v10, %v5766_v10  ;;  %v2827_v51 = vmul.f32 %v2795_v57, %v1017_v59  ;;  %v3442_v12 = vadd.f32 %v3441_v38, %v3440_v25  ;;  %vm987_vm8 = vcmp.lt.f32.partialorder %v6308_v54, 239.5  ;;  %v6310_v25 = vld [vmem:[#allocation110_spill] sm:$0xff] }
 0x2c4   : > { %v3451_v38 = vsel %vm376_vm1, %v5747_v33, 0.0 }
 0x2c5   : > { %3669 = vst.msk [vmem:[%s5256_s6 + $0x60] sm:$0xf] %vm3644_vm10, %v3636_v11  ;;  %v2859_v13 = vadd.f32 %v2827_v51, %v2573_v48  ;;  %v3444_v28 = vadd.f32 %v3443_v52, %v3442_v12  ;;  %v3447_v11 = vsel %vm376_vm1, %v5707_v14, 0.0 }
 0x2c6   : > { %v3295_v21 = vpop.f32.mrf.mxu0  ;;  %v2506_v22 = vpop.f32.mrf.mxu1 }
 0x2c7   : > { %v3113_v15 = vadd.f32 %v3081_v31, %v2859_v13  ;;  %v3041_v60 = vpop.f32.mrf.mxu3  ;;  %v3336_v30 = vmul.f32 %v3295_v21, %v6305_v17  ;;  %v3446_v51 = vadd.f32 %v3445_v63, %v3444_v28  ;;  %v2543_v21 = vmul.f32 %v2503_v16, %v6307_v39 }
 0x2c8   : > { %v2755_v18 = vpop.f32.mrf.mxu2  ;;  %v3082_v0 = vmul.f32 %v3041_v60, %v1018_v2 }
 0x2c9   : > { %v5787_v43 = vadd.f32 %v3367_v35, %v3113_v15  ;;  %v2796_v3 = vmul.f32 %v2755_v18, %v6306_v45  ;;  %v3368_v8 = vmul.f32 %v3336_v30, %v1018_v2  ;;  %v3448_v31 = vadd.f32 %v3447_v11, %v3446_v51  ;;  %v6309_v15 = vld [vmem:[#allocation102_spill] sm:$0xff] }
 0x2ca   : > { %v2575_v16 = vadd.f32 %v2543_v21, %v6310_v25  ;;  %v3453_v18 = vsel %vm376_vm1, %v5766_v10, 0.0 }
 0x2cb   : > { %v3637_v42 = vpack.c.bf16 %v5787_v43, %v5787_v43  ;;  %v2828_v57 = vmul.f32 %v2796_v3, %v1018_v2  ;;  %v3450_v36 = vadd.f32 %v3449_v20, %v3448_v31  ;;  %v1019_v2 = vsel %vm987_vm8, 1.0, %v6108_v56  ;;  %v6313_v31 = vld [vmem:[#allocation99_spill] sm:$0xff] }
 0x2cc   : > { %v3455_v12 = vsel %vm376_vm1, %v5787_v43, 0.0 }
 0x2cd   : > { %3670 = vst.msk [vmem:[%s5256_s6 + $0x64] sm:$0xf] %vm3644_vm10, %v3637_v42  ;;  %v2860_v48 = vadd.f32 %v2828_v57, %v2574_v61  ;;  %v3452_v45 = vadd.f32 %v3451_v38, %v3450_v36  ;;  %v6311_v61 = vld [vmem:[#allocation97_spill] sm:$0xff] }
 0x2ce   : > { %v3297_v59 = vpop.f32.mrf.mxu0  ;;  %vm988_vm9 = vcmp.lt.f32.partialorder %v6311_v61, 239.5  ;;  %v6317_v61 = vld [vmem:[#allocation109_spill] sm:$0xff] }
 0x2cf   : > { %v3114_v13 = vadd.f32 %v3082_v0, %v2860_v48  ;;  %v3043_v55 = vpop.f32.mrf.mxu3  ;;  %v3337_v52 = vmul.f32 %v3297_v59, %v6307_v39  ;;  %v3454_v57 = vadd.f32 %v3453_v18, %v3452_v45  ;;  %v6312_v0 = vld [vmem:[#allocation108_spill] sm:$0xff]  ;;  %v2508_v48 = vpop.f32.mrf.mxu1  ;;  %v1020_v39 = vsel %vm988_vm9, 1.0, %v6108_v56 }
 0x2d0   : > { %v2757_v9 = vpop.f32.mrf.mxu2  ;;  %v3083_v42 = vmul.f32 %v3043_v55, %v1019_v2  ;;  %v2544_v28 = vmul.f32 %v2506_v22, %v6312_v0  ;;  %v6314_v22 = vld [vmem:[#allocation112_spill] sm:$0xff] }
 0x2d1   : > { %v5806_v35 = vadd.f32 %v3368_v8, %v3114_v13  ;;  %v2797_v17 = vmul.f32 %v2757_v9, %v6309_v15  ;;  %v3369_v8 = vmul.f32 %v3337_v52, %v1019_v2  ;;  %v3456_v51 = vadd.f32 %v3455_v12, %v3454_v57  ;;  %v6315_v52 = vld [vmem:[#allocation111_spill] sm:$0xff] }
 0x2d2   : > { %v2576_v38 = vadd.f32 %v2544_v28, %v6314_v22  ;;  %v6318_v28 = vld [vmem:[#allocation116_spill] sm:$0xff] }
 0x2d3   : > { %v3638_v60 = vpack.c.bf16 %v5806_v35, %v5806_v35  ;;  %v2829_v30 = vmul.f32 %v2797_v17, %v1019_v2  ;;  %v3457_v11 = vsel %vm376_vm1, %v5806_v35, 0.0 }
 0x2d4   : > { %v3458_v55 = vadd.f32 %v3457_v11, %v3456_v51 }
 0x2d5   : > { %3671 = vst.msk [vmem:[%s5256_s6 + $0x68] sm:$0xf] %vm3644_vm10, %v3638_v60  ;;  %v2861_v63 = vadd.f32 %v2829_v30, %v2575_v16  ;;  %v2545_v30 = vmul.f32 %v2508_v48, %v6315_v52 }
 0x2d6   : > { %v3300_v3 = vpop.f32.mrf.mxu0 }
 0x2d7   : > { %v3115_v59 = vadd.f32 %v3083_v42, %v2861_v63  ;;  %v3046_v20 = vpop.f32.mrf.mxu3  ;;  %v3338_v54 = vmul.f32 %v3300_v3, %v6312_v0  ;;  %v6316_v3 = vld [vmem:[#allocation107_spill] sm:$0xff]  ;;  %v2511_v0 = vpop.f32.mrf.mxu1  ;;  %v2577_v11 = vadd.f32 %v2545_v30, %v6318_v28 }
 0x2d8   : > { %v2760_v21 = vpop.f32.mrf.mxu2  ;;  %v3084_v25 = vmul.f32 %v3046_v20, %v1020_v39  ;;  %vm989_vm11 = vcmp.lt.f32.partialorder %v6316_v3, 239.5 }
 0x2d9   : > { %v5825_v13 = vadd.f32 %v3369_v8, %v3115_v59  ;;  %v2798_v9 = vmul.f32 %v2760_v21, %v6313_v31  ;;  %v3370_v18 = vmul.f32 %v3338_v54, %v1020_v39  ;;  %v1021_v8 = vsel %vm989_vm11, 1.0, %v6108_v56  ;;  %v6319_v31 = vld [vmem:[#allocation103_spill] sm:$0xff] }
 0x2da   : > { %vm990_vm12 = vcmp.lt.f32.partialorder %v6319_v31, 239.5 }
 0x2db   : > { %v3459_v15 = vsel %vm376_vm1, %v5825_v13, 0.0  ;;  %v3639_v17 = vpack.c.bf16 %v5825_v13, %v5825_v13  ;;  %v2830_v36 = vmul.f32 %v2798_v9, %v1020_v39  ;;  %v6320_v9 = vld [vmem:[#allocation114_spill] sm:$0xff] }
 0x2dc   : > { %v3460_v16 = vadd.f32 %v3459_v15, %v3458_v55  ;;  %v2546_v55 = vmul.f32 %v2511_v0, %v6320_v9 }
 0x2dd   : > { %3672 = vst.msk [vmem:[%s5256_s6 + $0x6c] sm:$0xf] %vm3644_vm10, %v3639_v17  ;;  %v2862_v60 = vadd.f32 %v2830_v36, %v2576_v38  ;;  %v1022_v17 = vsel %vm990_vm12, 1.0, %v6108_v56 }
 0x2de   : > { %v3302_v2 = vpop.f32.mrf.mxu0 }
 0x2df   : > { %v3116_v45 = vadd.f32 %v3084_v25, %v2862_v60  ;;  %v3048_v63 = vpop.f32.mrf.mxu3  ;;  %v3339_v51 = vmul.f32 %v3302_v2, %v6315_v52  ;;  %v2578_v52 = vadd.f32 %v2546_v55, %v5198_v23 }
 0x2e0   : > { %v2762_v12 = vpop.f32.mrf.mxu2  ;;  %v3085_v54 = vmul.f32 %v3048_v63, %v1021_v8  ;;  %v2513_v63 = vpop.f32.mrf.mxu1 }
 0x2e1   : > { %v5838_v42 = vadd.f32 %v3370_v18, %v3116_v45  ;;  %v2799_v57 = vmul.f32 %v2762_v12, %v6317_v61  ;;  %v3371_v38 = vmul.f32 %v3339_v51, %v1021_v8  ;;  %v2547_v28 = vmul.f32 %v2513_v63, %v5187_v26  ;;  %v6323_v51 = vld [vmem:[#allocation115_spill] sm:$0xff] }
 0x2e3   : > { %v3461_v59 = vsel %vm376_vm1, %v5838_v42, 0.0  ;;  %v3640_v48 = vpack.c.bf16 %v5838_v42, %v5838_v42  ;;  %v2831_v39 = vmul.f32 %v2799_v57, %v1021_v8  ;;  %v6322_v8 = vld [vmem:[#allocation113_spill] sm:$0xff] }
 0x2e4   : > { %v3462_v21 = vadd.f32 %v3461_v59, %v3460_v16  ;;  %v6321_v16 = vld [vmem:[#allocation105_spill] sm:$0xff]  ;;  %vm991_vm13 = vcmp.lt.f32.partialorder %v6322_v8, 239.5 }
 0x2e5   : > { %3673 = vst.msk [vmem:[%s5256_s6 + $0x70] sm:$0xf] %vm3644_vm10, %v3640_v48  ;;  %v2863_v20 = vadd.f32 %v2831_v39, %v2577_v11 }
 0x2e6   : > { %v3305_v22 = vpop.f32.mrf.mxu0 }
 0x2e7   : > { %v3117_v15 = vadd.f32 %v3085_v54, %v2863_v20  ;;  %v3051_v25 = vpop.f32.mrf.mxu3  ;;  %v3340_v2 = vmul.f32 %v3305_v22, %v6320_v9  ;;  %v6324_v20 = vld [vmem:[#allocation4_spill] sm:$0xff] }
 0x2e8   : > { %v2765_v36 = vpop.f32.mrf.mxu2  ;;  %v3086_v12 = vmul.f32 %v3051_v25, %v1022_v17  ;;  %v2579_v54 = vadd.f32 %v2547_v28, %v6324_v20 }
 0x2e9   : > { %v3403_v18 = vadd.f32 %v3371_v38, %v3117_v15  ;;  %v2800_v60 = vmul.f32 %v2765_v36, %v6321_v16  ;;  %v3372_v57 = vmul.f32 %v3340_v2, %v1022_v17 }
 0x2eb   : > { %v3463_v30 = vsel %vm376_vm1, %v3403_v18, 0.0  ;;  %v3641_v45 = vpack.c.bf16 %v3403_v18, %v3403_v18  ;;  %v2832_v3 = vmul.f32 %v2800_v60, %v1022_v17 }
 0x2ec   : > { %v3464_v61 = vadd.f32 %v3463_v30, %v3462_v21  ;;  %v1023_v21 = vsel %vm991_vm13, 1.0, %v6108_v56 }
 0x2ed   : > { %3674 = vst.msk [vmem:[%s5256_s6 + $0x74] sm:$0xf] %vm3644_vm10, %v3641_v45  ;;  %v2864_v0 = vadd.f32 %v2832_v3, %v2578_v52 }
 0x2ee   : > { %v3307_v59 = vpop.f32.mrf.mxu0 }
 0x2ef   : > { %v3118_v11 = vadd.f32 %v3086_v12, %v2864_v0  ;;  %v3053_v31 = vpop.f32.mrf.mxu3  ;;  %v3341_v22 = vmul.f32 %v3307_v59, %v5187_v26 }
 0x2f0   : > { %v2767_v48 = vpop.f32.mrf.mxu2  ;;  %v3087_v36 = vmul.f32 %v3053_v31, %v1023_v21 }
 0x2f1   : > { %v3404_v23 = vadd.f32 %v3372_v57, %v3118_v11  ;;  %v2801_v39 = vmul.f32 %v2767_v48, %v6323_v51  ;;  %v3373_v25 = vmul.f32 %v3341_v22, %v1023_v21 }
 0x2f3   : > { %v3465_v9 = vsel %vm376_vm1, %v3404_v23, 0.0  ;;  %v3642_v55 = vpack.c.bf16 %v3404_v23, %v3404_v23  ;;  %v2833_v38 = vmul.f32 %v2801_v39, %v1023_v21 }
 0x2f4   : > { %v3466_v15 = vadd.f32 %v3465_v9, %v3464_v61 }
 0x2f5   : > { %3675 = vst.msk [vmem:[%s5256_s6 + $0x78] sm:$0xf] %vm3644_vm10, %v3642_v55  ;;  %v2865_v17 = vadd.f32 %v2833_v38, %v2579_v54 }
 0x2f7   : > { %v3119_v2 = vadd.f32 %v3087_v36, %v2865_v17 }
 0x2f9   : > { %v3405_v16 = vadd.f32 %v3373_v25, %v3119_v2 }
 0x2fb   : > { %v3467_v60 = vsel %vm376_vm1, %v3405_v16, 0.0  ;;  %v3643_v56 = vpack.c.bf16 %v3405_v16, %v3405_v16 }
 0x2fc   : > { %v3468_v52 = vadd.f32 %v3467_v60, %v3466_v15 }
 0x2fd   : > { %3676 = vst.msk [vmem:[%s5256_s6 + $0x7c] sm:$0xf] %vm3644_vm10, %v3643_v56 }
 0x2fe   : > { %v3469_v30 = vrot.slane %v3468_v52, 4 }
 0x300   : > { %v3470_v45 = vadd.f32 %v3469_v30, %v3468_v52 }
 0x302   : > { %v3471_v26 = vrot.slane %v3470_v45, 2 }
 0x304   : > { %v3472_v3 = vadd.f32 %v3471_v26, %v3470_v45 }
 0x306   : > { %v3473_v12 = vrot.slane %v3472_v3, 1 }
 0x308   : > { %v3474_v63 = vadd.f32 %v3473_v12, %v3472_v3 }
 0x30a   : > { %3610 = vst.msk [vmem:[%s5876_s10] sm:$0x1] %vm3609_vm14, %v3474_v63  ;;  %v5880_v61 = vmul.f32 0.00390625, %v3474_v63 }
 0x30c   : > { %v5884_v57 = vsub.f32 %v5806_v35, %v5880_v61  ;;  %v5888_v0 = vsub.f32 %v5825_v13, %v5880_v61  ;;  %v5892_v28 = vsub.f32 %v5838_v42, %v5880_v61  ;;  %v5895_v11 = vsub.f32 %v3403_v18, %v5880_v61 }
 0x30d   : > { %v5898_v8 = vsub.f32 %v3404_v23, %v5880_v61  ;;  %v5901_v59 = vsub.f32 %v3405_v16, %v5880_v61  ;;  %v3476_v35 = vsub.f32 %v5249_v29, %v5880_v61  ;;  %v3477_v13 = vsub.f32 %v5283_v37, %v5880_v61 }
 0x30e   : > { %v3478_v48 = vsub.f32 %v5317_v24, %v5880_v61  ;;  %v3479_v42 = vsub.f32 %v5344_v34, %v5880_v61  ;;  %v3480_v23 = vsub.f32 %v5381_v1, %v5880_v61  ;;  %v3481_v20 = vsub.f32 %v5408_v50, %v5880_v61 }
 0x30f   : > { %v3508_v18 = vmul.f32 %v3476_v35, %v3476_v35  ;;  %v3509_v51 = vmul.f32 %v3477_v13, %v3477_v13  ;;  %v3482_v24 = vsub.f32 %v5443_v7, %v5880_v61  ;;  %v3483_v1 = vsub.f32 %v5470_v41, %v5880_v61 }
 0x310   : > { %v3510_v39 = vmul.f32 %v3478_v48, %v3478_v48  ;;  %v3511_v54 = vmul.f32 %v3479_v42, %v3479_v42  ;;  %v3512_v31 = vmul.f32 %v3480_v23, %v3480_v23  ;;  %v3513_v55 = vmul.f32 %v3481_v20, %v3481_v20 }
 0x311   : > { %v3540_v29 = vsel %vm376_vm1, %v3508_v18, 0.0  ;;  %v3541_v37 = vsel %vm376_vm1, %v3509_v51, 0.0  ;;  %v3484_v38 = vsub.f32 %v5499_v6, %v5880_v61  ;;  %v3514_v15 = vmul.f32 %v3482_v24, %v3482_v24 }
 0x312   : > { %v3542_v21 = vadd.f32 %v3541_v37, %v3540_v29  ;;  %v3543_v34 = vsel %vm376_vm1, %v3510_v39, 0.0  ;;  %v3545_v22 = vsel %vm376_vm1, %v3511_v54, 0.0  ;;  %v3547_v17 = vsel %vm376_vm1, %v3512_v31, 0.0 }
 0x313   : > { %v3485_v7 = vsub.f32 %v5523_v47, %v5880_v61  ;;  %v3515_v25 = vmul.f32 %v3483_v1, %v3483_v1  ;;  %v3549_v2 = vsel %vm376_vm1, %v3513_v55, 0.0  ;;  %v3486_v41 = vsub.f32 %v5552_v46, %v5880_v61 }
 0x314   : > { %v3544_v9 = vadd.f32 %v3543_v34, %v3542_v21  ;;  %v3516_v60 = vmul.f32 %v3484_v38, %v3484_v38  ;;  %v3551_v56 = vsel %vm376_vm1, %v3514_v15, 0.0  ;;  %v3487_v6 = vsub.f32 %v5572_v49, %v5880_v61 }
 0x315   : > { %v3517_v30 = vmul.f32 %v3485_v7, %v3485_v7  ;;  %v3553_v45 = vsel %vm376_vm1, %v3515_v25, 0.0  ;;  %v3488_v47 = vsub.f32 %v5587_v53, %v5880_v61  ;;  %v3518_v3 = vmul.f32 %v3486_v41, %v3486_v41 }
 0x316   : > { %v3546_v50 = vadd.f32 %v3545_v22, %v3544_v9  ;;  %v3555_v12 = vsel %vm376_vm1, %v3516_v60, 0.0  ;;  %v3489_v46 = vsub.f32 %v5603_v40, %v5880_v61  ;;  %v3519_v35 = vmul.f32 %v3487_v6, %v3487_v6 }
 0x317   : > { %v3557_v13 = vsel %vm376_vm1, %v3517_v30, 0.0  ;;  %v3490_v49 = vsub.f32 %v5614_v19, %v5880_v61  ;;  %v3520_v42 = vmul.f32 %v3488_v47, %v3488_v47  ;;  %v3559_v18 = vsel %vm376_vm1, %v3518_v3, 0.0 }
 0x318   : > { %v3548_v36 = vadd.f32 %v3547_v17, %v3546_v50  ;;  %v3491_v53 = vsub.f32 %v5627_v32, %v5880_v61  ;;  %v3521_v23 = vmul.f32 %v3489_v46, %v3489_v46  ;;  %v3561_v39 = vsel %vm376_vm1, %v3519_v35, 0.0 }
 0x319   : > { %v3492_v40 = vsub.f32 %v5638_v62, %v5880_v61  ;;  %v3522_v54 = vmul.f32 %v3490_v49, %v3490_v49  ;;  %v3563_v29 = vsel %vm376_vm1, %v3520_v42, 0.0  ;;  %v3493_v19 = vsub.f32 %v5651_v4, %v5880_v61 }
 0x31a   : > { %v3550_v16 = vadd.f32 %v3549_v2, %v3548_v36  ;;  %v3523_v21 = vmul.f32 %v3491_v53, %v3491_v53  ;;  %v3565_v24 = vsel %vm376_vm1, %v3521_v23, 0.0  ;;  %v3494_v32 = vsub.f32 %v5662_v5, %v5880_v61 }
 0x31b   : > { %v3524_v34 = vmul.f32 %v3492_v40, %v3492_v40  ;;  %v3567_v9 = vsel %vm376_vm1, %v3522_v54, 0.0  ;;  %v3495_v62 = vsub.f32 %v5675_v27, %v5880_v61  ;;  %v3525_v55 = vmul.f32 %v3493_v19, %v3493_v19 }
 0x31c   : > { %v3552_v52 = vadd.f32 %v3551_v56, %v3550_v16  ;;  %v3569_v22 = vsel %vm376_vm1, %v3523_v21, 0.0  ;;  %v3496_v4 = vsub.f32 %v5686_v58, %v5880_v61  ;;  %v3526_v38 = vmul.f32 %v3494_v32, %v3494_v32 }
 0x31d   : > { %v3571_v15 = vsel %vm376_vm1, %v3524_v34, 0.0  ;;  %v3497_v5 = vsub.f32 %v5707_v14, %v5880_v61  ;;  %v3527_v36 = vmul.f32 %v3495_v62, %v3495_v62  ;;  %v3573_v7 = vsel %vm376_vm1, %v3525_v55, 0.0 }
 0x31e   : > { %v3554_v26 = vadd.f32 %v3553_v45, %v3552_v52  ;;  %v3498_v27 = vsub.f32 %v5726_v44, %v5880_v61  ;;  %v3528_v2 = vmul.f32 %v3496_v4, %v3496_v4  ;;  %v3575_v16 = vsel %vm376_vm1, %v3526_v38, 0.0 }
 0x31f   : > { %v3499_v58 = vsub.f32 %v5747_v33, %v5880_v61  ;;  %v3529_v60 = vmul.f32 %v3497_v5, %v3497_v5  ;;  %v3577_v56 = vsel %vm376_vm1, %v3527_v36, 0.0  ;;  %v3500_v14 = vsub.f32 %v5766_v10, %v5880_v61 }
 0x320   : > { %v3556_v63 = vadd.f32 %v3555_v12, %v3554_v26  ;;  %v3530_v6 = vmul.f32 %v3498_v27, %v3498_v27  ;;  %v3579_v30 = vsel %vm376_vm1, %v3528_v2, 0.0  ;;  %v3501_v44 = vsub.f32 %v5787_v43, %v5880_v61 }
 0x321   : > { %v3531_v26 = vmul.f32 %v3499_v58, %v3499_v58  ;;  %v3581_v47 = vsel %vm376_vm1, %v3529_v60, 0.0  ;;  %v3532_v12 = vmul.f32 %v3500_v14, %v3500_v14  ;;  %v3534_v10 = vmul.f32 %v5884_v57, %v5884_v57 }
 0x322   : > { %v3558_v48 = vadd.f32 %v3557_v13, %v3556_v63  ;;  %v3583_v33 = vsel %vm376_vm1, %v3530_v6, 0.0  ;;  %v3533_v46 = vmul.f32 %v3501_v44, %v3501_v44  ;;  %v3535_v43 = vmul.f32 %v5888_v0, %v5888_v0 }
 0x323   : > { %v3585_v35 = vsel %vm376_vm1, %v3531_v26, 0.0  ;;  %v3537_v23 = vmul.f32 %v5895_v11, %v5895_v11  ;;  %v3539_v54 = vmul.f32 %v5901_v59, %v5901_v59 }
 0x324   : > { %v3560_v51 = vadd.f32 %v3559_v18, %v3558_v48  ;;  %v3587_v48 = vsel %vm376_vm1, %v3532_v12, 0.0  ;;  %v3589_v61 = vsel %vm376_vm1, %v3533_v46, 0.0  ;;  %v3536_v18 = vmul.f32 %v5892_v28, %v5892_v28 }
 0x325   : > { %v3593_v57 = vsel %vm376_vm1, %v3535_v43, 0.0  ;;  %v3597_v28 = vsel %vm376_vm1, %v3537_v23, 0.0  ;;  %v3601_v11 = vsel %vm376_vm1, %v3539_v54, 0.0 }
 0x326   : > { %v3562_v20 = vadd.f32 %v3561_v39, %v3560_v51  ;;  %v3591_v51 = vsel %vm376_vm1, %v3534_v10, 0.0  ;;  %v3595_v0 = vsel %vm376_vm1, %v3536_v18, 0.0 }
 0x328   : > { %v3564_v37 = vadd.f32 %v3563_v29, %v3562_v20  ;;  %v3538_v20 = vmul.f32 %v5898_v8, %v5898_v8 }
 0x32a   : > { %v3566_v31 = vadd.f32 %v3565_v24, %v3564_v37  ;;  %v3599_v37 = vsel %vm376_vm1, %v3538_v20, 0.0 }
 0x32c   : > { %v3568_v1 = vadd.f32 %v3567_v9, %v3566_v31 }
 0x32e   : > { %v3570_v50 = vadd.f32 %v3569_v22, %v3568_v1 }
 0x330   : > { %v3572_v17 = vadd.f32 %v3571_v15, %v3570_v50 }
 0x332   : > { %v3574_v25 = vadd.f32 %v3573_v7, %v3572_v17 }
 0x334   : > { %v3576_v41 = vadd.f32 %v3575_v16, %v3574_v25 }
 0x336   : > { %v3578_v52 = vadd.f32 %v3577_v56, %v3576_v41 }
 0x338   : > { %v3580_v45 = vadd.f32 %v3579_v30, %v3578_v52 }
 0x33a   : > { %v3582_v3 = vadd.f32 %v3581_v47, %v3580_v45 }
 0x33c   : > { %v3584_v63 = vadd.f32 %v3583_v33, %v3582_v3 }
 0x33e   : > { %v3586_v13 = vadd.f32 %v3585_v35, %v3584_v63 }
 0x340   : > { %v3588_v49 = vadd.f32 %v3587_v48, %v3586_v13 }
 0x342   : > { %v3590_v42 = vadd.f32 %v3589_v61, %v3588_v49 }
 0x344   : > { %v3592_v53 = vadd.f32 %v3591_v51, %v3590_v42 }
 0x346   : > { %v3594_v39 = vadd.f32 %v3593_v57, %v3592_v53 }
 0x348   : > { %v3596_v40 = vadd.f32 %v3595_v0, %v3594_v39 }
 0x34a   : > { %v3598_v29 = vadd.f32 %v3597_v28, %v3596_v40 }
 0x34c   : > { %v3600_v19 = vadd.f32 %v3599_v37, %v3598_v29 }
 0x34e   : > { %v3602_v21 = vadd.f32 %v3601_v11, %v3600_v19 }
 0x350   : > { %v3603_v24 = vrot.slane %v3602_v21, 4 }
 0x352   : > { %v3604_v31 = vadd.f32 %v3603_v24, %v3602_v21 }
 0x354   : > { %v3605_v32 = vrot.slane %v3604_v31, 2 }
 0x356   : > { %v3606_v8 = vadd.f32 %v3605_v32, %v3604_v31 }
 0x358   : > { %v3607_v34 = vrot.slane %v3606_v8, 1 }
 0x35a   : > { %v3608_v9 = vadd.f32 %v3607_v34, %v3606_v8 }
 0x35c   : > { %3611 = vst.msk [vmem:[%s5876_s10 + $0x1] sm:$0x1] %vm3609_vm14, %v3608_v9 }
 0x35d PF: > { %s16_s18 = sadd.s32 1, %s3950_s18  }
 0x35e   : > { %p13_p5 = scmp.ge.s32.totalorder %s16_s18, 4  }
 0x360   :  { %15 = sbr.rel (!%p13_p5) target bundleno = 1 (0x1), region = 86 }

</bundles_post_ra>
